<compile_context>
chip_gen: v7x
topology: tpu7x:2x2x1
jax: 0.10.0
libtpu: 0.0.40
codegen_flags: <defaults>
</compile_context>

<pallas_src>
import functools
import math

import numpy as np

import jax
import jax.numpy as jnp
from jax.experimental import pallas as pl
from jax.experimental.pallas import tpu as pltpu


_VMEM_LIMIT = 32 * 1024 * 1024  # fits v7x's 64 MiB physical VMEM with headroom


def _cparams(n_grid_dims):
    return pltpu.CompilerParams(
        dimension_semantics=("parallel",) * n_grid_dims,
        vmem_limit_bytes=_VMEM_LIMIT,
    )


def _col_lt(Mp, Wp, W):
    """(1, Mp) bool mask of flat padded-row positions whose column (p mod Wp)
    is < W.  Computed from a lane iota with log2(H) conditional subtractions so
    no vector div/rem is needed (all constants are static Python ints)."""
    c = jax.lax.broadcasted_iota(jnp.int32, (1, Mp), 1)
    k = pl.next_power_of_2(max(Mp // Wp, 1))
    while k >= 1:
        c = jnp.where(c >= k * Wp, c - k * Wp, c)
        k //= 2
    return c < W


# ---------------------------------------------------------------------------
# Kernel 1: 3x3 conv (stride 1, pad 1) + bias + fused BN partial statistics
# ---------------------------------------------------------------------------
def _make_conv_kernel(H, W, Cin):
    Wp = W + 2
    Mp = H * Wp

    def kernel(xf_ref, w_ref, b_ref, y_ref, s_ref, q_ref, col_ref):
        # xf_ref : (1, Cin, Lp)   zero-padded channels-first image, spatial flat
        # w_ref  : (Cout, 9*Cin)  column index = tap*Cin + cin
        # b_ref  : (Cout, 1)
        # y_ref  : (1, Cout, Mp)  conv+bias in padded-flat row layout
        # s_ref  : (1, Cout, 1)   per-image channel sum   (valid positions only)
        # q_ref  : (1, Cout, 1)   per-image channel sum of squares
        # col_ref: (9*Cin, Mp)    VMEM scratch: in-VMEM im2col operand
        for t in range(9):                             # 9 static slab copies
            dy, dx = divmod(t, 3)
            col_ref[pl.ds(t * Cin, Cin), :] = xf_ref[0, :, pl.ds(dy * Wp + dx, Mp)]
        # one K = 9*Cin MXU matmul instead of nine K = Cin matmuls
        acc = jnp.dot(w_ref[...], col_ref[...],
                      preferred_element_type=jnp.float32) + b_ref[...]
        y_ref[0] = acc
        mask = _col_lt(Mp, Wp, W)                      # wrap columns excluded
        zm = jnp.where(mask, acc, 0.0)
        s_ref[0] = jnp.sum(zm, axis=1, keepdims=True)
        q_ref[0] = jnp.sum(zm * acc, axis=1, keepdims=True)

    return kernel


def conv3x3_bias_stats(xf, H, W, w_oihw, bias):
    """F.conv2d(k=3, s=1, p=1) + bias on a channels-first, zero-padded,
    spatially flattened input (N, Cin, (H+3)*(W+2)).  Returns the conv output
    in channels-first padded-flat layout (N, Cout, H*(W+2)) plus per-image
    per-channel sum / sum-of-squares of the valid outputs (for fused BN)."""
    N, Cin, Lp = xf.shape
    Wp = W + 2
    Mp = H * Wp
    assert Lp == (H + 3) * Wp, (Lp, H, W)
    Cout = w_oihw.shape[0]
    K9 = 9 * Cin
    # (Cout, Cin, 3, 3) -> (Cout, 3, 3, Cin) -> (Cout, 9*Cin): col = tap*Cin+cin
    w2 = jnp.transpose(w_oihw, (0, 2, 3, 1)).reshape(Cout, K9)
    b2 = bias.reshape(Cout, 1)

    y, s, q = pl.pallas_call(
        _make_conv_kernel(H, W, Cin),
        out_shape=(
            jax.ShapeDtypeStruct((N, Cout, Mp), jnp.float32),
            jax.ShapeDtypeStruct((N, Cout, 1), jnp.float32),
            jax.ShapeDtypeStruct((N, Cout, 1), jnp.float32),
        ),
        grid=(N,),
        in_specs=[
            pl.BlockSpec((1, Cin, Lp), lambda n: (n, 0, 0)),
            pl.BlockSpec((Cout, K9), lambda n: (0, 0)),
            pl.BlockSpec((Cout, 1), lambda n: (0, 0)),
        ],
        out_specs=(
            pl.BlockSpec((1, Cout, Mp), lambda n: (n, 0, 0)),
            pl.BlockSpec((1, Cout, 1), lambda n: (n, 0, 0)),
            pl.BlockSpec((1, Cout, 1), lambda n: (n, 0, 0)),
        ),
        scratch_shapes=[pltpu.VMEM((K9, Mp), jnp.float32)],
        compiler_params=_cparams(1),
    )(xf, w2, b2)
    return y, s, q


# ---------------------------------------------------------------------------
# Kernel 2: fused BN-apply + ReLU + MaxPool2d(2, 2) that writes the pooled
# activation directly into the NEXT conv's zero-padded padded-flat layout.
# ---------------------------------------------------------------------------
def _affine_relu_pool_kernel(y_ref, sc_ref, sh_ref, sel_ref, o_ref):
    # y_ref  : (1, C, Mp)          conv output, channels-first padded-flat
    # sc/sh  : (C, 1)              BN scale / shift
    # sel_ref: (4, Mp, Lp_next)    0/1 selection matrices; column j of sel[k]
    #                              picks the k-th element of the 2x2 window that
    #                              feeds padded-flat output position j (all-zero
    #                              column for pad positions).
    # o_ref  : (1, C, Lp_next)     next conv layer's padded-flat input
    z = jnp.maximum(y_ref[0] * sc_ref[...] + sh_ref[...], 0.0)  # BN+ReLU, whole block
    r = jnp.dot(z, sel_ref[0], preferred_element_type=jnp.float32)
    for k in range(1, 4):
        r = jnp.maximum(r, jnp.dot(z, sel_ref[k], preferred_element_type=jnp.float32))
    o_ref[0] = r   # pad rows/cols come out exactly 0 (ReLU >= 0, zero select cols)


@functools.lru_cache(maxsize=None)
def _pool_select_np(H, W):
    """0/1 matrices (4, H*(W+2), (H//2+3)*(W//2+2)) mapping a padded-flat conv
    output onto the NEXT layer's zero-padded padded-flat input, one matrix per
    element of the 2x2 pooling window."""
    Wp = W + 2
    Ho, Wo = H // 2, W // 2
    Hp2, Wp2 = Ho + 3, Wo + 2
    sel = np.zeros((4, H * Wp, Hp2 * Wp2), np.float32)
    for a in range(2):
        for b in range(2):
            k = 2 * a + b
            for ho in range(Ho):
                for wo in range(Wo):
                    src = (2 * ho + a) * Wp + (2 * wo + b)
                    dst = (ho + 1) * Wp2 + (wo + 1)
                    sel[k, src, dst] = 1.0
    return sel


def affine_relu_pool(y, scale, shift, H, W):
    N, C, Mp = y.shape
    assert Mp == H * (W + 2)
    Ho, Wo = H // 2, W // 2
    Lp2 = (Ho + 3) * (Wo + 2)
    sel = jnp.asarray(_pool_select_np(H, W))   # constant, folded at trace time
    return pl.pallas_call(
        _affine_relu_pool_kernel,
        out_shape=jax.ShapeDtypeStruct((N, C, Lp2), jnp.float32),
        grid=(N,),
        in_specs=[
            pl.BlockSpec((1, C, Mp), lambda n: (n, 0, 0)),
            pl.BlockSpec((C, 1), lambda n: (0, 0)),
            pl.BlockSpec((C, 1), lambda n: (0, 0)),
            pl.BlockSpec((4, Mp, Lp2), lambda n: (0, 0, 0)),
        ],
        out_specs=pl.BlockSpec((1, C, Lp2), lambda n: (n, 0, 0)),
        compiler_params=_cparams(1),
    )(y, scale.reshape(C, 1), shift.reshape(C, 1), sel)


# ---------------------------------------------------------------------------
# Kernel 3: network head — BN-apply + ReLU + the trailing max-pools collapsed
# to a global HxW max (spatial ends at 1x1) + Linear classifier, all fused.
# ---------------------------------------------------------------------------
def _make_head_kernel(H, W):
    Wp = W + 2
    Mp = H * Wp

    def kernel(y_ref, sc_ref, sh_ref, wl_ref, bl_ref, o_ref):
        # y_ref: (1, C, Mp)  sc/sh: (C, 1)  wl: (num_classes, C)  bl: (nc, 1)
        # o_ref: (1, num_classes, 1)
        z = jnp.maximum(y_ref[0] * sc_ref[...] + sh_ref[...], 0.0)   # BN + ReLU
        mask = _col_lt(Mp, Wp, W)
        # ReLU output >= 0, so zeroing the wrap columns and maxing over all
        # lanes equals the max over the valid HxW window.
        feat = jnp.max(jnp.where(mask, z, 0.0), axis=1, keepdims=True)   # (C, 1)
        o_ref[0] = jnp.dot(wl_ref[...], feat,
                           preferred_element_type=jnp.float32) + bl_ref[...]

    return kernel


def bn_relu_globalpool_linear(y, scale, shift, H, W, wl, bl):
    N, C, Mp = y.shape
    assert Mp == H * (W + 2)
    NC = wl.shape[0]
    out = pl.pallas_call(
        _make_head_kernel(H, W),
        out_shape=jax.ShapeDtypeStruct((N, NC, 1), jnp.float32),
        grid=(N,),
        in_specs=[
            pl.BlockSpec((1, C, Mp), lambda n: (n, 0, 0)),
            pl.BlockSpec((C, 1), lambda n: (0, 0)),
            pl.BlockSpec((C, 1), lambda n: (0, 0)),
            pl.BlockSpec((NC, C), lambda n: (0, 0)),
            pl.BlockSpec((NC, 1), lambda n: (0, 0)),
        ],
        out_specs=pl.BlockSpec((1, NC, 1), lambda n: (n, 0, 0)),
        compiler_params=_cparams(1),
    )(y, scale.reshape(C, 1), shift.reshape(C, 1), wl, bl.reshape(NC, 1))
    return out.reshape(N, NC)


# ---------------------------------------------------------------------------
# Glue: BN scale/shift from the fused partial statistics (tiny vectors)
# ---------------------------------------------------------------------------
def _bn_scale_shift(s, q, count, gamma, beta, eps=1e-5):
    # s, q: (N, C, 1) per-image channel sum / sum-of-squares (valid pixels only)
    ssum = jnp.sum(s, axis=(0, 2))
    sqs = jnp.sum(q, axis=(0, 2))
    mean = ssum / count
    # TODO(synk): E[x^2]-E[x]^2 in f32 is cancellation-prone late in training;
    # a shifted/Welford reduction would track PyTorch more tightly there.
    var = jnp.maximum(sqs / count - mean * mean, 0.0)   # biased (training mode)
    scale = gamma * jax.lax.rsqrt(var + eps)
    shift = beta - mean * scale
    return scale, shift


def conv_bn_relu_pool_block(xf, H, W, layer_params, eps=1e-5):
    """Conv3x3(pad=1) + BatchNorm2d(batch stats) + ReLU + MaxPool2d(2, 2);
    output already in the next conv's padded-flat channels-first layout."""
    w, b, gamma, beta = layer_params
    N = xf.shape[0]
    y, s, q = conv3x3_bias_stats(xf, H, W, w, b)
    scale, shift = _bn_scale_shift(s, q, float(N * H * W), gamma, beta, eps)
    return affine_relu_pool(y, scale, shift, H, W)


def conv_bn_relu_head_block(xf, H, W, layer_params, wl, bl, eps=1e-5):
    """Last conv block fused with the trailing max-pools (spatial -> 1x1) and
    the Linear classifier."""
    w, b, gamma, beta = layer_params
    N = xf.shape[0]
    y, s, q = conv3x3_bias_stats(xf, H, W, w, b)
    scale, shift = _bn_scale_shift(s, q, float(N * H * W), gamma, beta, eps)
    return bn_relu_globalpool_linear(y, scale, shift, H, W, wl, bl)


# ---------------------------------------------------------------------------
# Model: VGG(configuration, image_channel=3, num_classes=10, batch_norm=True)
# ---------------------------------------------------------------------------
CONFIGURATION = [64, "M", 128, "M", 512, "M", "M"]
IMAGE_CHANNEL = 3            # != 1, so the ZeroPad2d(2) branch is not taken
NUM_CLASSES = 10
WIDTH_FACTOR = 1.0 / 8.0     # channels 8/16/64; classifier in = int(512/8) = 64


def init_params(key):
    params = {"conv": [], "linear": None}
    in_ch = IMAGE_CHANNEL
    for item in CONFIGURATION:
        if isinstance(item, str):
            continue
        out_ch = int(item * WIDTH_FACTOR)
        fan_in = in_ch * 3 * 3
        bound = 1.0 / math.sqrt(fan_in)      # kaiming_uniform(a=sqrt(5)) bound
        key, kw, kb = jax.random.split(key, 3)
        w = jax.random.uniform(kw, (out_ch, in_ch, 3, 3), jnp.float32, -bound, bound)
        b = jax.random.uniform(kb, (out_ch,), jnp.float32, -bound, bound)
        gamma = jnp.ones((out_ch,), jnp.float32)
        beta = jnp.zeros((out_ch,), jnp.float32)
        params["conv"].append((w, b, gamma, beta))
        in_ch = out_ch
    feat = int(512 * WIDTH_FACTOR)
    bound = 1.0 / math.sqrt(feat)
    key, kw, kb = jax.random.split(key, 3)
    wl = jax.random.uniform(kw, (NUM_CLASSES, feat), jnp.float32, -bound, bound)
    bl = jax.random.uniform(kb, (NUM_CLASSES,), jnp.float32, -bound, bound)
    params["linear"] = (wl, bl)
    return params


def vgg_forward(params, x_nchw):
    N, C0, H, W = x_nchw.shape
    # One-time zero pad of the raw NCHW input into the conv layout
    # (1 row top / 2 rows bottom / 1 col each side), spatially flattened.
    # All later layers stay in this layout — no per-layer jnp.pad round trips.
    xp = jnp.pad(x_nchw, ((0, 0), (0, 0), (1, 2), (1, 1)))
    x = xp.reshape(N, C0, (H + 3) * (W + 2))

    # Group the configuration into (conv_channels, n_trailing_pools) blocks.
    blocks = []
    for item in CONFIGURATION:
        if isinstance(item, str):
            # TODO(synk): only 'M' (MaxPool2d(k=2, s=2, p=0)) is implemented;
            # 'A' (avg pool) and SubSampling entries are not.
            assert item == "M" and blocks, "unsupported configuration entry"
            blocks[-1][1] += 1
        else:
            blocks.append([item, 0])

    wl, bl = params["linear"]
    for bi, (_, npool) in enumerate(blocks):
        last = bi == len(blocks) - 1
        if not last:
            # TODO(synk): convs not followed by exactly one 'M' are not needed
            # by this configuration and are not implemented.
            assert npool == 1
            x = conv_bn_relu_pool_block(x, H, W, params["conv"][bi])
            H, W = H // 2, W // 2
        else:
            # The trailing pools take the spatial extent exactly to 1x1, so they
            # collapse to a single global max fused with the classifier.
            assert H == W == 2 ** npool
            x = conv_bn_relu_head_block(x, H, W, params["conv"][bi], wl, bl)
    return x


# ---------------------------------------------------------------------------
# Pure-JAX reference (XLA ops only) for a correctness check of the kernels.
# ---------------------------------------------------------------------------
def _reference_forward(params, x):
    h = x
    ci = 0
    for item in CONFIGURATION:
        if isinstance(item, str):
            h = jax.lax.reduce_window(h, -jnp.inf, jax.lax.max,
                                      (1, 1, 2, 2), (1, 1, 2, 2), "VALID")
        else:
            w, b, gamma, beta = params["conv"][ci]
            ci += 1
            h = jax.lax.conv_general_dilated(
                h, w, (1, 1), ((1, 1), (1, 1)),
                dimension_numbers=("NCHW", "OIHW", "NCHW"))
            h = h + b.reshape(1, -1, 1, 1)
            mean = jnp.mean(h, axis=(0, 2, 3), keepdims=True)
            var = jnp.mean(jnp.square(h - mean), axis=(0, 2, 3), keepdims=True)
            h = (gamma.reshape(1, -1, 1, 1) * (h - mean) * jax.lax.rsqrt(var + 1e-5)
                 + beta.reshape(1, -1, 1, 1))
            h = jnp.maximum(h, 0.0)
    wl, bl = params["linear"]
    return h.reshape(h.shape[0], -1) @ wl.T + bl


if __name__ == "__main__":
    key = jax.random.PRNGKey(0)
    key, kx = jax.random.split(key)
    x = jax.random.normal(kx, (2, IMAGE_CHANNEL, 16, 16), jnp.float32)   # NCHW
    params = init_params(key)

    fwd = jax.jit(vgg_forward)
    out = jax.block_until_ready(fwd(params, x))
    assert out.shape == (2, NUM_CLASSES), out.shape
    assert bool(jnp.all(jnp.isfinite(out)))

    ref = jax.block_until_ready(jax.jit(_reference_forward)(params, x))
    np.testing.assert_allclose(np.asarray(out), np.asarray(ref), rtol=1e-2, atol=1e-2)

    print("KERNEL_OK")
</pallas_src>

<mosaic_0001>
module attributes {stable_mosaic.version = 11 : i64} {
  func.func @kernel(%arg0: i32, %arg1: memref<1x8x110xf32, #tpu.memory_space<vmem>>, %arg2: memref<16x72xf32, #tpu.memory_space<vmem>>, %arg3: memref<16x1xf32, #tpu.memory_space<vmem>>, %arg4: memref<1x16x80xf32, #tpu.memory_space<vmem>>, %arg5: memref<1x16x1xf32, #tpu.memory_space<vmem>>, %arg6: memref<1x16x1xf32, #tpu.memory_space<vmem>>, %arg7: memref<72x80xf32, #tpu.memory_space<vmem>>) attributes {dimension_semantics = [#tpu.dimension_semantics<parallel>], iteration_bounds = array<i64: 2>, scalar_prefetch = 0 : i64, scratch_operands = 1 : i64, tpu.core_type = #tpu.core_type<tc>, window_params = [{transform_indices = @transform_0, window_bounds = array<i64: 1, 8, 110>}, {pipeline_mode = #tpu.pipeline_mode<synchronous>, transform_indices = @transform_1, window_bounds = array<i64: 16, 72>}, {pipeline_mode = #tpu.pipeline_mode<synchronous>, transform_indices = @transform_2, window_bounds = array<i64: 16, 1>}, {transform_indices = @transform_3, window_bounds = array<i64: 1, 16, 80>}, {transform_indices = @transform_4, window_bounds = array<i64: 1, 16, 1>}, {transform_indices = @transform_5, window_bounds = array<i64: 1, 16, 1>}]} {
    %c0 = arith.constant 0 : index
    %c0_0 = arith.constant 0 : index
    %c0_1 = arith.constant 0 : index
    %0 = vector.load %arg1[%c0, %c0_0, %c0_1] : memref<1x8x110xf32, #tpu.memory_space<vmem>>, vector<1x8x80xf32>
    %1 = vector.shape_cast %0 : vector<1x8x80xf32> to vector<8x80xf32>
    %c0_2 = arith.constant 0 : index
    %c0_3 = arith.constant 0 : index
    %2 = vector.load %arg7[%c0_2, %c0_3] : memref<72x80xf32, #tpu.memory_space<vmem>>, vector<8x80xf32>
    tpu.vector_store %arg7[%c0_2, %c0_3], %1 {strides = array<i32>} : memref<72x80xf32, #tpu.memory_space<vmem>>, vector<8x80xf32>,
    %c0_4 = arith.constant 0 : index
    %c0_5 = arith.constant 0 : index
    %c1 = arith.constant 1 : index
    %3 = vector.load %arg1[%c0_4, %c0_5, %c1] : memref<1x8x110xf32, #tpu.memory_space<vmem>>, vector<1x8x80xf32>
    %4 = vector.shape_cast %3 : vector<1x8x80xf32> to vector<8x80xf32>
    %c8 = arith.constant 8 : index
    %c0_6 = arith.constant 0 : index
    %5 = vector.load %arg7[%c8, %c0_6] : memref<72x80xf32, #tpu.memory_space<vmem>>, vector<8x80xf32>
    tpu.vector_store %arg7[%c8, %c0_6], %4 {strides = array<i32>} : memref<72x80xf32, #tpu.memory_space<vmem>>, vector<8x80xf32>,
    %c0_7 = arith.constant 0 : index
    %c0_8 = arith.constant 0 : index
    %c2 = arith.constant 2 : index
    %6 = vector.load %arg1[%c0_7, %c0_8, %c2] : memref<1x8x110xf32, #tpu.memory_space<vmem>>, vector<1x8x80xf32>
    %7 = vector.shape_cast %6 : vector<1x8x80xf32> to vector<8x80xf32>
    %c16 = arith.constant 16 : index
    %c0_9 = arith.constant 0 : index
    %8 = vector.load %arg7[%c16, %c0_9] : memref<72x80xf32, #tpu.memory_space<vmem>>, vector<8x80xf32>
    tpu.vector_store %arg7[%c16, %c0_9], %7 {strides = array<i32>} : memref<72x80xf32, #tpu.memory_space<vmem>>, vector<8x80xf32>,
    %c0_10 = arith.constant 0 : index
    %c0_11 = arith.constant 0 : index
    %c10 = arith.constant 10 : index
    %9 = vector.load %arg1[%c0_10, %c0_11, %c10] : memref<1x8x110xf32, #tpu.memory_space<vmem>>, vector<1x8x80xf32>
    %10 = vector.shape_cast %9 : vector<1x8x80xf32> to vector<8x80xf32>
    %c24 = arith.constant 24 : index
    %c0_12 = arith.constant 0 : index
    %11 = vector.load %arg7[%c24, %c0_12] : memref<72x80xf32, #tpu.memory_space<vmem>>, vector<8x80xf32>
    tpu.vector_store %arg7[%c24, %c0_12], %10 {strides = array<i32>} : memref<72x80xf32, #tpu.memory_space<vmem>>, vector<8x80xf32>,
    %c0_13 = arith.constant 0 : index
    %c0_14 = arith.constant 0 : index
    %c11 = arith.constant 11 : index
    %12 = vector.load %arg1[%c0_13, %c0_14, %c11] : memref<1x8x110xf32, #tpu.memory_space<vmem>>, vector<1x8x80xf32>
    %13 = vector.shape_cast %12 : vector<1x8x80xf32> to vector<8x80xf32>
    %c32 = arith.constant 32 : index
    %c0_15 = arith.constant 0 : index
    %14 = vector.load %arg7[%c32, %c0_15] : memref<72x80xf32, #tpu.memory_space<vmem>>, vector<8x80xf32>
    tpu.vector_store %arg7[%c32, %c0_15], %13 {strides = array<i32>} : memref<72x80xf32, #tpu.memory_space<vmem>>, vector<8x80xf32>,
    %c0_16 = arith.constant 0 : index
    %c0_17 = arith.constant 0 : index
    %c12 = arith.constant 12 : index
    %15 = vector.load %arg1[%c0_16, %c0_17, %c12] : memref<1x8x110xf32, #tpu.memory_space<vmem>>, vector<1x8x80xf32>
    %16 = vector.shape_cast %15 : vector<1x8x80xf32> to vector<8x80xf32>
    %c40 = arith.constant 40 : index
    %c0_18 = arith.constant 0 : index
    %17 = vector.load %arg7[%c40, %c0_18] : memref<72x80xf32, #tpu.memory_space<vmem>>, vector<8x80xf32>
    tpu.vector_store %arg7[%c40, %c0_18], %16 {strides = array<i32>} : memref<72x80xf32, #tpu.memory_space<vmem>>, vector<8x80xf32>,
    %c0_19 = arith.constant 0 : index
    %c0_20 = arith.constant 0 : index
    %c20 = arith.constant 20 : index
    %18 = vector.load %arg1[%c0_19, %c0_20, %c20] : memref<1x8x110xf32, #tpu.memory_space<vmem>>, vector<1x8x80xf32>
    %19 = vector.shape_cast %18 : vector<1x8x80xf32> to vector<8x80xf32>
    %c48 = arith.constant 48 : index
    %c0_21 = arith.constant 0 : index
    %20 = vector.load %arg7[%c48, %c0_21] : memref<72x80xf32, #tpu.memory_space<vmem>>, vector<8x80xf32>
    tpu.vector_store %arg7[%c48, %c0_21], %19 {strides = array<i32>} : memref<72x80xf32, #tpu.memory_space<vmem>>, vector<8x80xf32>,
    %c0_22 = arith.constant 0 : index
    %c0_23 = arith.constant 0 : index
    %c21 = arith.constant 21 : index
    %21 = vector.load %arg1[%c0_22, %c0_23, %c21] : memref<1x8x110xf32, #tpu.memory_space<vmem>>, vector<1x8x80xf32>
    %22 = vector.shape_cast %21 : vector<1x8x80xf32> to vector<8x80xf32>
    %c56 = arith.constant 56 : index
    %c0_24 = arith.constant 0 : index
    %23 = vector.load %arg7[%c56, %c0_24] : memref<72x80xf32, #tpu.memory_space<vmem>>, vector<8x80xf32>
    tpu.vector_store %arg7[%c56, %c0_24], %22 {strides = array<i32>} : memref<72x80xf32, #tpu.memory_space<vmem>>, vector<8x80xf32>,
    %c0_25 = arith.constant 0 : index
    %c0_26 = arith.constant 0 : index
    %c22 = arith.constant 22 : index
    %24 = vector.load %arg1[%c0_25, %c0_26, %c22] : memref<1x8x110xf32, #tpu.memory_space<vmem>>, vector<1x8x80xf32>
    %25 = vector.shape_cast %24 : vector<1x8x80xf32> to vector<8x80xf32>
    %c64 = arith.constant 64 : index
    %c0_27 = arith.constant 0 : index
    %26 = vector.load %arg7[%c64, %c0_27] : memref<72x80xf32, #tpu.memory_space<vmem>>, vector<8x80xf32>
    tpu.vector_store %arg7[%c64, %c0_27], %25 {strides = array<i32>} : memref<72x80xf32, #tpu.memory_space<vmem>>, vector<8x80xf32>,
    %c0_28 = arith.constant 0 : index
    %c0_29 = arith.constant 0 : index
    %27 = vector.load %arg2[%c0_28, %c0_29] : memref<16x72xf32, #tpu.memory_space<vmem>>, vector<16x72xf32>
    %c0_30 = arith.constant 0 : index
    %c0_31 = arith.constant 0 : index
    %28 = vector.load %arg7[%c0_30, %c0_31] : memref<72x80xf32, #tpu.memory_space<vmem>>, vector<72x80xf32>
    %cst = arith.constant dense<0.000000e+00> : vector<16x80xf32>
    %29 = tpu.matmul %27, %28, %cst {dimension_numbers = #tpu.dot_dimension_numbers<[1], [0], [0], [1], [0, 0, 1, 1], [], []>} : vector<16x72xf32>, vector<72x80xf32>, vector<16x80xf32> -> vector<16x80xf32>
    %c0_32 = arith.constant 0 : index
    %c0_33 = arith.constant 0 : index
    %30 = vector.load %arg3[%c0_32, %c0_33] : memref<16x1xf32, #tpu.memory_space<vmem>>, vector<16x1xf32>
    %31 = vector.broadcast %30 : vector<16x1xf32> to vector<16x80xf32>
    %32 = arith.addf %29, %31 : vector<16x80xf32>
    %c0_34 = arith.constant 0 : index
    %c0_35 = arith.constant 0 : index
    %c0_36 = arith.constant 0 : index
    %33 = vector.load %arg4[%c0_34, %c0_35, %c0_36] : memref<1x16x80xf32, #tpu.memory_space<vmem>>, vector<1x16x80xf32>
    %34 = vector.shape_cast %33 : vector<1x16x80xf32> to vector<16x80xf32>
    %35 = vector.shape_cast %32 : vector<16x80xf32> to vector<1x16x80xf32>
    tpu.vector_store %arg4[%c0_34, %c0_35, %c0_36], %35 {strides = array<i32>} : memref<1x16x80xf32, #tpu.memory_space<vmem>>, vector<1x16x80xf32>,
    %36 = tpu.iota {dimensions = array<i32: 1>} : vector<1x80xi32>
    %c80_i32 = arith.constant 80 : i32
    %37 = vector.broadcast %c80_i32 : i32 to vector<1x80xi32>
    %38 = arith.cmpi sge, %36, %37 : vector<1x80xi32>
    %c80_i32_37 = arith.constant 80 : i32
    %39 = vector.broadcast %c80_i32_37 : i32 to vector<1x80xi32>
    %40 = arith.subi %36, %39 : vector<1x80xi32>
    %41 = arith.select %38, %40, %36 : vector<1x80xi1>, vector<1x80xi32>
    %c40_i32 = arith.constant 40 : i32
    %42 = vector.broadcast %c40_i32 : i32 to vector<1x80xi32>
    %43 = arith.cmpi sge, %41, %42 : vector<1x80xi32>
    %c40_i32_38 = arith.constant 40 : i32
    %44 = vector.broadcast %c40_i32_38 : i32 to vector<1x80xi32>
    %45 = arith.subi %41, %44 : vector<1x80xi32>
    %46 = arith.select %43, %45, %41 : vector<1x80xi1>, vector<1x80xi32>
    %c20_i32 = arith.constant 20 : i32
    %47 = vector.broadcast %c20_i32 : i32 to vector<1x80xi32>
    %48 = arith.cmpi sge, %46, %47 : vector<1x80xi32>
    %c20_i32_39 = arith.constant 20 : i32
    %49 = vector.broadcast %c20_i32_39 : i32 to vector<1x80xi32>
    %50 = arith.subi %46, %49 : vector<1x80xi32>
    %51 = arith.select %48, %50, %46 : vector<1x80xi1>, vector<1x80xi32>
    %c10_i32 = arith.constant 10 : i32
    %52 = vector.broadcast %c10_i32 : i32 to vector<1x80xi32>
    %53 = arith.cmpi sge, %51, %52 : vector<1x80xi32>
    %c10_i32_40 = arith.constant 10 : i32
    %54 = vector.broadcast %c10_i32_40 : i32 to vector<1x80xi32>
    %55 = arith.subi %51, %54 : vector<1x80xi32>
    %56 = arith.select %53, %55, %51 : vector<1x80xi1>, vector<1x80xi32>
    %c8_i32 = arith.constant 8 : i32
    %57 = vector.broadcast %c8_i32 : i32 to vector<1x80xi32>
    %58 = arith.cmpi slt, %56, %57 : vector<1x80xi32>
    %cst_41 = arith.constant 0.000000e+00 : f32
    %59 = vector.shape_cast %58 : vector<1x80xi1> to vector<1x80xi1>
    %60 = vector.broadcast %59 : vector<1x80xi1> to vector<16x80xi1>
    %61 = vector.broadcast %cst_41 : f32 to vector<16x80xf32>
    %62 = arith.select %60, %32, %61 : vector<16x80xi1>, vector<16x80xf32>
    %cst_42 = arith.constant dense<0.000000e+00> : vector<16xf32>
    %63 = vector.multi_reduction <add>, %62, %cst_42 [1] : vector<16x80xf32> to vector<16xf32>
    %64 = vector.shape_cast %63 : vector<16xf32> to vector<16x1xf32>
    %c0_43 = arith.constant 0 : index
    %c0_44 = arith.constant 0 : index
    %c0_45 = arith.constant 0 : index
    %65 = vector.load %arg5[%c0_43, %c0_44, %c0_45] : memref<1x16x1xf32, #tpu.memory_space<vmem>>, vector<1x16x1xf32>
    %66 = vector.shape_cast %65 : vector<1x16x1xf32> to vector<16x1xf32>
    %67 = vector.shape_cast %64 : vector<16x1xf32> to vector<1x16x1xf32>
    tpu.vector_store %arg5[%c0_43, %c0_44, %c0_45], %67 {strides = array<i32>} : memref<1x16x1xf32, #tpu.memory_space<vmem>>, vector<1x16x1xf32>,
    %68 = arith.mulf %62, %32 : vector<16x80xf32>
    %cst_46 = arith.constant dense<0.000000e+00> : vector<16xf32>
    %69 = vector.multi_reduction <add>, %68, %cst_46 [1] : vector<16x80xf32> to vector<16xf32>
    %70 = vector.shape_cast %69 : vector<16xf32> to vector<16x1xf32>
    %c0_47 = arith.constant 0 : index
    %c0_48 = arith.constant 0 : index
    %c0_49 = arith.constant 0 : index
    %71 = vector.load %arg6[%c0_47, %c0_48, %c0_49] : memref<1x16x1xf32, #tpu.memory_space<vmem>>, vector<1x16x1xf32>
    %72 = vector.shape_cast %71 : vector<1x16x1xf32> to vector<16x1xf32>
    %73 = vector.shape_cast %70 : vector<16x1xf32> to vector<1x16x1xf32>
    tpu.vector_store %arg6[%c0_47, %c0_48, %c0_49], %73 {strides = array<i32>} : memref<1x16x1xf32, #tpu.memory_space<vmem>>, vector<1x16x1xf32>,
    return
  }
  func.func @transform_0(%arg0: i32) -> (i32, i32, i32) {
    %c0_i32 = arith.constant 0 : i32
    %c0_i32_0 = arith.constant 0 : i32
    %c0_i32_1 = arith.constant 0 : i32
    return %arg0, %c0_i32, %c0_i32_0 : i32, i32, i32
  }
  func.func @transform_1(%arg0: i32) -> (i32, i32) {
    %c0_i32 = arith.constant 0 : i32
    %c0_i32_0 = arith.constant 0 : i32
    %c0_i32_1 = arith.constant 0 : i32
    return %c0_i32, %c0_i32_0 : i32, i32
  }
  func.func @transform_2(%arg0: i32) -> (i32, i32) {
    %c0_i32 = arith.constant 0 : i32
    %c0_i32_0 = arith.constant 0 : i32
    %c0_i32_1 = arith.constant 0 : i32
    return %c0_i32, %c0_i32_0 : i32, i32
  }
  func.func @transform_3(%arg0: i32) -> (i32, i32, i32) {
    %c0_i32 = arith.constant 0 : i32
    %c0_i32_0 = arith.constant 0 : i32
    %c0_i32_1 = arith.constant 0 : i32
    return %arg0, %c0_i32, %c0_i32_0 : i32, i32, i32
  }
  func.func @transform_4(%arg0: i32) -> (i32, i32, i32) {
    %c0_i32 = arith.constant 0 : i32
    %c0_i32_0 = arith.constant 0 : i32
    %c0_i32_1 = arith.constant 0 : i32
    return %arg0, %c0_i32, %c0_i32_0 : i32, i32, i32
  }
  func.func @transform_5(%arg0: i32) -> (i32, i32, i32) {
    %c0_i32 = arith.constant 0 : i32
    %c0_i32_0 = arith.constant 0 : i32
    %c0_i32_1 = arith.constant 0 : i32
    return %arg0, %c0_i32, %c0_i32_0 : i32, i32, i32
  }
}

module attributes {stable_mosaic.version = 11 : i64} {
  func.func @kernel(%arg0: i32, %arg1: memref<1x3x342xf32, #tpu.memory_space<vmem>>, %arg2: memref<8x27xf32, #tpu.memory_space<vmem>>, %arg3: memref<8x1xf32, #tpu.memory_space<vmem>>, %arg4: memref<1x8x288xf32, #tpu.memory_space<vmem>>, %arg5: memref<1x8x1xf32, #tpu.memory_space<vmem>>, %arg6: memref<1x8x1xf32, #tpu.memory_space<vmem>>, %arg7: memref<27x288xf32, #tpu.memory_space<vmem>>) attributes {dimension_semantics = [#tpu.dimension_semantics<parallel>], iteration_bounds = array<i64: 2>, scalar_prefetch = 0 : i64, scratch_operands = 1 : i64, tpu.core_type = #tpu.core_type<tc>, window_params = [{transform_indices = @transform_0, window_bounds = array<i64: 1, 3, 342>}, {pipeline_mode = #tpu.pipeline_mode<synchronous>, transform_indices = @transform_1, window_bounds = array<i64: 8, 27>}, {pipeline_mode = #tpu.pipeline_mode<synchronous>, transform_indices = @transform_2, window_bounds = array<i64: 8, 1>}, {transform_indices = @transform_3, window_bounds = array<i64: 1, 8, 288>}, {transform_indices = @transform_4, window_bounds = array<i64: 1, 8, 1>}, {transform_indices = @transform_5, window_bounds = array<i64: 1, 8, 1>}]} {
    %c0 = arith.constant 0 : index
    %c0_0 = arith.constant 0 : index
    %c0_1 = arith.constant 0 : index
    %0 = vector.load %arg1[%c0, %c0_0, %c0_1] : memref<1x3x342xf32, #tpu.memory_space<vmem>>, vector<1x3x288xf32>
    %1 = vector.shape_cast %0 : vector<1x3x288xf32> to vector<3x288xf32>
    %c0_2 = arith.constant 0 : index
    %c0_3 = arith.constant 0 : index
    %2 = vector.load %arg7[%c0_2, %c0_3] : memref<27x288xf32, #tpu.memory_space<vmem>>, vector<3x288xf32>
    tpu.vector_store %arg7[%c0_2, %c0_3], %1 {strides = array<i32>} : memref<27x288xf32, #tpu.memory_space<vmem>>, vector<3x288xf32>,
    %c0_4 = arith.constant 0 : index
    %c0_5 = arith.constant 0 : index
    %c1 = arith.constant 1 : index
    %3 = vector.load %arg1[%c0_4, %c0_5, %c1] : memref<1x3x342xf32, #tpu.memory_space<vmem>>, vector<1x3x288xf32>
    %4 = vector.shape_cast %3 : vector<1x3x288xf32> to vector<3x288xf32>
    %c3 = arith.constant 3 : index
    %c0_6 = arith.constant 0 : index
    %5 = vector.load %arg7[%c3, %c0_6] : memref<27x288xf32, #tpu.memory_space<vmem>>, vector<3x288xf32>
    tpu.vector_store %arg7[%c3, %c0_6], %4 {strides = array<i32>} : memref<27x288xf32, #tpu.memory_space<vmem>>, vector<3x288xf32>,
    %c0_7 = arith.constant 0 : index
    %c0_8 = arith.constant 0 : index
    %c2 = arith.constant 2 : index
    %6 = vector.load %arg1[%c0_7, %c0_8, %c2] : memref<1x3x342xf32, #tpu.memory_space<vmem>>, vector<1x3x288xf32>
    %7 = vector.shape_cast %6 : vector<1x3x288xf32> to vector<3x288xf32>
    %c6 = arith.constant 6 : index
    %c0_9 = arith.constant 0 : index
    %8 = vector.load %arg7[%c6, %c0_9] : memref<27x288xf32, #tpu.memory_space<vmem>>, vector<3x288xf32>
    tpu.vector_store %arg7[%c6, %c0_9], %7 {strides = array<i32>} : memref<27x288xf32, #tpu.memory_space<vmem>>, vector<3x288xf32>,
    %c0_10 = arith.constant 0 : index
    %c0_11 = arith.constant 0 : index
    %c18 = arith.constant 18 : index
    %9 = vector.load %arg1[%c0_10, %c0_11, %c18] : memref<1x3x342xf32, #tpu.memory_space<vmem>>, vector<1x3x288xf32>
    %10 = vector.shape_cast %9 : vector<1x3x288xf32> to vector<3x288xf32>
    %c9 = arith.constant 9 : index
    %c0_12 = arith.constant 0 : index
    %11 = vector.load %arg7[%c9, %c0_12] : memref<27x288xf32, #tpu.memory_space<vmem>>, vector<3x288xf32>
    tpu.vector_store %arg7[%c9, %c0_12], %10 {strides = array<i32>} : memref<27x288xf32, #tpu.memory_space<vmem>>, vector<3x288xf32>,
    %c0_13 = arith.constant 0 : index
    %c0_14 = arith.constant 0 : index
    %c19 = arith.constant 19 : index
    %12 = vector.load %arg1[%c0_13, %c0_14, %c19] : memref<1x3x342xf32, #tpu.memory_space<vmem>>, vector<1x3x288xf32>
    %13 = vector.shape_cast %12 : vector<1x3x288xf32> to vector<3x288xf32>
    %c12 = arith.constant 12 : index
    %c0_15 = arith.constant 0 : index
    %14 = vector.load %arg7[%c12, %c0_15] : memref<27x288xf32, #tpu.memory_space<vmem>>, vector<3x288xf32>
    tpu.vector_store %arg7[%c12, %c0_15], %13 {strides = array<i32>} : memref<27x288xf32, #tpu.memory_space<vmem>>, vector<3x288xf32>,
    %c0_16 = arith.constant 0 : index
    %c0_17 = arith.constant 0 : index
    %c20 = arith.constant 20 : index
    %15 = vector.load %arg1[%c0_16, %c0_17, %c20] : memref<1x3x342xf32, #tpu.memory_space<vmem>>, vector<1x3x288xf32>
    %16 = vector.shape_cast %15 : vector<1x3x288xf32> to vector<3x288xf32>
    %c15 = arith.constant 15 : index
    %c0_18 = arith.constant 0 : index
    %17 = vector.load %arg7[%c15, %c0_18] : memref<27x288xf32, #tpu.memory_space<vmem>>, vector<3x288xf32>
    tpu.vector_store %arg7[%c15, %c0_18], %16 {strides = array<i32>} : memref<27x288xf32, #tpu.memory_space<vmem>>, vector<3x288xf32>,
    %c0_19 = arith.constant 0 : index
    %c0_20 = arith.constant 0 : index
    %c36 = arith.constant 36 : index
    %18 = vector.load %arg1[%c0_19, %c0_20, %c36] : memref<1x3x342xf32, #tpu.memory_space<vmem>>, vector<1x3x288xf32>
    %19 = vector.shape_cast %18 : vector<1x3x288xf32> to vector<3x288xf32>
    %c18_21 = arith.constant 18 : index
    %c0_22 = arith.constant 0 : index
    %20 = vector.load %arg7[%c18_21, %c0_22] : memref<27x288xf32, #tpu.memory_space<vmem>>, vector<3x288xf32>
    tpu.vector_store %arg7[%c18_21, %c0_22], %19 {strides = array<i32>} : memref<27x288xf32, #tpu.memory_space<vmem>>, vector<3x288xf32>,
    %c0_23 = arith.constant 0 : index
    %c0_24 = arith.constant 0 : index
    %c37 = arith.constant 37 : index
    %21 = vector.load %arg1[%c0_23, %c0_24, %c37] : memref<1x3x342xf32, #tpu.memory_space<vmem>>, vector<1x3x288xf32>
    %22 = vector.shape_cast %21 : vector<1x3x288xf32> to vector<3x288xf32>
    %c21 = arith.constant 21 : index
    %c0_25 = arith.constant 0 : index
    %23 = vector.load %arg7[%c21, %c0_25] : memref<27x288xf32, #tpu.memory_space<vmem>>, vector<3x288xf32>
    tpu.vector_store %arg7[%c21, %c0_25], %22 {strides = array<i32>} : memref<27x288xf32, #tpu.memory_space<vmem>>, vector<3x288xf32>,
    %c0_26 = arith.constant 0 : index
    %c0_27 = arith.constant 0 : index
    %c38 = arith.constant 38 : index
    %24 = vector.load %arg1[%c0_26, %c0_27, %c38] : memref<1x3x342xf32, #tpu.memory_space<vmem>>, vector<1x3x288xf32>
    %25 = vector.shape_cast %24 : vector<1x3x288xf32> to vector<3x288xf32>
    %c24 = arith.constant 24 : index
    %c0_28 = arith.constant 0 : index
    %26 = vector.load %arg7[%c24, %c0_28] : memref<27x288xf32, #tpu.memory_space<vmem>>, vector<3x288xf32>
    tpu.vector_store %arg7[%c24, %c0_28], %25 {strides = array<i32>} : memref<27x288xf32, #tpu.memory_space<vmem>>, vector<3x288xf32>,
    %c0_29 = arith.constant 0 : index
    %c0_30 = arith.constant 0 : index
    %27 = vector.load %arg2[%c0_29, %c0_30] : memref<8x27xf32, #tpu.memory_space<vmem>>, vector<8x27xf32>
    %c0_31 = arith.constant 0 : index
    %c0_32 = arith.constant 0 : index
    %28 = vector.load %arg7[%c0_31, %c0_32] : memref<27x288xf32, #tpu.memory_space<vmem>>, vector<27x288xf32>
    %cst = arith.constant dense<0.000000e+00> : vector<8x288xf32>
    %29 = tpu.matmul %27, %28, %cst {dimension_numbers = #tpu.dot_dimension_numbers<[1], [0], [0], [1], [0, 0, 1, 1], [], []>} : vector<8x27xf32>, vector<27x288xf32>, vector<8x288xf32> -> vector<8x288xf32>
    %c0_33 = arith.constant 0 : index
    %c0_34 = arith.constant 0 : index
    %30 = vector.load %arg3[%c0_33, %c0_34] : memref<8x1xf32, #tpu.memory_space<vmem>>, vector<8x1xf32>
    %31 = vector.broadcast %30 : vector<8x1xf32> to vector<8x288xf32>
    %32 = arith.addf %29, %31 : vector<8x288xf32>
    %c0_35 = arith.constant 0 : index
    %c0_36 = arith.constant 0 : index
    %c0_37 = arith.constant 0 : index
    %33 = vector.load %arg4[%c0_35, %c0_36, %c0_37] : memref<1x8x288xf32, #tpu.memory_space<vmem>>, vector<1x8x288xf32>
    %34 = vector.shape_cast %33 : vector<1x8x288xf32> to vector<8x288xf32>
    %35 = vector.shape_cast %32 : vector<8x288xf32> to vector<1x8x288xf32>
    tpu.vector_store %arg4[%c0_35, %c0_36, %c0_37], %35 {strides = array<i32>} : memref<1x8x288xf32, #tpu.memory_space<vmem>>, vector<1x8x288xf32>,
    %36 = tpu.iota {dimensions = array<i32: 1>} : vector<1x288xi32>
    %c288_i32 = arith.constant 288 : i32
    %37 = vector.broadcast %c288_i32 : i32 to vector<1x288xi32>
    %38 = arith.cmpi sge, %36, %37 : vector<1x288xi32>
    %c288_i32_38 = arith.constant 288 : i32
    %39 = vector.broadcast %c288_i32_38 : i32 to vector<1x288xi32>
    %40 = arith.subi %36, %39 : vector<1x288xi32>
    %41 = arith.select %38, %40, %36 : vector<1x288xi1>, vector<1x288xi32>
    %c144_i32 = arith.constant 144 : i32
    %42 = vector.broadcast %c144_i32 : i32 to vector<1x288xi32>
    %43 = arith.cmpi sge, %41, %42 : vector<1x288xi32>
    %c144_i32_39 = arith.constant 144 : i32
    %44 = vector.broadcast %c144_i32_39 : i32 to vector<1x288xi32>
    %45 = arith.subi %41, %44 : vector<1x288xi32>
    %46 = arith.select %43, %45, %41 : vector<1x288xi1>, vector<1x288xi32>
    %c72_i32 = arith.constant 72 : i32
    %47 = vector.broadcast %c72_i32 : i32 to vector<1x288xi32>
    %48 = arith.cmpi sge, %46, %47 : vector<1x288xi32>
    %c72_i32_40 = arith.constant 72 : i32
    %49 = vector.broadcast %c72_i32_40 : i32 to vector<1x288xi32>
    %50 = arith.subi %46, %49 : vector<1x288xi32>
    %51 = arith.select %48, %50, %46 : vector<1x288xi1>, vector<1x288xi32>
    %c36_i32 = arith.constant 36 : i32
    %52 = vector.broadcast %c36_i32 : i32 to vector<1x288xi32>
    %53 = arith.cmpi sge, %51, %52 : vector<1x288xi32>
    %c36_i32_41 = arith.constant 36 : i32
    %54 = vector.broadcast %c36_i32_41 : i32 to vector<1x288xi32>
    %55 = arith.subi %51, %54 : vector<1x288xi32>
    %56 = arith.select %53, %55, %51 : vector<1x288xi1>, vector<1x288xi32>
    %c18_i32 = arith.constant 18 : i32
    %57 = vector.broadcast %c18_i32 : i32 to vector<1x288xi32>
    %58 = arith.cmpi sge, %56, %57 : vector<1x288xi32>
    %c18_i32_42 = arith.constant 18 : i32
    %59 = vector.broadcast %c18_i32_42 : i32 to vector<1x288xi32>
    %60 = arith.subi %56, %59 : vector<1x288xi32>
    %61 = arith.select %58, %60, %56 : vector<1x288xi1>, vector<1x288xi32>
    %c16_i32 = arith.constant 16 : i32
    %62 = vector.broadcast %c16_i32 : i32 to vector<1x288xi32>
    %63 = arith.cmpi slt, %61, %62 : vector<1x288xi32>
    %cst_43 = arith.constant 0.000000e+00 : f32
    %64 = vector.shape_cast %63 : vector<1x288xi1> to vector<1x288xi1>
    %65 = vector.broadcast %64 : vector<1x288xi1> to vector<8x288xi1>
    %66 = vector.broadcast %cst_43 : f32 to vector<8x288xf32>
    %67 = arith.select %65, %32, %66 : vector<8x288xi1>, vector<8x288xf32>
    %cst_44 = arith.constant dense<0.000000e+00> : vector<8xf32>
    %68 = vector.multi_reduction <add>, %67, %cst_44 [1] : vector<8x288xf32> to vector<8xf32>
    %69 = vector.shape_cast %68 : vector<8xf32> to vector<8x1xf32>
    %c0_45 = arith.constant 0 : index
    %c0_46 = arith.constant 0 : index
    %c0_47 = arith.constant 0 : index
    %70 = vector.load %arg5[%c0_45, %c0_46, %c0_47] : memref<1x8x1xf32, #tpu.memory_space<vmem>>, vector<1x8x1xf32>
    %71 = vector.shape_cast %70 : vector<1x8x1xf32> to vector<8x1xf32>
    %72 = vector.shape_cast %69 : vector<8x1xf32> to vector<1x8x1xf32>
    tpu.vector_store %arg5[%c0_45, %c0_46, %c0_47], %72 {strides = array<i32>} : memref<1x8x1xf32, #tpu.memory_space<vmem>>, vector<1x8x1xf32>,
    %73 = arith.mulf %67, %32 : vector<8x288xf32>
    %cst_48 = arith.constant dense<0.000000e+00> : vector<8xf32>
    %74 = vector.multi_reduction <add>, %73, %cst_48 [1] : vector<8x288xf32> to vector<8xf32>
    %75 = vector.shape_cast %74 : vector<8xf32> to vector<8x1xf32>
    %c0_49 = arith.constant 0 : index
    %c0_50 = arith.constant 0 : index
    %c0_51 = arith.constant 0 : index
    %76 = vector.load %arg6[%c0_49, %c0_50, %c0_51] : memref<1x8x1xf32, #tpu.memory_space<vmem>>, vector<1x8x1xf32>
    %77 = vector.shape_cast %76 : vector<1x8x1xf32> to vector<8x1xf32>
    %78 = vector.shape_cast %75 : vector<8x1xf32> to vector<1x8x1xf32>
    tpu.vector_store %arg6[%c0_49, %c0_50, %c0_51], %78 {strides = array<i32>} : memref<1x8x1xf32, #tpu.memory_space<vmem>>, vector<1x8x1xf32>,
    return
  }
  func.func @transform_0(%arg0: i32) -> (i32, i32, i32) {
    %c0_i32 = arith.constant 0 : i32
    %c0_i32_0 = arith.constant 0 : i32
    %c0_i32_1 = arith.constant 0 : i32
    return %arg0, %c0_i32, %c0_i32_0 : i32, i32, i32
  }
  func.func @transform_1(%arg0: i32) -> (i32, i32) {
    %c0_i32 = arith.constant 0 : i32
    %c0_i32_0 = arith.constant 0 : i32
    %c0_i32_1 = arith.constant 0 : i32
    return %c0_i32, %c0_i32_0 : i32, i32
  }
  func.func @transform_2(%arg0: i32) -> (i32, i32) {
    %c0_i32 = arith.constant 0 : i32
    %c0_i32_0 = arith.constant 0 : i32
    %c0_i32_1 = arith.constant 0 : i32
    return %c0_i32, %c0_i32_0 : i32, i32
  }
  func.func @transform_3(%arg0: i32) -> (i32, i32, i32) {
    %c0_i32 = arith.constant 0 : i32
    %c0_i32_0 = arith.constant 0 : i32
    %c0_i32_1 = arith.constant 0 : i32
    return %arg0, %c0_i32, %c0_i32_0 : i32, i32, i32
  }
  func.func @transform_4(%arg0: i32) -> (i32, i32, i32) {
    %c0_i32 = arith.constant 0 : i32
    %c0_i32_0 = arith.constant 0 : i32
    %c0_i32_1 = arith.constant 0 : i32
    return %arg0, %c0_i32, %c0_i32_0 : i32, i32, i32
  }
  func.func @transform_5(%arg0: i32) -> (i32, i32, i32) {
    %c0_i32 = arith.constant 0 : i32
    %c0_i32_0 = arith.constant 0 : i32
    %c0_i32_1 = arith.constant 0 : i32
    return %arg0, %c0_i32, %c0_i32_0 : i32, i32, i32
  }
}

module attributes {stable_mosaic.version = 11 : i64} {
  func.func @_affine_relu_pool_kernel(%arg0: i32, %arg1: memref<1x8x288xf32, #tpu.memory_space<vmem>>, %arg2: memref<8x1xf32, #tpu.memory_space<vmem>>, %arg3: memref<8x1xf32, #tpu.memory_space<vmem>>, %arg4: memref<4x288x110xf32, #tpu.memory_space<vmem>>, %arg5: memref<1x8x110xf32, #tpu.memory_space<vmem>>) attributes {dimension_semantics = [#tpu.dimension_semantics<parallel>], iteration_bounds = array<i64: 2>, scalar_prefetch = 0 : i64, scratch_operands = 0 : i64, tpu.core_type = #tpu.core_type<tc>, window_params = [{transform_indices = @transform_0, window_bounds = array<i64: 1, 8, 288>}, {pipeline_mode = #tpu.pipeline_mode<synchronous>, transform_indices = @transform_1, window_bounds = array<i64: 8, 1>}, {pipeline_mode = #tpu.pipeline_mode<synchronous>, transform_indices = @transform_2, window_bounds = array<i64: 8, 1>}, {pipeline_mode = #tpu.pipeline_mode<synchronous>, transform_indices = @transform_3, window_bounds = array<i64: 4, 288, 110>}, {transform_indices = @transform_4, window_bounds = array<i64: 1, 8, 110>}]} {
    %c0 = arith.constant 0 : index
    %c0_0 = arith.constant 0 : index
    %c0_1 = arith.constant 0 : index
    %0 = vector.load %arg1[%c0, %c0_0, %c0_1] : memref<1x8x288xf32, #tpu.memory_space<vmem>>, vector<1x8x288xf32>
    %1 = vector.shape_cast %0 : vector<1x8x288xf32> to vector<8x288xf32>
    %c0_2 = arith.constant 0 : index
    %c0_3 = arith.constant 0 : index
    %2 = vector.load %arg2[%c0_2, %c0_3] : memref<8x1xf32, #tpu.memory_space<vmem>>, vector<8x1xf32>
    %3 = vector.broadcast %2 : vector<8x1xf32> to vector<8x288xf32>
    %4 = arith.mulf %1, %3 : vector<8x288xf32>
    %c0_4 = arith.constant 0 : index
    %c0_5 = arith.constant 0 : index
    %5 = vector.load %arg3[%c0_4, %c0_5] : memref<8x1xf32, #tpu.memory_space<vmem>>, vector<8x1xf32>
    %6 = vector.broadcast %5 : vector<8x1xf32> to vector<8x288xf32>
    %7 = arith.addf %4, %6 : vector<8x288xf32>
    %cst = arith.constant 0.000000e+00 : f32
    %8 = vector.broadcast %cst : f32 to vector<8x288xf32>
    %9 = arith.maximumf %7, %8 : vector<8x288xf32>
    %c0_6 = arith.constant 0 : index
    %c0_7 = arith.constant 0 : index
    %c0_8 = arith.constant 0 : index
    %10 = vector.load %arg4[%c0_6, %c0_7, %c0_8] : memref<4x288x110xf32, #tpu.memory_space<vmem>>, vector<1x288x110xf32>
    %11 = vector.shape_cast %10 : vector<1x288x110xf32> to vector<288x110xf32>
    %cst_9 = arith.constant dense<0.000000e+00> : vector<8x110xf32>
    %12 = tpu.matmul %9, %11, %cst_9 {dimension_numbers = #tpu.dot_dimension_numbers<[1], [0], [0], [1], [0, 0, 1, 1], [], []>} : vector<8x288xf32>, vector<288x110xf32>, vector<8x110xf32> -> vector<8x110xf32>
    %c1 = arith.constant 1 : index
    %c0_10 = arith.constant 0 : index
    %c0_11 = arith.constant 0 : index
    %13 = vector.load %arg4[%c1, %c0_10, %c0_11] : memref<4x288x110xf32, #tpu.memory_space<vmem>>, vector<1x288x110xf32>
    %14 = vector.shape_cast %13 : vector<1x288x110xf32> to vector<288x110xf32>
    %cst_12 = arith.constant dense<0.000000e+00> : vector<8x110xf32>
    %15 = tpu.matmul %9, %14, %cst_12 {dimension_numbers = #tpu.dot_dimension_numbers<[1], [0], [0], [1], [0, 0, 1, 1], [], []>} : vector<8x288xf32>, vector<288x110xf32>, vector<8x110xf32> -> vector<8x110xf32>
    %16 = arith.maximumf %12, %15 : vector<8x110xf32>
    %c2 = arith.constant 2 : index
    %c0_13 = arith.constant 0 : index
    %c0_14 = arith.constant 0 : index
    %17 = vector.load %arg4[%c2, %c0_13, %c0_14] : memref<4x288x110xf32, #tpu.memory_space<vmem>>, vector<1x288x110xf32>
    %18 = vector.shape_cast %17 : vector<1x288x110xf32> to vector<288x110xf32>
    %cst_15 = arith.constant dense<0.000000e+00> : vector<8x110xf32>
    %19 = tpu.matmul %9, %18, %cst_15 {dimension_numbers = #tpu.dot_dimension_numbers<[1], [0], [0], [1], [0, 0, 1, 1], [], []>} : vector<8x288xf32>, vector<288x110xf32>, vector<8x110xf32> -> vector<8x110xf32>
    %20 = arith.maximumf %16, %19 : vector<8x110xf32>
    %c3 = arith.constant 3 : index
    %c0_16 = arith.constant 0 : index
    %c0_17 = arith.constant 0 : index
    %21 = vector.load %arg4[%c3, %c0_16, %c0_17] : memref<4x288x110xf32, #tpu.memory_space<vmem>>, vector<1x288x110xf32>
    %22 = vector.shape_cast %21 : vector<1x288x110xf32> to vector<288x110xf32>
    %cst_18 = arith.constant dense<0.000000e+00> : vector<8x110xf32>
    %23 = tpu.matmul %9, %22, %cst_18 {dimension_numbers = #tpu.dot_dimension_numbers<[1], [0], [0], [1], [0, 0, 1, 1], [], []>} : vector<8x288xf32>, vector<288x110xf32>, vector<8x110xf32> -> vector<8x110xf32>
    %24 = arith.maximumf %20, %23 : vector<8x110xf32>
    %c0_19 = arith.constant 0 : index
    %c0_20 = arith.constant 0 : index
    %c0_21 = arith.constant 0 : index
    %25 = vector.load %arg5[%c0_19, %c0_20, %c0_21] : memref<1x8x110xf32, #tpu.memory_space<vmem>>, vector<1x8x110xf32>
    %26 = vector.shape_cast %25 : vector<1x8x110xf32> to vector<8x110xf32>
    %27 = vector.shape_cast %24 : vector<8x110xf32> to vector<1x8x110xf32>
    tpu.vector_store %arg5[%c0_19, %c0_20, %c0_21], %27 {strides = array<i32>} : memref<1x8x110xf32, #tpu.memory_space<vmem>>, vector<1x8x110xf32>,
    return
  }
  func.func @transform_0(%arg0: i32) -> (i32, i32, i32) {
    %c0_i32 = arith.constant 0 : i32
    %c0_i32_0 = arith.constant 0 : i32
    %c0_i32_1 = arith.constant 0 : i32
    return %arg0, %c0_i32, %c0_i32_0 : i32, i32, i32
  }
  func.func @transform_1(%arg0: i32) -> (i32, i32) {
    %c0_i32 = arith.constant 0 : i32
    %c0_i32_0 = arith.constant 0 : i32
    %c0_i32_1 = arith.constant 0 : i32
    return %c0_i32, %c0_i32_0 : i32, i32
  }
  func.func @transform_2(%arg0: i32) -> (i32, i32) {
    %c0_i32 = arith.constant 0 : i32
    %c0_i32_0 = arith.constant 0 : i32
    %c0_i32_1 = arith.constant 0 : i32
    return %c0_i32, %c0_i32_0 : i32, i32
  }
  func.func @transform_3(%arg0: i32) -> (i32, i32, i32) {
    %c0_i32 = arith.constant 0 : i32
    %c0_i32_0 = arith.constant 0 : i32
    %c0_i32_1 = arith.constant 0 : i32
    %c0_i32_2 = arith.constant 0 : i32
    return %c0_i32, %c0_i32_0, %c0_i32_1 : i32, i32, i32
  }
  func.func @transform_4(%arg0: i32) -> (i32, i32, i32) {
    %c0_i32 = arith.constant 0 : i32
    %c0_i32_0 = arith.constant 0 : i32
    %c0_i32_1 = arith.constant 0 : i32
    return %arg0, %c0_i32, %c0_i32_0 : i32, i32, i32
  }
}

module attributes {stable_mosaic.version = 11 : i64} {
  func.func @_affine_relu_pool_kernel(%arg0: i32, %arg1: memref<1x16x80xf32, #tpu.memory_space<vmem>>, %arg2: memref<16x1xf32, #tpu.memory_space<vmem>>, %arg3: memref<16x1xf32, #tpu.memory_space<vmem>>, %arg4: memref<4x80x42xf32, #tpu.memory_space<vmem>>, %arg5: memref<1x16x42xf32, #tpu.memory_space<vmem>>) attributes {dimension_semantics = [#tpu.dimension_semantics<parallel>], iteration_bounds = array<i64: 2>, scalar_prefetch = 0 : i64, scratch_operands = 0 : i64, tpu.core_type = #tpu.core_type<tc>, window_params = [{transform_indices = @transform_0, window_bounds = array<i64: 1, 16, 80>}, {pipeline_mode = #tpu.pipeline_mode<synchronous>, transform_indices = @transform_1, window_bounds = array<i64: 16, 1>}, {pipeline_mode = #tpu.pipeline_mode<synchronous>, transform_indices = @transform_2, window_bounds = array<i64: 16, 1>}, {pipeline_mode = #tpu.pipeline_mode<synchronous>, transform_indices = @transform_3, window_bounds = array<i64: 4, 80, 42>}, {transform_indices = @transform_4, window_bounds = array<i64: 1, 16, 42>}]} {
    %c0 = arith.constant 0 : index
    %c0_0 = arith.constant 0 : index
    %c0_1 = arith.constant 0 : index
    %0 = vector.load %arg1[%c0, %c0_0, %c0_1] : memref<1x16x80xf32, #tpu.memory_space<vmem>>, vector<1x16x80xf32>
    %1 = vector.shape_cast %0 : vector<1x16x80xf32> to vector<16x80xf32>
    %c0_2 = arith.constant 0 : index
    %c0_3 = arith.constant 0 : index
    %2 = vector.load %arg2[%c0_2, %c0_3] : memref<16x1xf32, #tpu.memory_space<vmem>>, vector<16x1xf32>
    %3 = vector.broadcast %2 : vector<16x1xf32> to vector<16x80xf32>
    %4 = arith.mulf %1, %3 : vector<16x80xf32>
    %c0_4 = arith.constant 0 : index
    %c0_5 = arith.constant 0 : index
    %5 = vector.load %arg3[%c0_4, %c0_5] : memref<16x1xf32, #tpu.memory_space<vmem>>, vector<16x1xf32>
    %6 = vector.broadcast %5 : vector<16x1xf32> to vector<16x80xf32>
    %7 = arith.addf %4, %6 : vector<16x80xf32>
    %cst = arith.constant 0.000000e+00 : f32
    %8 = vector.broadcast %cst : f32 to vector<16x80xf32>
    %9 = arith.maximumf %7, %8 : vector<16x80xf32>
    %c0_6 = arith.constant 0 : index
    %c0_7 = arith.constant 0 : index
    %c0_8 = arith.constant 0 : index
    %10 = vector.load %arg4[%c0_6, %c0_7, %c0_8] : memref<4x80x42xf32, #tpu.memory_space<vmem>>, vector<1x80x42xf32>
    %11 = vector.shape_cast %10 : vector<1x80x42xf32> to vector<80x42xf32>
    %cst_9 = arith.constant dense<0.000000e+00> : vector<16x42xf32>
    %12 = tpu.matmul %9, %11, %cst_9 {dimension_numbers = #tpu.dot_dimension_numbers<[1], [0], [0], [1], [0, 0, 1, 1], [], []>} : vector<16x80xf32>, vector<80x42xf32>, vector<16x42xf32> -> vector<16x42xf32>
    %c1 = arith.constant 1 : index
    %c0_10 = arith.constant 0 : index
    %c0_11 = arith.constant 0 : index
    %13 = vector.load %arg4[%c1, %c0_10, %c0_11] : memref<4x80x42xf32, #tpu.memory_space<vmem>>, vector<1x80x42xf32>
    %14 = vector.shape_cast %13 : vector<1x80x42xf32> to vector<80x42xf32>
    %cst_12 = arith.constant dense<0.000000e+00> : vector<16x42xf32>
    %15 = tpu.matmul %9, %14, %cst_12 {dimension_numbers = #tpu.dot_dimension_numbers<[1], [0], [0], [1], [0, 0, 1, 1], [], []>} : vector<16x80xf32>, vector<80x42xf32>, vector<16x42xf32> -> vector<16x42xf32>
    %16 = arith.maximumf %12, %15 : vector<16x42xf32>
    %c2 = arith.constant 2 : index
    %c0_13 = arith.constant 0 : index
    %c0_14 = arith.constant 0 : index
    %17 = vector.load %arg4[%c2, %c0_13, %c0_14] : memref<4x80x42xf32, #tpu.memory_space<vmem>>, vector<1x80x42xf32>
    %18 = vector.shape_cast %17 : vector<1x80x42xf32> to vector<80x42xf32>
    %cst_15 = arith.constant dense<0.000000e+00> : vector<16x42xf32>
    %19 = tpu.matmul %9, %18, %cst_15 {dimension_numbers = #tpu.dot_dimension_numbers<[1], [0], [0], [1], [0, 0, 1, 1], [], []>} : vector<16x80xf32>, vector<80x42xf32>, vector<16x42xf32> -> vector<16x42xf32>
    %20 = arith.maximumf %16, %19 : vector<16x42xf32>
    %c3 = arith.constant 3 : index
    %c0_16 = arith.constant 0 : index
    %c0_17 = arith.constant 0 : index
    %21 = vector.load %arg4[%c3, %c0_16, %c0_17] : memref<4x80x42xf32, #tpu.memory_space<vmem>>, vector<1x80x42xf32>
    %22 = vector.shape_cast %21 : vector<1x80x42xf32> to vector<80x42xf32>
    %cst_18 = arith.constant dense<0.000000e+00> : vector<16x42xf32>
    %23 = tpu.matmul %9, %22, %cst_18 {dimension_numbers = #tpu.dot_dimension_numbers<[1], [0], [0], [1], [0, 0, 1, 1], [], []>} : vector<16x80xf32>, vector<80x42xf32>, vector<16x42xf32> -> vector<16x42xf32>
    %24 = arith.maximumf %20, %23 : vector<16x42xf32>
    %c0_19 = arith.constant 0 : index
    %c0_20 = arith.constant 0 : index
    %c0_21 = arith.constant 0 : index
    %25 = vector.load %arg5[%c0_19, %c0_20, %c0_21] : memref<1x16x42xf32, #tpu.memory_space<vmem>>, vector<1x16x42xf32>
    %26 = vector.shape_cast %25 : vector<1x16x42xf32> to vector<16x42xf32>
    %27 = vector.shape_cast %24 : vector<16x42xf32> to vector<1x16x42xf32>
    tpu.vector_store %arg5[%c0_19, %c0_20, %c0_21], %27 {strides = array<i32>} : memref<1x16x42xf32, #tpu.memory_space<vmem>>, vector<1x16x42xf32>,
    return
  }
  func.func @transform_0(%arg0: i32) -> (i32, i32, i32) {
    %c0_i32 = arith.constant 0 : i32
    %c0_i32_0 = arith.constant 0 : i32
    %c0_i32_1 = arith.constant 0 : i32
    return %arg0, %c0_i32, %c0_i32_0 : i32, i32, i32
  }
  func.func @transform_1(%arg0: i32) -> (i32, i32) {
    %c0_i32 = arith.constant 0 : i32
    %c0_i32_0 = arith.constant 0 : i32
    %c0_i32_1 = arith.constant 0 : i32
    return %c0_i32, %c0_i32_0 : i32, i32
  }
  func.func @transform_2(%arg0: i32) -> (i32, i32) {
    %c0_i32 = arith.constant 0 : i32
    %c0_i32_0 = arith.constant 0 : i32
    %c0_i32_1 = arith.constant 0 : i32
    return %c0_i32, %c0_i32_0 : i32, i32
  }
  func.func @transform_3(%arg0: i32) -> (i32, i32, i32) {
    %c0_i32 = arith.constant 0 : i32
    %c0_i32_0 = arith.constant 0 : i32
    %c0_i32_1 = arith.constant 0 : i32
    %c0_i32_2 = arith.constant 0 : i32
    return %c0_i32, %c0_i32_0, %c0_i32_1 : i32, i32, i32
  }
  func.func @transform_4(%arg0: i32) -> (i32, i32, i32) {
    %c0_i32 = arith.constant 0 : i32
    %c0_i32_0 = arith.constant 0 : i32
    %c0_i32_1 = arith.constant 0 : i32
    return %arg0, %c0_i32, %c0_i32_0 : i32, i32, i32
  }
}

module attributes {stable_mosaic.version = 11 : i64} {
  func.func @kernel(%arg0: i32, %arg1: memref<1x16x42xf32, #tpu.memory_space<vmem>>, %arg2: memref<64x144xf32, #tpu.memory_space<vmem>>, %arg3: memref<64x1xf32, #tpu.memory_space<vmem>>, %arg4: memref<1x64x24xf32, #tpu.memory_space<vmem>>, %arg5: memref<1x64x1xf32, #tpu.memory_space<vmem>>, %arg6: memref<1x64x1xf32, #tpu.memory_space<vmem>>, %arg7: memref<144x24xf32, #tpu.memory_space<vmem>>) attributes {dimension_semantics = [#tpu.dimension_semantics<parallel>], iteration_bounds = array<i64: 2>, scalar_prefetch = 0 : i64, scratch_operands = 1 : i64, tpu.core_type = #tpu.core_type<tc>, window_params = [{transform_indices = @transform_0, window_bounds = array<i64: 1, 16, 42>}, {pipeline_mode = #tpu.pipeline_mode<synchronous>, transform_indices = @transform_1, window_bounds = array<i64: 64, 144>}, {pipeline_mode = #tpu.pipeline_mode<synchronous>, transform_indices = @transform_2, window_bounds = array<i64: 64, 1>}, {transform_indices = @transform_3, window_bounds = array<i64: 1, 64, 24>}, {transform_indices = @transform_4, window_bounds = array<i64: 1, 64, 1>}, {transform_indices = @transform_5, window_bounds = array<i64: 1, 64, 1>}]} {
    %c0 = arith.constant 0 : index
    %c0_0 = arith.constant 0 : index
    %c0_1 = arith.constant 0 : index
    %0 = vector.load %arg1[%c0, %c0_0, %c0_1] : memref<1x16x42xf32, #tpu.memory_space<vmem>>, vector<1x16x24xf32>
    %1 = vector.shape_cast %0 : vector<1x16x24xf32> to vector<16x24xf32>
    %c0_2 = arith.constant 0 : index
    %c0_3 = arith.constant 0 : index
    %2 = vector.load %arg7[%c0_2, %c0_3] : memref<144x24xf32, #tpu.memory_space<vmem>>, vector<16x24xf32>
    tpu.vector_store %arg7[%c0_2, %c0_3], %1 {strides = array<i32>} : memref<144x24xf32, #tpu.memory_space<vmem>>, vector<16x24xf32>,
    %c0_4 = arith.constant 0 : index
    %c0_5 = arith.constant 0 : index
    %c1 = arith.constant 1 : index
    %3 = vector.load %arg1[%c0_4, %c0_5, %c1] : memref<1x16x42xf32, #tpu.memory_space<vmem>>, vector<1x16x24xf32>
    %4 = vector.shape_cast %3 : vector<1x16x24xf32> to vector<16x24xf32>
    %c16 = arith.constant 16 : index
    %c0_6 = arith.constant 0 : index
    %5 = vector.load %arg7[%c16, %c0_6] : memref<144x24xf32, #tpu.memory_space<vmem>>, vector<16x24xf32>
    tpu.vector_store %arg7[%c16, %c0_6], %4 {strides = array<i32>} : memref<144x24xf32, #tpu.memory_space<vmem>>, vector<16x24xf32>,
    %c0_7 = arith.constant 0 : index
    %c0_8 = arith.constant 0 : index
    %c2 = arith.constant 2 : index
    %6 = vector.load %arg1[%c0_7, %c0_8, %c2] : memref<1x16x42xf32, #tpu.memory_space<vmem>>, vector<1x16x24xf32>
    %7 = vector.shape_cast %6 : vector<1x16x24xf32> to vector<16x24xf32>
    %c32 = arith.constant 32 : index
    %c0_9 = arith.constant 0 : index
    %8 = vector.load %arg7[%c32, %c0_9] : memref<144x24xf32, #tpu.memory_space<vmem>>, vector<16x24xf32>
    tpu.vector_store %arg7[%c32, %c0_9], %7 {strides = array<i32>} : memref<144x24xf32, #tpu.memory_space<vmem>>, vector<16x24xf32>,
    %c0_10 = arith.constant 0 : index
    %c0_11 = arith.constant 0 : index
    %c6 = arith.constant 6 : index
    %9 = vector.load %arg1[%c0_10, %c0_11, %c6] : memref<1x16x42xf32, #tpu.memory_space<vmem>>, vector<1x16x24xf32>
    %10 = vector.shape_cast %9 : vector<1x16x24xf32> to vector<16x24xf32>
    %c48 = arith.constant 48 : index
    %c0_12 = arith.constant 0 : index
    %11 = vector.load %arg7[%c48, %c0_12] : memref<144x24xf32, #tpu.memory_space<vmem>>, vector<16x24xf32>
    tpu.vector_store %arg7[%c48, %c0_12], %10 {strides = array<i32>} : memref<144x24xf32, #tpu.memory_space<vmem>>, vector<16x24xf32>,
    %c0_13 = arith.constant 0 : index
    %c0_14 = arith.constant 0 : index
    %c7 = arith.constant 7 : index
    %12 = vector.load %arg1[%c0_13, %c0_14, %c7] : memref<1x16x42xf32, #tpu.memory_space<vmem>>, vector<1x16x24xf32>
    %13 = vector.shape_cast %12 : vector<1x16x24xf32> to vector<16x24xf32>
    %c64 = arith.constant 64 : index
    %c0_15 = arith.constant 0 : index
    %14 = vector.load %arg7[%c64, %c0_15] : memref<144x24xf32, #tpu.memory_space<vmem>>, vector<16x24xf32>
    tpu.vector_store %arg7[%c64, %c0_15], %13 {strides = array<i32>} : memref<144x24xf32, #tpu.memory_space<vmem>>, vector<16x24xf32>,
    %c0_16 = arith.constant 0 : index
    %c0_17 = arith.constant 0 : index
    %c8 = arith.constant 8 : index
    %15 = vector.load %arg1[%c0_16, %c0_17, %c8] : memref<1x16x42xf32, #tpu.memory_space<vmem>>, vector<1x16x24xf32>
    %16 = vector.shape_cast %15 : vector<1x16x24xf32> to vector<16x24xf32>
    %c80 = arith.constant 80 : index
    %c0_18 = arith.constant 0 : index
    %17 = vector.load %arg7[%c80, %c0_18] : memref<144x24xf32, #tpu.memory_space<vmem>>, vector<16x24xf32>
    tpu.vector_store %arg7[%c80, %c0_18], %16 {strides = array<i32>} : memref<144x24xf32, #tpu.memory_space<vmem>>, vector<16x24xf32>,
    %c0_19 = arith.constant 0 : index
    %c0_20 = arith.constant 0 : index
    %c12 = arith.constant 12 : index
    %18 = vector.load %arg1[%c0_19, %c0_20, %c12] : memref<1x16x42xf32, #tpu.memory_space<vmem>>, vector<1x16x24xf32>
    %19 = vector.shape_cast %18 : vector<1x16x24xf32> to vector<16x24xf32>
    %c96 = arith.constant 96 : index
    %c0_21 = arith.constant 0 : index
    %20 = vector.load %arg7[%c96, %c0_21] : memref<144x24xf32, #tpu.memory_space<vmem>>, vector<16x24xf32>
    tpu.vector_store %arg7[%c96, %c0_21], %19 {strides = array<i32>} : memref<144x24xf32, #tpu.memory_space<vmem>>, vector<16x24xf32>,
    %c0_22 = arith.constant 0 : index
    %c0_23 = arith.constant 0 : index
    %c13 = arith.constant 13 : index
    %21 = vector.load %arg1[%c0_22, %c0_23, %c13] : memref<1x16x42xf32, #tpu.memory_space<vmem>>, vector<1x16x24xf32>
    %22 = vector.shape_cast %21 : vector<1x16x24xf32> to vector<16x24xf32>
    %c112 = arith.constant 112 : index
    %c0_24 = arith.constant 0 : index
    %23 = vector.load %arg7[%c112, %c0_24] : memref<144x24xf32, #tpu.memory_space<vmem>>, vector<16x24xf32>
    tpu.vector_store %arg7[%c112, %c0_24], %22 {strides = array<i32>} : memref<144x24xf32, #tpu.memory_space<vmem>>, vector<16x24xf32>,
    %c0_25 = arith.constant 0 : index
    %c0_26 = arith.constant 0 : index
    %c14 = arith.constant 14 : index
    %24 = vector.load %arg1[%c0_25, %c0_26, %c14] : memref<1x16x42xf32, #tpu.memory_space<vmem>>, vector<1x16x24xf32>
    %25 = vector.shape_cast %24 : vector<1x16x24xf32> to vector<16x24xf32>
    %c128 = arith.constant 128 : index
    %c0_27 = arith.constant 0 : index
    %26 = vector.load %arg7[%c128, %c0_27] : memref<144x24xf32, #tpu.memory_space<vmem>>, vector<16x24xf32>
    tpu.vector_store %arg7[%c128, %c0_27], %25 {strides = array<i32>} : memref<144x24xf32, #tpu.memory_space<vmem>>, vector<16x24xf32>,
    %c0_28 = arith.constant 0 : index
    %c0_29 = arith.constant 0 : index
    %27 = vector.load %arg2[%c0_28, %c0_29] : memref<64x144xf32, #tpu.memory_space<vmem>>, vector<64x144xf32>
    %c0_30 = arith.constant 0 : index
    %c0_31 = arith.constant 0 : index
    %28 = vector.load %arg7[%c0_30, %c0_31] : memref<144x24xf32, #tpu.memory_space<vmem>>, vector<144x24xf32>
    %cst = arith.constant dense<0.000000e+00> : vector<64x24xf32>
    %29 = tpu.matmul %27, %28, %cst {dimension_numbers = #tpu.dot_dimension_numbers<[1], [0], [0], [1], [0, 0, 1, 1], [], []>} : vector<64x144xf32>, vector<144x24xf32>, vector<64x24xf32> -> vector<64x24xf32>
    %c0_32 = arith.constant 0 : index
    %c0_33 = arith.constant 0 : index
    %30 = vector.load %arg3[%c0_32, %c0_33] : memref<64x1xf32, #tpu.memory_space<vmem>>, vector<64x1xf32>
    %31 = vector.broadcast %30 : vector<64x1xf32> to vector<64x24xf32>
    %32 = arith.addf %29, %31 : vector<64x24xf32>
    %c0_34 = arith.constant 0 : index
    %c0_35 = arith.constant 0 : index
    %c0_36 = arith.constant 0 : index
    %33 = vector.load %arg4[%c0_34, %c0_35, %c0_36] : memref<1x64x24xf32, #tpu.memory_space<vmem>>, vector<1x64x24xf32>
    %34 = vector.shape_cast %33 : vector<1x64x24xf32> to vector<64x24xf32>
    %35 = vector.shape_cast %32 : vector<64x24xf32> to vector<1x64x24xf32>
    tpu.vector_store %arg4[%c0_34, %c0_35, %c0_36], %35 {strides = array<i32>} : memref<1x64x24xf32, #tpu.memory_space<vmem>>, vector<1x64x24xf32>,
    %36 = tpu.iota {dimensions = array<i32: 1>} : vector<1x24xi32>
    %c24_i32 = arith.constant 24 : i32
    %37 = vector.broadcast %c24_i32 : i32 to vector<1x24xi32>
    %38 = arith.cmpi sge, %36, %37 : vector<1x24xi32>
    %c24_i32_37 = arith.constant 24 : i32
    %39 = vector.broadcast %c24_i32_37 : i32 to vector<1x24xi32>
    %40 = arith.subi %36, %39 : vector<1x24xi32>
    %41 = arith.select %38, %40, %36 : vector<1x24xi1>, vector<1x24xi32>
    %c12_i32 = arith.constant 12 : i32
    %42 = vector.broadcast %c12_i32 : i32 to vector<1x24xi32>
    %43 = arith.cmpi sge, %41, %42 : vector<1x24xi32>
    %c12_i32_38 = arith.constant 12 : i32
    %44 = vector.broadcast %c12_i32_38 : i32 to vector<1x24xi32>
    %45 = arith.subi %41, %44 : vector<1x24xi32>
    %46 = arith.select %43, %45, %41 : vector<1x24xi1>, vector<1x24xi32>
    %c6_i32 = arith.constant 6 : i32
    %47 = vector.broadcast %c6_i32 : i32 to vector<1x24xi32>
    %48 = arith.cmpi sge, %46, %47 : vector<1x24xi32>
    %c6_i32_39 = arith.constant 6 : i32
    %49 = vector.broadcast %c6_i32_39 : i32 to vector<1x24xi32>
    %50 = arith.subi %46, %49 : vector<1x24xi32>
    %51 = arith.select %48, %50, %46 : vector<1x24xi1>, vector<1x24xi32>
    %c4_i32 = arith.constant 4 : i32
    %52 = vector.broadcast %c4_i32 : i32 to vector<1x24xi32>
    %53 = arith.cmpi slt, %51, %52 : vector<1x24xi32>
    %cst_40 = arith.constant 0.000000e+00 : f32
    %54 = vector.shape_cast %53 : vector<1x24xi1> to vector<1x24xi1>
    %55 = vector.broadcast %54 : vector<1x24xi1> to vector<64x24xi1>
    %56 = vector.broadcast %cst_40 : f32 to vector<64x24xf32>
    %57 = arith.select %55, %32, %56 : vector<64x24xi1>, vector<64x24xf32>
    %cst_41 = arith.constant dense<0.000000e+00> : vector<64xf32>
    %58 = vector.multi_reduction <add>, %57, %cst_41 [1] : vector<64x24xf32> to vector<64xf32>
    %59 = vector.shape_cast %58 : vector<64xf32> to vector<64x1xf32>
    %c0_42 = arith.constant 0 : index
    %c0_43 = arith.constant 0 : index
    %c0_44 = arith.constant 0 : index
    %60 = vector.load %arg5[%c0_42, %c0_43, %c0_44] : memref<1x64x1xf32, #tpu.memory_space<vmem>>, vector<1x64x1xf32>
    %61 = vector.shape_cast %60 : vector<1x64x1xf32> to vector<64x1xf32>
    %62 = vector.shape_cast %59 : vector<64x1xf32> to vector<1x64x1xf32>
    tpu.vector_store %arg5[%c0_42, %c0_43, %c0_44], %62 {strides = array<i32>} : memref<1x64x1xf32, #tpu.memory_space<vmem>>, vector<1x64x1xf32>,
    %63 = arith.mulf %57, %32 : vector<64x24xf32>
    %cst_45 = arith.constant dense<0.000000e+00> : vector<64xf32>
    %64 = vector.multi_reduction <add>, %63, %cst_45 [1] : vector<64x24xf32> to vector<64xf32>
    %65 = vector.shape_cast %64 : vector<64xf32> to vector<64x1xf32>
    %c0_46 = arith.constant 0 : index
    %c0_47 = arith.constant 0 : index
    %c0_48 = arith.constant 0 : index
    %66 = vector.load %arg6[%c0_46, %c0_47, %c0_48] : memref<1x64x1xf32, #tpu.memory_space<vmem>>, vector<1x64x1xf32>
    %67 = vector.shape_cast %66 : vector<1x64x1xf32> to vector<64x1xf32>
    %68 = vector.shape_cast %65 : vector<64x1xf32> to vector<1x64x1xf32>
    tpu.vector_store %arg6[%c0_46, %c0_47, %c0_48], %68 {strides = array<i32>} : memref<1x64x1xf32, #tpu.memory_space<vmem>>, vector<1x64x1xf32>,
    return
  }
  func.func @transform_0(%arg0: i32) -> (i32, i32, i32) {
    %c0_i32 = arith.constant 0 : i32
    %c0_i32_0 = arith.constant 0 : i32
    %c0_i32_1 = arith.constant 0 : i32
    return %arg0, %c0_i32, %c0_i32_0 : i32, i32, i32
  }
  func.func @transform_1(%arg0: i32) -> (i32, i32) {
    %c0_i32 = arith.constant 0 : i32
    %c0_i32_0 = arith.constant 0 : i32
    %c0_i32_1 = arith.constant 0 : i32
    return %c0_i32, %c0_i32_0 : i32, i32
  }
  func.func @transform_2(%arg0: i32) -> (i32, i32) {
    %c0_i32 = arith.constant 0 : i32
    %c0_i32_0 = arith.constant 0 : i32
    %c0_i32_1 = arith.constant 0 : i32
    return %c0_i32, %c0_i32_0 : i32, i32
  }
  func.func @transform_3(%arg0: i32) -> (i32, i32, i32) {
    %c0_i32 = arith.constant 0 : i32
    %c0_i32_0 = arith.constant 0 : i32
    %c0_i32_1 = arith.constant 0 : i32
    return %arg0, %c0_i32, %c0_i32_0 : i32, i32, i32
  }
  func.func @transform_4(%arg0: i32) -> (i32, i32, i32) {
    %c0_i32 = arith.constant 0 : i32
    %c0_i32_0 = arith.constant 0 : i32
    %c0_i32_1 = arith.constant 0 : i32
    return %arg0, %c0_i32, %c0_i32_0 : i32, i32, i32
  }
  func.func @transform_5(%arg0: i32) -> (i32, i32, i32) {
    %c0_i32 = arith.constant 0 : i32
    %c0_i32_0 = arith.constant 0 : i32
    %c0_i32_1 = arith.constant 0 : i32
    return %arg0, %c0_i32, %c0_i32_0 : i32, i32, i32
  }
}

module attributes {stable_mosaic.version = 11 : i64} {
  func.func @kernel(%arg0: i32, %arg1: memref<1x64x24xf32, #tpu.memory_space<vmem>>, %arg2: memref<64x1xf32, #tpu.memory_space<vmem>>, %arg3: memref<64x1xf32, #tpu.memory_space<vmem>>, %arg4: memref<10x64xf32, #tpu.memory_space<vmem>>, %arg5: memref<10x1xf32, #tpu.memory_space<vmem>>, %arg6: memref<1x10x1xf32, #tpu.memory_space<vmem>>) attributes {dimension_semantics = [#tpu.dimension_semantics<parallel>], iteration_bounds = array<i64: 2>, scalar_prefetch = 0 : i64, scratch_operands = 0 : i64, tpu.core_type = #tpu.core_type<tc>, window_params = [{transform_indices = @transform_0, window_bounds = array<i64: 1, 64, 24>}, {pipeline_mode = #tpu.pipeline_mode<synchronous>, transform_indices = @transform_1, window_bounds = array<i64: 64, 1>}, {pipeline_mode = #tpu.pipeline_mode<synchronous>, transform_indices = @transform_2, window_bounds = array<i64: 64, 1>}, {pipeline_mode = #tpu.pipeline_mode<synchronous>, transform_indices = @transform_3, window_bounds = array<i64: 10, 64>}, {pipeline_mode = #tpu.pipeline_mode<synchronous>, transform_indices = @transform_4, window_bounds = array<i64: 10, 1>}, {transform_indices = @transform_5, window_bounds = array<i64: 1, 10, 1>}]} {
    %c0 = arith.constant 0 : index
    %c0_0 = arith.constant 0 : index
    %c0_1 = arith.constant 0 : index
    %0 = vector.load %arg1[%c0, %c0_0, %c0_1] : memref<1x64x24xf32, #tpu.memory_space<vmem>>, vector<1x64x24xf32>
    %1 = vector.shape_cast %0 : vector<1x64x24xf32> to vector<64x24xf32>
    %c0_2 = arith.constant 0 : index
    %c0_3 = arith.constant 0 : index
    %2 = vector.load %arg2[%c0_2, %c0_3] : memref<64x1xf32, #tpu.memory_space<vmem>>, vector<64x1xf32>
    %3 = vector.broadcast %2 : vector<64x1xf32> to vector<64x24xf32>
    %4 = arith.mulf %1, %3 : vector<64x24xf32>
    %c0_4 = arith.constant 0 : index
    %c0_5 = arith.constant 0 : index
    %5 = vector.load %arg3[%c0_4, %c0_5] : memref<64x1xf32, #tpu.memory_space<vmem>>, vector<64x1xf32>
    %6 = vector.broadcast %5 : vector<64x1xf32> to vector<64x24xf32>
    %7 = arith.addf %4, %6 : vector<64x24xf32>
    %cst = arith.constant 0.000000e+00 : f32
    %8 = vector.broadcast %cst : f32 to vector<64x24xf32>
    %9 = arith.maximumf %7, %8 : vector<64x24xf32>
    %10 = tpu.iota {dimensions = array<i32: 1>} : vector<1x24xi32>
    %c24_i32 = arith.constant 24 : i32
    %11 = vector.broadcast %c24_i32 : i32 to vector<1x24xi32>
    %12 = arith.cmpi sge, %10, %11 : vector<1x24xi32>
    %c24_i32_6 = arith.constant 24 : i32
    %13 = vector.broadcast %c24_i32_6 : i32 to vector<1x24xi32>
    %14 = arith.subi %10, %13 : vector<1x24xi32>
    %15 = arith.select %12, %14, %10 : vector<1x24xi1>, vector<1x24xi32>
    %c12_i32 = arith.constant 12 : i32
    %16 = vector.broadcast %c12_i32 : i32 to vector<1x24xi32>
    %17 = arith.cmpi sge, %15, %16 : vector<1x24xi32>
    %c12_i32_7 = arith.constant 12 : i32
    %18 = vector.broadcast %c12_i32_7 : i32 to vector<1x24xi32>
    %19 = arith.subi %15, %18 : vector<1x24xi32>
    %20 = arith.select %17, %19, %15 : vector<1x24xi1>, vector<1x24xi32>
    %c6_i32 = arith.constant 6 : i32
    %21 = vector.broadcast %c6_i32 : i32 to vector<1x24xi32>
    %22 = arith.cmpi sge, %20, %21 : vector<1x24xi32>
    %c6_i32_8 = arith.constant 6 : i32
    %23 = vector.broadcast %c6_i32_8 : i32 to vector<1x24xi32>
    %24 = arith.subi %20, %23 : vector<1x24xi32>
    %25 = arith.select %22, %24, %20 : vector<1x24xi1>, vector<1x24xi32>
    %c4_i32 = arith.constant 4 : i32
    %26 = vector.broadcast %c4_i32 : i32 to vector<1x24xi32>
    %27 = arith.cmpi slt, %25, %26 : vector<1x24xi32>
    %cst_9 = arith.constant 0.000000e+00 : f32
    %28 = vector.shape_cast %27 : vector<1x24xi1> to vector<1x24xi1>
    %29 = vector.broadcast %28 : vector<1x24xi1> to vector<64x24xi1>
    %30 = vector.broadcast %cst_9 : f32 to vector<64x24xf32>
    %31 = arith.select %29, %9, %30 : vector<64x24xi1>, vector<64x24xf32>
    %cst_10 = arith.constant dense<0xFF800000> : vector<64xf32>
    %32 = vector.multi_reduction <maximumf>, %31, %cst_10 [1] : vector<64x24xf32> to vector<64xf32>
    %33 = vector.shape_cast %32 : vector<64xf32> to vector<64x1xf32>
    %c0_11 = arith.constant 0 : index
    %c0_12 = arith.constant 0 : index
    %34 = vector.load %arg4[%c0_11, %c0_12] : memref<10x64xf32, #tpu.memory_space<vmem>>, vector<10x64xf32>
    %cst_13 = arith.constant dense<0.000000e+00> : vector<10x1xf32>
    %35 = tpu.matmul %34, %33, %cst_13 {dimension_numbers = #tpu.dot_dimension_numbers<[1], [0], [0], [1], [0, 0, 1, 1], [], []>} : vector<10x64xf32>, vector<64x1xf32>, vector<10x1xf32> -> vector<10x1xf32>
    %c0_14 = arith.constant 0 : index
    %c0_15 = arith.constant 0 : index
    %36 = vector.load %arg5[%c0_14, %c0_15] : memref<10x1xf32, #tpu.memory_space<vmem>>, vector<10x1xf32>
    %37 = arith.addf %35, %36 : vector<10x1xf32>
    %c0_16 = arith.constant 0 : index
    %c0_17 = arith.constant 0 : index
    %c0_18 = arith.constant 0 : index
    %38 = vector.load %arg6[%c0_16, %c0_17, %c0_18] : memref<1x10x1xf32, #tpu.memory_space<vmem>>, vector<1x10x1xf32>
    %39 = vector.shape_cast %38 : vector<1x10x1xf32> to vector<10x1xf32>
    %40 = vector.shape_cast %37 : vector<10x1xf32> to vector<1x10x1xf32>
    tpu.vector_store %arg6[%c0_16, %c0_17, %c0_18], %40 {strides = array<i32>} : memref<1x10x1xf32, #tpu.memory_space<vmem>>, vector<1x10x1xf32>,
    return
  }
  func.func @transform_0(%arg0: i32) -> (i32, i32, i32) {
    %c0_i32 = arith.constant 0 : i32
    %c0_i32_0 = arith.constant 0 : i32
    %c0_i32_1 = arith.constant 0 : i32
    return %arg0, %c0_i32, %c0_i32_0 : i32, i32, i32
  }
  func.func @transform_1(%arg0: i32) -> (i32, i32) {
    %c0_i32 = arith.constant 0 : i32
    %c0_i32_0 = arith.constant 0 : i32
    %c0_i32_1 = arith.constant 0 : i32
    return %c0_i32, %c0_i32_0 : i32, i32
  }
  func.func @transform_2(%arg0: i32) -> (i32, i32) {
    %c0_i32 = arith.constant 0 : i32
    %c0_i32_0 = arith.constant 0 : i32
    %c0_i32_1 = arith.constant 0 : i32
    return %c0_i32, %c0_i32_0 : i32, i32
  }
  func.func @transform_3(%arg0: i32) -> (i32, i32) {
    %c0_i32 = arith.constant 0 : i32
    %c0_i32_0 = arith.constant 0 : i32
    %c0_i32_1 = arith.constant 0 : i32
    return %c0_i32, %c0_i32_0 : i32, i32
  }
  func.func @transform_4(%arg0: i32) -> (i32, i32) {
    %c0_i32 = arith.constant 0 : i32
    %c0_i32_0 = arith.constant 0 : i32
    %c0_i32_1 = arith.constant 0 : i32
    return %c0_i32, %c0_i32_0 : i32, i32
  }
  func.func @transform_5(%arg0: i32) -> (i32, i32, i32) {
    %c0_i32 = arith.constant 0 : i32
    %c0_i32_0 = arith.constant 0 : i32
    %c0_i32_1 = arith.constant 0 : i32
    return %arg0, %c0_i32, %c0_i32_0 : i32, i32, i32
  }
}

</mosaic_0001>

<bundles_post_ra>
// kernel: vgg_forward.8
= control target key start
LH: loop header
LB: loop body
LE: loop exit
PB: predicated region body
PF: predicated region fallthrough
CT: control target
= control target key end

     0   :  { %s701_s18 = smov 0   ;;  %s762_s0 = inlined_call_operand.vmem [shape: f32[2,8,110], index: 0, kind: input, shape index: {}]   ;;  %s763_s1 = inlined_call_operand.vmem [shape: f32[16,72], index: 1, kind: input, shape index: {}]   ;;  %s764_s2 = inlined_call_operand.vmem [shape: f32[16,1], index: 2, kind: input, shape index: {}]   ;;  %s765_s3 = inlined_call_operand.vmem [shape: f32[2,16,80], index: 3, kind: output, shape index: {0}]   ;;  %s766_s4 = inlined_call_operand.vmem [shape: f32[2,16,1], index: 4, kind: output, shape index: {1}]   ;;  %s767_s5 = inlined_call_operand.vmem [shape: f32[2,16,1], index: 5, kind: output, shape index: {2}]  }
   0x1 LB: > { %s564_s19 = sadd.s32 4294967295, %s660_s18   ;;  %p568_p0 = scmp.ge.s32.totalorder %s660_s18, 1  ;;  %s660_s18 = sphi %s701_s18, %s16_s18  }
   0x2   : > { %p191_p1 = scmp.lt.s32.totalorder %s660_s18, 3 }
   0x4   : > { %p192_p2 = pnand %p568_p0, %p191_p1 }
   0x5   : > { %p228_p3 = scmp.lt.s32.totalorder (!%p192_p2), %s564_s19, 1  ;;  %vm248_vm0 = vcmask (!%p192_p2), 654336   ;;  %s662_s24 = smov (!%p192_p2), 127   ;;  %v298_v1 = vld [vmem:[%s763_s1] sm:$0xff] (!%p192_p2)  ;;  %vm321_vm1 = vcmask (!%p192_p2), 588800   ;;  %v310_v2 = vld [vmem:[%s764_s2 + $0x8] sm:$0xff] (!%p192_p2)  ;;  %v405_v27 = vlaneseq (!%p192_p2) }
   0x6   : > { %195 = sbr.rel (%p192_p2) target bundleno = 524 (0x20c), region = 32  ;;  %s663_s25 = smov (!%p192_p2), 118   ;;  %616 = vmatprep.mubr.msk.f32.mxu0 (!%p192_p2), %vm321_vm1, %v298_v1  ;;  %v309_v3 = vld [vmem:[%s764_s2] sm:$0xff] (!%p192_p2)  ;;  %v670_v4 = vmov (!%p192_p2), 0   ;;  %v299_v26 = vld [vmem:[%s763_s1 + $0x8] sm:$0xff] (!%p192_p2)  ;;  %vm430_vm7 = vcmask (!%p192_p2), 7168  }
   0x7   : > { %s664_s26 = smov (!%p192_p2), 126   ;;  %s665_s27 = smov (!%p192_p2), 117   ;;  %653 = vset.pattern.permute.xlu1 (!%p192_p2), %v670_v4  ;;  %652 = vset.pattern.permute.xlu0 (!%p192_p2), %v670_v4  ;;  %v406_v28 = vand.u32 (!%p192_p2), 127, %v405_v27 }
   0x8   : > { %s666_s28 = smov (!%p192_p2), 116   ;;  %s667_s29 = smov (!%p192_p2), 108  }
   0x9   : > { %s668_s30 = smov (!%p192_p2), 107   ;;  %s669_s6 = smov (!%p192_p2), 106   ;;  %v578_v29 = vadd.s32 (!%p192_p2), 4294967216, %v406_v28  ;;  %vm407_vm2 = vcmp.ge.s32.totalorder (!%p192_p2), %v406_v28, 80 }
   0xb   : > { %v409_v30 = vsel (!%p192_p2), %vm407_vm2, %v578_v29, %v406_v28 }
   0xc   : > { %v579_v31 = vadd.s32 (!%p192_p2), 4294967256, %v409_v30  ;;  %vm410_vm3 = vcmp.ge.s32.totalorder (!%p192_p2), %v409_v30, 40 }
   0xd   : > { %s769_s19 = smov (!%p228_p3, %s564_s19), 1 }
   0xe   : > { %s569_s20 = sshll.u32 %s769_s19, 3  ;;  %v412_v32 = vsel %vm410_vm3, %v579_v31, %v409_v30  ;;  %s739_s15 = sshll.u32 %s769_s19, 4 }
   0xf   : > { %s231_s23 = scalar_lea.vmem %s762_s0, %s569_s20  ;;  %v580_v33 = vadd.s32 4294967276, %v412_v32  ;;  %vm413_vm4 = vcmp.ge.s32.totalorder %v412_v32, 20  ;;  %s236_s20 = scalar_lea.vmem %s765_s3, %s739_s15 }
  0x10   : > { %v250_v0 = vld [vmem:[%s231_s23] sm:$0xff]  ;;  %s241_s22 = scalar_lea.vmem %s766_s4, %s739_s15 }
  0x11   : > { %252 = vrot.lane.b32.xlu0 %v250_v0, %s662_s24  ;;  %264 = vrot.lane.b32.xlu1 %v250_v0, %s663_s25  ;;  %249 = vst.msk [vmem:[#allocation2] sm:$0xff] %vm248_vm0, %v250_v0  ;;  %v415_v34 = vsel %vm413_vm4, %v580_v33, %v412_v32  ;;  %s246_s25 = scalar_lea.vmem %s767_s5, %s739_s15 }
  0x12   : > { %v581_v35 = vadd.s32 4294967286, %v415_v34  ;;  %vm416_vm5 = vcmp.ge.s32.totalorder %v415_v34, 10 }
  0x14   : > { %v418_v36 = vsel %vm416_vm5, %v581_v35, %v415_v34 }
  0x15   : > { %258 = vrot.lane.b32.xlu0 %v250_v0, %s664_s26  ;;  %270 = vrot.lane.b32.xlu1 %v250_v0, %s665_s27  ;;  %vm419_vm6 = vcmp.lt.s32.totalorder %v418_v36, 8 }
  0x18   : > { %v300_v9 = vld [vmem:[#allocation2] sm:$0xff] }
  0x19   : > { %276 = vrot.lane.b32.xlu0 %v250_v0, %s666_s28  ;;  %282 = vrot.lane.b32.xlu1 %v250_v0, %s667_s29 }
  0x1d   : > { %288 = vrot.lane.b32.xlu0 %v250_v0, %s668_s30  ;;  %294 = vrot.lane.b32.xlu1 %v250_v0, %s669_s6 }
  0x21   : > { %318 = vperm.xlu1 %653, %v310_v2   ;;  %313 = vperm.xlu0 %652, %v309_v3  }
  0x83   : > { %v253_v5 = vpop.permute.xlu0 %252  ;;  %v265_v6 = vpop.permute.xlu1 %264 }
  0x84   : > { %255 = vst.msk [vmem:[#allocation2 + $0x8] sm:$0xff] %vm248_vm0, %v253_v5  ;;  %267 = vst.msk [vmem:[#allocation2 + $0x18] sm:$0xff] %vm248_vm0, %v265_v6 }
  0x87   : > { %v259_v7 = vpop.permute.xlu0 %258  ;;  %v271_v8 = vpop.permute.xlu1 %270 }
  0x88   : > { %261 = vst.msk [vmem:[#allocation2 + $0x10] sm:$0xff] %vm248_vm0, %v259_v7  ;;  %273 = vst.msk [vmem:[#allocation2 + $0x20] sm:$0xff] %vm248_vm0, %v271_v8 }
  0x8b   : > { %v277_v10 = vpop.permute.xlu0 %276  ;;  %v301_v11 = vld [vmem:[#allocation2 + $0x8] sm:$0xff]  ;;  %v283_v12 = vpop.permute.xlu1 %282  ;;  %v303_v14 = vld [vmem:[#allocation2 + $0x18] sm:$0xff] }
  0x8c   : > { %279 = vst.msk [vmem:[#allocation2 + $0x28] sm:$0xff] %vm248_vm0, %v277_v10  ;;  %v619_v13 = vpack.c.bf16 %v301_v11, %v300_v9  ;;  %285 = vst.msk [vmem:[#allocation2 + $0x30] sm:$0xff] %vm248_vm0, %v283_v12 }
  0x8e   : > { %620 = vmatprep.subr.bf16.mxu0 %v619_v13 }
  0x8f   : > { %v289_v15 = vpop.permute.xlu0 %288  ;;  %622 = vmatpush3.bf16.msra.mxu0 %v619_v13  ;;  %v302_v16 = vld [vmem:[#allocation2 + $0x10] sm:$0xff]  ;;  %v295_v17 = vpop.permute.xlu1 %294  ;;  %v304_v19 = vld [vmem:[#allocation2 + $0x20] sm:$0xff] }
  0x90   : > { %291 = vst.msk [vmem:[#allocation2 + $0x38] sm:$0xff] %vm248_vm0, %v289_v15  ;;  %v623_v18 = vpack.c.bf16 %v303_v14, %v302_v16  ;;  %297 = vst.msk [vmem:[#allocation2 + $0x40] sm:$0xff] %vm248_vm0, %v295_v17 }
  0x92   : > { %624 = vmatprep.subr.bf16.mxu0 %v623_v18 }
  0x93   : > { %626 = vmatpush3.bf16.msra.mxu0 %v623_v18  ;;  %v305_v20 = vld [vmem:[#allocation2 + $0x28] sm:$0xff]  ;;  %v306_v22 = vld [vmem:[#allocation2 + $0x30] sm:$0xff] }
  0x94   : > { %v627_v21 = vpack.c.bf16 %v305_v20, %v304_v19 }
  0x96   : > { %628 = vmatprep.subr.bf16.mxu0 %v627_v21 }
  0x97   : > { %630 = vmatpush3.bf16.msra.mxu0 %v627_v21  ;;  %v307_v23 = vld [vmem:[#allocation2 + $0x38] sm:$0xff]  ;;  %v308_v25 = vld [vmem:[#allocation2 + $0x40] sm:$0xff] }
  0x98   : > { %v631_v24 = vpack.c.bf16 %v307_v23, %v306_v22 }
  0x9a   : > { %632 = vmatprep.subr.bf16.mxu0 %v631_v24 }
  0x9b   : > { %634 = vmatpush3.bf16.msra.mxu0 %v631_v24 }
  0x9c   : > { %614 = vmatprep.subr.mxu0 %v308_v25 }
  0x9f   : > { %615 = vmatpush3.msra.mxu0 %v308_v25 }
  0xa0   : > { %617 = vmatmul.mubr.msk.f32.vlgmr.msra.gmra.mrb[0].mxu0 %vm321_vm1, %v299_v26  ;;  %v319_v37 = vpop.permute.xlu1 %318  ;;  %v314_v38 = vpop.permute.xlu0 %313 }
 0x173   : > { %v618_v39 = vpop.f32.mrb[0].mxu0 }
 0x174   : > { %v400_v40 = vadd.f32 %v618_v39, %v319_v37  ;;  %v394_v41 = vpop.f32.mrb[1].mxu0 }
 0x175   : > { %v395_v42 = vadd.f32 %v394_v41, %v314_v38 }
 0x176   : > { %404 = vst.msk [vmem:[%s236_s20 + $0x8] sm:$0xff] %vm248_vm0, %v400_v40  ;;  %v423_v43 = vsel %vm419_vm6, %v400_v40, 0.0 }
 0x177   : > { %403 = vst.msk [vmem:[%s236_s20] sm:$0xff] %vm248_vm0, %v395_v42  ;;  %v427_v44 = vsel %vm248_vm0, %v423_v43, 0.0  ;;  %v422_v45 = vsel %vm419_vm6, %v395_v42, 0.0  ;;  %v434_v48 = vmul.f32 %v423_v43, %v400_v40 }
 0x178   : > { %428 = vadd.xlane.f32.xlu0 %v427_v44  ;;  %v424_v46 = vsel %vm248_vm0, %v422_v45, 0.0  ;;  %v433_v47 = vmul.f32 %v422_v45, %v395_v42 }
 0x179   : > { %425 = vadd.xlane.f32.xlu1 %v424_v46  ;;  %v438_v50 = vsel %vm248_vm0, %v434_v48, 0.0 }
 0x17a   : > { %v435_v49 = vsel %vm248_vm0, %v433_v47, 0.0 }
 0x17c   : > { %436 = vadd.xlane.f32.xlu0 %v435_v49 }
 0x17d   : > { %439 = vadd.xlane.f32.xlu1 %v438_v50 }
 0x205   : > { %v429_v51 = vpop.xlane.xlu0 %428 }
 0x206   : > { %432 = vst.msk [vmem:[%s241_s22 + $0x8] sm:$0xff] %vm430_vm7, %v429_v51  ;;  %v426_v52 = vpop.xlane.xlu1 %425 }
 0x207   : > { %431 = vst.msk [vmem:[%s241_s22] sm:$0xff] %vm430_vm7, %v426_v52 }
 0x209   : > { %v437_v53 = vpop.xlane.xlu0 %436 }
 0x20a   : > { %441 = vst.msk [vmem:[%s246_s25] sm:$0xff] %vm430_vm7, %v437_v53  ;;  %v440_v54 = vpop.xlane.xlu1 %439 }
 0x20b   : > { %442 = vst.msk [vmem:[%s246_s25 + $0x8] sm:$0xff] %vm430_vm7, %v440_v54 }
 0x20c PF: > { %s16_s18 = sadd.s32 1, %s660_s18  }
 0x20d   : > { %p13_p4 = scmp.ge.s32.totalorder %s16_s18, 4  }
 0x20f   :  { %15 = sbr.rel (!%p13_p4) target bundleno = 1 (0x1), region = 86 }

// kernel: vgg_forward.9
= control target key start
LH: loop header
LB: loop body
LE: loop exit
PB: predicated region body
PF: predicated region fallthrough
CT: control target
= control target key end

     0   :  { %s960_s15 = smov 0   ;;  %s1128_s0 = inlined_call_operand.vmem [shape: f32[2,16,80], index: 0, kind: input, shape index: {}]   ;;  %s1129_s1 = inlined_call_operand.vmem [shape: f32[16,1], index: 1, kind: input, shape index: {}]   ;;  %s1130_s2 = inlined_call_operand.vmem [shape: f32[16,1], index: 2, kind: input, shape index: {}]   ;;  %s1131_s3 = inlined_call_operand.vmem [shape: f32[4,80,42], index: 3, kind: input, shape index: {}]   ;;  %s1132_s4 = inlined_call_operand.vmem [shape: f32[2,16,42], index: 4, kind: output, shape index: {}]  }
   0x1 LB: > { %s644_s16 = sadd.s32 4294967295, %s932_s15   ;;  %p648_p0 = scmp.ge.s32.totalorder %s932_s15, 1  ;;  %s932_s15 = sphi %s960_s15, %s14_s15  }
   0x2   : > { %p162_p1 = scmp.lt.s32.totalorder %s932_s15, 3 }
   0x4   : > { %p163_p2 = pnand %p648_p0, %p162_p1 }
   0x5   : > { %v214_v0 = vld [vmem:[%s1130_s2] sm:$0xff] (!%p163_p2)  ;;  %v934_v2 = vmov (!%p163_p2), 0   ;;  %v215_v3 = vld [vmem:[%s1130_s2 + $0x8] sm:$0xff] (!%p163_p2)  ;;  %v655_v8 = vld [vmem:[%s1131_s3 + $0x50] sm:$0xff] (!%p163_p2)  ;;  %p188_p3 = scmp.lt.s32.totalorder (!%p163_p2), %s644_s16, 1  ;;  %vm240_vm0 = vcmask (!%p163_p2), 654336  }
   0x6   : > { %166 = sbr.rel (%p163_p2) target bundleno = 384 (0x180), region = 36  ;;  %v200_v1 = vld [vmem:[%s1129_s1] sm:$0xff] (!%p163_p2)  ;;  %925 = vset.pattern.permute.xlu1 (!%p163_p2), %v934_v2  ;;  %924 = vset.pattern.permute.xlu0 (!%p163_p2), %v934_v2  ;;  %v201_v4 = vld [vmem:[%s1129_s1 + $0x8] sm:$0xff] (!%p163_p2)  ;;  %v656_v9 = vld [vmem:[%s1131_s3 + $0x58] sm:$0xff] (!%p163_p2)  ;;  %vm586_vm1 = vcmask (!%p163_p2), 343040  }
   0x7   : > { %v230_v5 = vld [vmem:[%s1131_s3] sm:$0xff] (!%p163_p2)  ;;  %v231_v6 = vld [vmem:[%s1131_s3 + $0x8] sm:$0xff] (!%p163_p2)  ;;  %218 = vperm.xlu1 (!%p163_p2), %925, %v214_v0   ;;  %204 = vperm.xlu0 (!%p163_p2), %924, %v200_v1   ;;  %v232_v10 = vld [vmem:[%s1131_s3 + $0x10] sm:$0xff] (!%p163_p2)  ;;  %v855_v11 = vpack.c.bf16 (!%p163_p2), %v656_v9, %v655_v8 }
   0x8   : > { %v835_v7 = vpack.c.bf16 (!%p163_p2), %v231_v6, %v230_v5  ;;  %v233_v12 = vld [vmem:[%s1131_s3 + $0x18] sm:$0xff] (!%p163_p2)  ;;  %v657_v13 = vld [vmem:[%s1131_s3 + $0x60] sm:$0xff] (!%p163_p2)  ;;  %v658_v14 = vld [vmem:[%s1131_s3 + $0x68] sm:$0xff] (!%p163_p2) }
   0x9   : > { %v839_v15 = vpack.c.bf16 (!%p163_p2), %v233_v12, %v232_v10  ;;  %v859_v16 = vpack.c.bf16 (!%p163_p2), %v658_v14, %v657_v13  ;;  %v234_v17 = vld [vmem:[%s1131_s3 + $0x20] sm:$0xff] (!%p163_p2)  ;;  %v235_v18 = vld [vmem:[%s1131_s3 + $0x28] sm:$0xff] (!%p163_p2)  ;;  %856 = vmatprep.subr.bf16.mxu1 (!%p163_p2), %v855_v11  ;;  %v659_v19 = vld [vmem:[%s1131_s3 + $0x70] sm:$0xff] (!%p163_p2) }
   0xa   : > { %836 = vmatprep.subr.bf16.mxu0 (!%p163_p2), %v835_v7  ;;  %v660_v20 = vld [vmem:[%s1131_s3 + $0x78] sm:$0xff] (!%p163_p2)  ;;  %v843_v21 = vpack.c.bf16 (!%p163_p2), %v235_v18, %v234_v17  ;;  %858 = vmatpush3.bf16.msra.mxu1 (!%p163_p2), %v855_v11  ;;  %v236_v22 = vld [vmem:[%s1131_s3 + $0x30] sm:$0xff] (!%p163_p2)  ;;  %v661_v25 = vld [vmem:[%s1131_s3 + $0x80] sm:$0xff] (!%p163_p2) }
   0xb   : > { %838 = vmatpush3.bf16.msra.mxu0 (!%p163_p2), %v835_v7  ;;  %223 = vperm.xlu1 (!%p163_p2), %925, %v215_v3   ;;  %v237_v23 = vld [vmem:[%s1131_s3 + $0x38] sm:$0xff] (!%p163_p2)  ;;  %v863_v24 = vpack.c.bf16 (!%p163_p2), %v660_v20, %v659_v19  ;;  %v662_v26 = vld [vmem:[%s1131_s3 + $0x88] sm:$0xff] (!%p163_p2)  ;;  %v238_v28 = vld [vmem:[%s1131_s3 + $0x40] sm:$0xff] (!%p163_p2) }
   0xc   : > { %209 = vperm.xlu0 (!%p163_p2), %924, %v201_v4   ;;  %840 = vmatprep.subr.bf16.mxu0 (!%p163_p2), %v839_v15  ;;  %v847_v27 = vpack.c.bf16 (!%p163_p2), %v237_v23, %v236_v22  ;;  %v239_v29 = vld [vmem:[%s1131_s3 + $0x48] sm:$0xff] (!%p163_p2)  ;;  %v867_v30 = vpack.c.bf16 (!%p163_p2), %v662_v26, %v661_v25  ;;  %v663_v31 = vld [vmem:[%s1131_s3 + $0x90] sm:$0xff] (!%p163_p2)  ;;  %v664_v32 = vld [vmem:[%s1131_s3 + $0x98] sm:$0xff] (!%p163_p2) }
   0xd   : > { %860 = vmatprep.subr.bf16.mxu1 %v859_v16  ;;  %v851_v33 = vpack.c.bf16 %v239_v29, %v238_v28  ;;  %v667_v34 = vld [vmem:[%s1131_s3 + $0xa0] sm:$0xff]  ;;  %v668_v35 = vld [vmem:[%s1131_s3 + $0xa8] sm:$0xff]  ;;  %v871_v36 = vpack.c.bf16 %v664_v32, %v663_v31  ;;  %v679_v37 = vld [vmem:[%s1131_s3 + $0xf0] sm:$0xff]  ;;  %s1134_s16 = smov (!%p188_p3, %s644_s16), 1 }
   0xe   : > { %862 = vmatpush3.bf16.msra.mxu1 %v859_v16  ;;  %v680_v38 = vld [vmem:[%s1131_s3 + $0xf8] sm:$0xff]  ;;  %v875_v39 = vpack.c.bf16 %v668_v35, %v667_v34  ;;  %s693_s25 = sshll.u32 %s1134_s16, 4  ;;  %v669_v51 = vld [vmem:[%s1131_s3 + $0xb0] sm:$0xff]  ;;  %v681_v54 = vld [vmem:[%s1131_s3 + $0x100] sm:$0xff] }
   0xf   : > { %842 = vmatpush3.bf16.msra.mxu0 %v839_v15  ;;  %864 = vmatprep.subr.bf16.mxu1 %v863_v24  ;;  %v895_v40 = vpack.c.bf16 %v680_v38, %v679_v37  ;;  %s192_s28 = scalar_lea.vmem %s1128_s0, %s693_s25  ;;  %v670_v53 = vld [vmem:[%s1131_s3 + $0xb8] sm:$0xff]  ;;  %v682_v55 = vld [vmem:[%s1131_s3 + $0x108] sm:$0xff]  ;;  %v671_v57 = vld [vmem:[%s1131_s3 + $0xc0] sm:$0xff]  ;;  %s197_s14 = scalar_lea.vmem %s1132_s4, %s693_s25 }
  0x10   : > { %844 = vmatprep.subr.bf16.mxu0 %v843_v21  ;;  %v198_v41 = vld [vmem:[%s192_s28] sm:$0xff]  ;;  %v199_v45 = vld [vmem:[%s192_s28 + $0x8] sm:$0xff]  ;;  %v879_v58 = vpack.c.bf16 %v670_v53, %v669_v51  ;;  %v899_v59 = vpack.c.bf16 %v682_v55, %v681_v54  ;;  %v683_v61 = vld [vmem:[%s1131_s3 + $0x110] sm:$0xff] }
  0x11   : > { %v672_v60 = vld [vmem:[%s1131_s3 + $0xc8] sm:$0xff]  ;;  %v684_v62 = vld [vmem:[%s1131_s3 + $0x118] sm:$0xff]  ;;  %v673_v1 = vld [vmem:[%s1131_s3 + $0xd0] sm:$0xff] }
  0x12   : > { %866 = vmatpush3.bf16.msra.mxu1 %v863_v24  ;;  %v883_v63 = vpack.c.bf16 %v672_v60, %v671_v57  ;;  %v903_v0 = vpack.c.bf16 %v684_v62, %v683_v61  ;;  %v674_v2 = vld [vmem:[%s1131_s3 + $0xd8] sm:$0xff]  ;;  %v685_v3 = vld [vmem:[%s1131_s3 + $0x120] sm:$0xff]  ;;  %v686_v4 = vld [vmem:[%s1131_s3 + $0x128] sm:$0xff] }
  0x13   : > { %846 = vmatpush3.bf16.msra.mxu0 %v843_v21  ;;  %868 = vmatprep.subr.bf16.mxu1 %v867_v30  ;;  %v887_v5 = vpack.c.bf16 %v674_v2, %v673_v1  ;;  %v907_v6 = vpack.c.bf16 %v686_v4, %v685_v3  ;;  %v675_v7 = vld [vmem:[%s1131_s3 + $0xe0] sm:$0xff]  ;;  %v676_v8 = vld [vmem:[%s1131_s3 + $0xe8] sm:$0xff]  ;;  %v687_v9 = vld [vmem:[%s1131_s3 + $0x130] sm:$0xff] }
  0x14   : > { %848 = vmatprep.subr.bf16.mxu0 %v847_v27  ;;  %v688_v10 = vld [vmem:[%s1131_s3 + $0x138] sm:$0xff]  ;;  %v891_v11 = vpack.c.bf16 %v676_v8, %v675_v7 }
  0x15   : > { %v911_v12 = vpack.c.bf16 %v688_v10, %v687_v9 }
  0x16   : > { %870 = vmatpush3.bf16.msra.mxu1 %v867_v30 }
  0x17   : > { %850 = vmatpush3.bf16.msra.mxu0 %v847_v27  ;;  %872 = vmatprep.subr.bf16.mxu1 %v871_v36 }
  0x18   : > { %852 = vmatprep.subr.bf16.mxu0 %v851_v33 }
  0x1a   : > { %874 = vmatpush3.bf16.msra.mxu1 %v871_v36 }
  0x1b   : > { %854 = vmatpush3.bf16.msra.mxu0 %v851_v33  ;;  %896 = vmatprep.subr.bf16.mxu1 %v895_v40 }
  0x1c   : > { %876 = vmatprep.subr.bf16.mxu0 %v875_v39 }
  0x86   : > { %v219_v42 = vpop.permute.xlu1 %218  ;;  %v205_v43 = vpop.permute.xlu0 %204 }
  0x87   : > { %v212_v44 = vmul.f32 %v205_v43, %v198_v41 }
  0x89   : > { %v226_v46 = vadd.f32 %v219_v42, %v212_v44 }
  0x8a   : > { %v224_v50 = vpop.permute.xlu1 %223 }
  0x8b   : > { %v210_v47 = vpop.permute.xlu0 %209  ;;  %v228_v48 = vmax.f32 %v226_v46, 0.0 }
  0x8c   : > { %v213_v49 = vmul.f32 %v210_v47, %v199_v45 }
  0x8d   : > { %763 = vmatprep.mubr.msk.f32.mxu0 %vm240_vm0, %v228_v48  ;;  %786 = vmatprep.mubr.msk.f32.mxu1 %vm240_vm0, %v228_v48 }
  0x8e   : > { %v227_v52 = vadd.f32 %v224_v50, %v213_v49 }
  0x90   : > { %v229_v56 = vmax.f32 %v227_v52, 0.0 }
  0x92   : > { %764 = vmatmul.mubr.msk.f32.vlgmr.msra.gmra.mrb[0].mxu0 %vm240_vm0, %v229_v56  ;;  %787 = vmatmul.mubr.msk.f32.vlgmr.msra.gmra.mrb[0].mxu1 %vm240_vm0, %v229_v56 }
  0x93   : > { %878 = vmatpush3.bf16.msra.mxu0 %v875_v39  ;;  %898 = vmatpush3.bf16.msra.mxu1 %v895_v40 }
  0x94   : > { %809 = vmatprep.mubr.msk.f32.mxu0 %vm240_vm0, %v228_v48  ;;  %832 = vmatprep.mubr.msk.f32.mxu1 %vm240_vm0, %v228_v48 }
  0x95   : > { %880 = vmatprep.subr.bf16.mxu0 %v879_v58  ;;  %900 = vmatprep.subr.bf16.mxu1 %v899_v59 }
  0x97   : > { %882 = vmatpush3.bf16.msra.mxu0 %v879_v58  ;;  %902 = vmatpush3.bf16.msra.mxu1 %v899_v59 }
  0x98   : > { %884 = vmatprep.subr.bf16.mxu0 %v883_v63  ;;  %904 = vmatprep.subr.bf16.mxu1 %v903_v0 }
  0x9b   : > { %886 = vmatpush3.bf16.msra.mxu0 %v883_v63  ;;  %906 = vmatpush3.bf16.msra.mxu1 %v903_v0 }
  0x9c   : > { %888 = vmatprep.subr.bf16.mxu0 %v887_v5  ;;  %908 = vmatprep.subr.bf16.mxu1 %v907_v6 }
  0x9f   : > { %890 = vmatpush3.bf16.msra.mxu0 %v887_v5  ;;  %910 = vmatpush3.bf16.msra.mxu1 %v907_v6 }
  0xa0   : > { %892 = vmatprep.subr.bf16.mxu0 %v891_v11  ;;  %912 = vmatprep.subr.bf16.mxu1 %v911_v12 }
  0xa3   : > { %894 = vmatpush3.bf16.msra.mxu0 %v891_v11  ;;  %914 = vmatpush3.bf16.msra.mxu1 %v911_v12 }
  0xa6   : > { %810 = vmatmul.mubr.msk.f32.vlgmr.msra.gmra.mrb[2].mxu0 %vm240_vm0, %v229_v56  ;;  %833 = vmatmul.mubr.msk.f32.vlgmr.msra.gmra.mrb[2].mxu1 %vm240_vm0, %v229_v56 }
 0x165   : > { %v765_v13 = vpop.f32.mrb[0].mxu0  ;;  %v788_v14 = vpop.f32.mrb[0].mxu1 }
 0x166   : > { %v409_v15 = vmax.f32 %v765_v13, %v788_v14  ;;  %v313_v16 = vpop.f32.mrb[1].mxu0  ;;  %v399_v17 = vpop.f32.mrb[1].mxu1 }
 0x167   : > { %v408_v18 = vmax.f32 %v313_v16, %v399_v17 }
 0x179   : > { %v811_v19 = vpop.f32.mrb[2].mxu0  ;;  %v834_v20 = vpop.f32.mrb[2].mxu1 }
 0x17a   : > { %v497_v21 = vmax.f32 %v409_v15, %v811_v19  ;;  %v487_v22 = vpop.f32.mrb[3].mxu0  ;;  %v575_v23 = vpop.f32.mrb[3].mxu1 }
 0x17b   : > { %v496_v24 = vmax.f32 %v408_v18, %v487_v22 }
 0x17c   : > { %v585_v25 = vmax.f32 %v497_v21, %v834_v20 }
 0x17d   : > { %v584_v26 = vmax.f32 %v496_v24, %v575_v23 }
 0x17e   : > { %588 = vst.msk [vmem:[%s197_s14 + $0x8] sm:$0xff] %vm586_vm1, %v585_v25 }
 0x17f   : > { %587 = vst.msk [vmem:[%s197_s14] sm:$0xff] %vm586_vm1, %v584_v26 }
 0x180 PF: > { %s14_s15 = sadd.s32 1, %s932_s15  }
 0x181   : > { %p11_p4 = scmp.ge.s32.totalorder %s14_s15, 4  }
 0x183   :  { %13 = sbr.rel (!%p11_p4) target bundleno = 1 (0x1), region = 69 }

// kernel: vgg_forward.6
= control target key start
LH: loop header
LB: loop body
LE: loop exit
PB: predicated region body
PF: predicated region fallthrough
CT: control target
= control target key end

     0   :  { %s970_s18 = smov 0   ;;  %s1057_s0 = inlined_call_operand.vmem [shape: f32[2,3,342], index: 0, kind: input, shape index: {}]   ;;  %s1058_s1 = inlined_call_operand.vmem [shape: f32[8,27], index: 1, kind: input, shape index: {}]   ;;  %s1059_s2 = inlined_call_operand.vmem [shape: f32[8,1], index: 2, kind: input, shape index: {}]   ;;  %s1060_s3 = inlined_call_operand.vmem [shape: f32[2,8,288], index: 3, kind: output, shape index: {0}]   ;;  %s1061_s4 = inlined_call_operand.vmem [shape: f32[2,8,1], index: 4, kind: output, shape index: {1}]   ;;  %s1062_s5 = inlined_call_operand.vmem [shape: f32[2,8,1], index: 5, kind: output, shape index: {2}]  }
   0x1 LB: > { %s821_s19 = sadd.s32 4294967295, %s925_s18   ;;  %p825_p0 = scmp.ge.s32.totalorder %s925_s18, 1  ;;  %s925_s18 = sphi %s970_s18, %s16_s18  }
   0x2   : > { %p192_p1 = scmp.lt.s32.totalorder %s925_s18, 3 }
   0x4   : > { %p193_p2 = pnand %p825_p0, %p192_p1 }
   0x5   : > { %p228_p3 = scmp.lt.s32.totalorder (!%p193_p2), %s821_s19, 1  ;;  %s927_s24 = smov (!%p193_p2), 109   ;;  %vm253_vm0 = vcmask (!%p193_p2), 256000   ;;  %v931_v25 = vmov (!%p193_p2), 0.0|0.0   ;;  %v936_v46 = vmov (!%p193_p2), 0.0   ;;  %vm937_vm1 = vmmov (!%p193_p2), 0  }
   0x6   : > { %196 = sbr.rel (%p193_p2) target bundleno = 558 (0x22e), region = 32  ;;  %s928_s25 = smov (!%p193_p2), 126   ;;  %878 = vmatprep.subr.bf16.mxu1 (!%p193_p2), %v931_v25  ;;  %546 = vmatprep.mubr.f32.mxu0 (!%p193_p2), %v936_v46  ;;  %v462_v47 = vld [vmem:[%s1059_s2] sm:$0xff] (!%p193_p2)  ;;  %v938_v48 = vmov (!%p193_p2), 0   ;;  %vm301_vm2 = vcmask (!%p193_p2), 261126   ;;  %vm305_vm3 = vcmask (!%p193_p2), 253952  }
   0x7   : > { %s929_s26 = smov (!%p193_p2), 127   ;;  %s930_s27 = smov (!%p193_p2), 110   ;;  %865 = vmatprep.mubr.msk.f32.mxu1 (!%p193_p2), %vm937_vm1, %v936_v46  ;;  %908 = vset.pattern.permute.xlu0 (!%p193_p2), %v938_v48  ;;  %vm277_vm4 = vcmask (!%p193_p2), 259075   ;;  %vm329_vm5 = vcmask (!%p193_p2), 257025   ;;  %vm269_vm6 = vcmask (!%p193_p2), 1039360   ;;  %vm343_vm7 = vcmask (!%p193_p2), 891904  }
   0x8   : > { %s932_s28 = smov (!%p193_p2), 108   ;;  %s933_s29 = smov (!%p193_p2), 92   ;;  %vm351_vm8 = vcmask (!%p193_p2), 260100   ;;  %vm321_vm9 = vcmask (!%p193_p2), 900096   ;;  %vm293_vm10 = vcmask (!%p193_p2), 1031168   ;;  %vm367_vm11 = vcmask (!%p193_p2), 883712  }
   0x9   : > { %s934_s30 = smov (!%p193_p2), 91   ;;  %s935_s6 = smov (!%p193_p2), 90   ;;  %vm375_vm12 = vcmask (!%p193_p2), 261127   ;;  %vm379_vm13 = vcmask (!%p193_p2), 254976   ;;  %vm395_vm14 = vcmask (!%p193_p2), 752640   ;;  %vm403_vm15 = vcmask (!%p193_p2), 258050  }
   0xa   : > { %vm419_vm1 = vcmask (!%p193_p2), 744448  }
   0xd   : > { %s1064_s19 = smov (!%p228_p3, %s821_s19), 1 }
   0xe   : > { %s885_s20 = smul.u32 12, %s1064_s19  ;;  %s828_s15 = sshll.u32 %s1064_s19, 3 }
   0xf   : > { %s886_s11 = smul.u32 24, %s1064_s19 }
  0x10   : > { %s984_s23 = scalar_lea.vmem %s1057_s0, %s885_s20  ;;  %s241_s20 = scalar_lea.vmem %s1061_s4, %s828_s15 }
  0x11   : > { %v331_v0 = vld [vmem:[%s984_s23] sm:$0x77]  ;;  %v280_v1 = vld [vmem:[%s984_s23 + $0x8] sm:$0x7]  ;;  %s237_s14 = scalar_lea.vmem %s1060_s3, %s886_s11 }
  0x12   : > { %v256_v2 = vld [vmem:[%s984_s23 + $0x8] sm:$0x7]  ;;  %339 = vrot.lane.b32.xlu0 %v331_v0, %s927_s24  ;;  %v286_v3 = vrot.slane %v280_v1, 2  ;;  %v255_v6 = vld [vmem:[%s984_s23] sm:$0x77]  ;;  %v335_v30 = vcombine.low %v331_v0, %v331_v0 }
  0x13   : > { %v262_v4 = vrot.slane %v256_v2, 5  ;;  %v308_v5 = vld [vmem:[%s984_s23 + $0x8] sm:$0x7]  ;;  %v259_v7 = vcombine.high %v255_v6, %v255_v6  ;;  %v307_v9 = vld [vmem:[%s984_s23] sm:$0x77]  ;;  %v260_v26 = vrot.slane %v255_v6, 5 }
  0x14   : > { %291 = vrot.lane.b32.xlu1 %v286_v3, %s928_s25  ;;  %v314_v8 = vrot.slane %v308_v5, 7  ;;  %v279_v10 = vld [vmem:[%s984_s23] sm:$0x77]  ;;  %v311_v12 = vcombine.high %v307_v9, %v307_v9  ;;  %v911_v14 = vld [vmem:[%s984_s23 + $0x8] ss:$0 sps:$4 sm:$0x77]  }
  0x15   : > { %v261_v11 = vrot.slane %v259_v7, 5  ;;  %v353_v13 = vld [vmem:[%s984_s23] sm:$0x77]  ;;  %v283_v15 = vcombine.high %v279_v10, %v279_v10  ;;  %v247_v18 = vld [vmem:[%s984_s23 + $0x8] sm:$0x7]  ;;  %v284_v27 = vrot.slane %v279_v10, 2 }
  0x16   : > { %267 = vrot.lane.b32.xlu0 %v262_v4, %s929_s26  ;;  %v313_v16 = vrot.slane %v311_v12, 7  ;;  %v357_v17 = vcombine.high %v353_v13, %v353_v13  ;;  %254 = vst.msk [vmem:[#allocation2 + $0x10] sm:$0x7] %vm253_vm0, %v247_v18  ;;  %v246_v19 = vld [vmem:[%s984_s23] sm:$0x77]  ;;  %v312_v29 = vrot.slane %v307_v9, 7 }
  0x17   : > { %v285_v20 = vrot.slane %v283_v15, 2  ;;  %v249_v21 = vcombine.high %v246_v19, %v246_v19  ;;  %251 = vst [vmem:[#allocation2] sm:$0x7] %v246_v19  ;;  %v354_v22 = vld [vmem:[%s984_s23 + $0x8] sm:$0x7]  ;;  %v358_v33 = vrot.slane %v353_v13, 1 }
  0x18   : > { %319 = vrot.lane.b32.xlu1 %v314_v8, %s930_s27  ;;  %v359_v23 = vrot.slane %v357_v17, 1  ;;  %v360_v24 = vrot.slane %v354_v22, 1  ;;  %v381_v28 = vld [vmem:[%s984_s23] sm:$0x77]  ;;  %v382_v34 = vld [vmem:[%s984_s23 + $0x8] sm:$0x7] }
  0x19   : > { %252 = vst [vmem:[#allocation2 + $0x8] sm:$0x7] %v249_v21  ;;  %v385_v31 = vcombine.high %v381_v28, %v381_v28  ;;  %v405_v32 = vld [vmem:[%s984_s23] sm:$0x77]  ;;  %v388_v37 = vrot.slane %v382_v34, 6  ;;  %v386_v44 = vrot.slane %v381_v28, 6 }
  0x1a   : > { %265 = vrot.lane.b32.xlu0 %v261_v11, %s929_s26  ;;  %v409_v36 = vcombine.high %v405_v32, %v405_v32  ;;  %v406_v38 = vld [vmem:[%s984_s23 + $0x8] sm:$0x7]  ;;  %v429_v40 = vld [vmem:[%s984_s23] sm:$0x77]  ;;  %v410_v45 = vrot.slane %v405_v32, 3 }
  0x1b   : > { %v387_v35 = vrot.slane %v385_v31, 6  ;;  %v412_v41 = vrot.slane %v406_v38, 3  ;;  %v433_v42 = vcombine.high %v429_v40, %v429_v40  ;;  %v430_v43 = vld [vmem:[%s984_s23 + $0x8] sm:$0x7]  ;;  %s245_s23 = scalar_lea.vmem %s1062_s5, %s828_s15 }
  0x1c   : > { %341 = vrot.lane.b32.xlu1 %v911_v14, %s927_s24  ;;  %v411_v39 = vrot.slane %v409_v36, 3 }
  0x1e   : > { %317 = vrot.lane.b32.xlu0 %v313_v16, %s930_s27 }
  0x20   : > { %289 = vrot.lane.b32.xlu1 %v285_v20, %s928_s25 }
  0x22   : > { %363 = vrot.lane.b32.xlu0 %v359_v23, %s932_s28 }
  0x24   : > { %365 = vrot.lane.b32.xlu1 %v360_v24, %s932_s28 }
  0x26   : > { %263 = vrot.lane.b32.xlu0 %v260_v26, %s929_s26 }
  0x28   : > { %287 = vrot.lane.b32.xlu1 %v284_v27, %s928_s25 }
  0x2a   : > { %315 = vrot.lane.b32.xlu0 %v312_v29, %s930_s27 }
  0x2c   : > { %337 = vrot.lane.b32.xlu1 %v335_v30, %s927_s24 }
  0x2e   : > { %361 = vrot.lane.b32.xlu0 %v358_v33, %s932_s28 }
  0x30   : > { %391 = vrot.lane.b32.xlu1 %v387_v35, %s933_s29 }
  0x32   : > { %393 = vrot.lane.b32.xlu0 %v388_v37, %s933_s29 }
  0x34   : > { %415 = vrot.lane.b32.xlu1 %v411_v39, %s934_s30 }
  0x36   : > { %417 = vrot.lane.b32.xlu0 %v412_v41, %s934_s30 }
  0x38   : > { %436 = vrot.lane.b32.xlu1 %v433_v42, %s935_s6 }
  0x3a   : > { %438 = vrot.lane.b32.xlu0 %v430_v43, %s935_s6 }
  0x3c   : > { %389 = vrot.lane.b32.xlu1 %v386_v44, %s933_s29  ;;  %v627_v44 = vlaneseq }
  0x3e   : > { %413 = vrot.lane.b32.xlu0 %v410_v45, %s934_s30  ;;  %v628_v45 = vand.u32 127, %v627_v44 }
  0x40   : > { %434 = vrot.lane.b32.xlu1 %v429_v40, %s935_s6  ;;  %v449_v40 = vld [vmem:[%s1058_s1] sm:$0xff]  ;;  %v630_v46 = vadd.s32 256, %v628_v45 }
  0x42   : > { %465 = vperm.xlu0 %908, %v462_v47   ;;  %v837_v47 = vadd.s32 4294967008, %v630_v46 }
  0x84   : > { %v340_v49 = vpop.permute.xlu0 %339 }
  0x86   : > { %v292_v50 = vpop.permute.xlu1 %291 }
  0x87   : > { %302 = vst.msk [vmem:[#allocation2 + $0x10] sm:$0xc0] %vm301_vm2, %v292_v50  ;;  %vm427_vm2 = vcmask 261125  }
  0x88   : > { %306 = vst.msk [vmem:[#allocation2 + $0x28] sm:$0x1] %vm305_vm3, %v292_v50  ;;  %v268_v51 = vpop.permute.xlu0 %267  ;;  %vm440_vm3 = vcmask 736256  }
  0x89   : > { %278 = vst.msk [vmem:[#allocation2 + $0x10] sm:$0x38] %vm277_vm4, %v268_v51  ;;  %vm472_vm4 = vcmask 1042432  }
  0x8a   : > { %v320_v52 = vpop.permute.xlu1 %319 }
  0x8b   : > { %330 = vst.msk [vmem:[#allocation2 + $0x28] sm:$0xe] %vm329_vm5, %v320_v52  ;;  %vm939_vm5 = vmmov 1  }
  0x8c   : > { %v266_v53 = vpop.permute.xlu0 %265 }
  0x8d   : > { %v271_v54 = vsel %vm269_vm6, %v266_v53, %v268_v51 }
  0x8e   : > { %276 = vst [vmem:[#allocation2 + $0x8] sm:$0x38] %v271_v54  ;;  %v342_v55 = vpop.permute.xlu1 %341 }
  0x8f   : > { %v345_v56 = vsel %vm343_vm7, %v340_v49, %v342_v55  ;;  %352 = vst.msk [vmem:[#allocation2 + $0x28] sm:$0x70] %vm351_vm8, %v342_v55  ;;  %v841_v55 = vadd.s32 4294967224, %v628_v45 }
  0x90   : > { %350 = vst [vmem:[#allocation2 + $0x20] sm:$0x70] %v345_v56  ;;  %v318_v57 = vpop.permute.xlu0 %317  ;;  %v452_v7 = vld [vmem:[#allocation2 + $0x10] sm:$0xff] }
  0x91   : > { %v323_v58 = vsel %vm321_vm9, %v318_v57, %v320_v52 }
  0x92   : > { %328 = vst [vmem:[#allocation2 + $0x20] sm:$0xe] %v323_v58  ;;  %v290_v59 = vpop.permute.xlu1 %289 }
  0x93   : > { %v295_v60 = vsel %vm293_vm10, %v290_v59, %v292_v50 }
  0x94   : > { %300 = vst [vmem:[#allocation2 + $0x20] ss:$-20 sps:$4 sm:$0xc1] %v295_v60   ;;  %v364_v61 = vpop.permute.xlu0 %363 }
  0x96   : > { %v366_v62 = vpop.permute.xlu1 %365 }
  0x97   : > { %v369_v63 = vsel %vm367_vm11, %v364_v61, %v366_v62  ;;  %376 = vst.msk [vmem:[#allocation2 + $0x28] sm:$0x80] %vm375_vm12, %v366_v62 }
  0x98   : > { %380 = vst.msk [vmem:[#allocation2 + $0x40] sm:$0x3] %vm379_vm13, %v366_v62  ;;  %374 = vst [vmem:[#allocation2 + $0x38] ss:$-20 sps:$4 sm:$0x83] %v369_v63   ;;  %v264_v0 = vpop.permute.xlu0 %263 }
  0x99   : > { %v270_v1 = vsel %vm269_vm6, %v264_v0, %v266_v53  ;;  %vm873_vm6 = vmpackc.low %vm472_vm4, %vm939_vm5 }
  0x9a   : > { %275 = vst [vmem:[#allocation2] sm:$0x38] %v270_v1  ;;  %v288_v2 = vpop.permute.xlu1 %287 }
  0x9b   : > { %v294_v3 = vsel %vm293_vm10, %v288_v2, %v290_v59  ;;  %v451_v11 = vld [vmem:[#allocation2 + $0x8] sm:$0xff] }
  0x9c   : > { %299 = vst [vmem:[#allocation2 + $0x18] ss:$-20 sps:$4 sm:$0xc1] %v294_v3   ;;  %v316_v4 = vpop.permute.xlu0 %315 }
  0x9d   : > { %v322_v5 = vsel %vm321_vm9, %v316_v4, %v318_v57 }
  0x9e   : > { %327 = vst [vmem:[#allocation2 + $0x18] sm:$0xe] %v322_v5  ;;  %v338_v6 = vpop.permute.xlu1 %337  ;;  %v455_v8 = vld [vmem:[#allocation2 + $0x28] sm:$0xff] }
  0x9f   : > { %v344_v9 = vsel %vm343_vm7, %v338_v6, %v340_v49  ;;  %v879_v10 = vpack.c.bf16 %v455_v8, %v452_v7  ;;  %v454_v12 = vld [vmem:[#allocation2 + $0x20] sm:$0xff]  ;;  %vm633_vm7 = vcmp.ge.s32.totalorder %v630_v46, 288  ;;  %v629_v49 = vadd.s32 128, %v628_v45 }
  0xa0   : > { %349 = vst [vmem:[#allocation2 + $0x18] sm:$0x70] %v344_v9  ;;  %v362_v13 = vpop.permute.xlu0 %361  ;;  %v868_v14 = vpack.c.bf16 %v454_v12, %v451_v11  ;;  %v639_v48 = vsel %vm633_vm7, %v837_v47, %v630_v46  ;;  %vm693_vm7 = vcmask 7168  }
  0xa1   : > { %v368_v15 = vsel %vm367_vm11, %v362_v13, %v364_v61  ;;  %880 = vmatpush3.bf16.msra.mxu1 %v879_v10  ;;  %v840_v50 = vadd.s32 4294967152, %v639_v48  ;;  %vm642_vm8 = vcmp.ge.s32.totalorder %v639_v48, 144  ;;  %v839_v51 = vadd.s32 4294967152, %v629_v49 }
  0xa2   : > { %373 = vst [vmem:[#allocation2 + $0x30] ss:$-20 sps:$4 sm:$0x83] %v368_v15   ;;  %v392_v16 = vpop.permute.xlu1 %391  ;;  %869 = vmatprep.subr.bf16.mxu0 %v868_v14  ;;  %881 = vmatprep.subr.bf16.mxu1 %v931_v25  ;;  %vm641_vm9 = vcmp.ge.s32.totalorder %v629_v49, 144  ;;  %vm649_vm11 = vcmp.ge.s32.totalorder %v628_v45, 72 }
  0xa3   : > { %v450_v22 = vld [vmem:[#allocation2] sm:$0xff]  ;;  %v648_v52 = vsel %vm642_vm8, %v840_v50, %v639_v48  ;;  %v647_v53 = vsel %vm641_vm9, %v839_v51, %v629_v49  ;;  %v655_v58 = vsel %vm649_vm11, %v841_v55, %v628_v45 }
  0xa4   : > { %v394_v17 = vpop.permute.xlu0 %393  ;;  %v843_v54 = vadd.s32 4294967224, %v648_v52  ;;  %vm651_vm10 = vcmp.ge.s32.totalorder %v648_v52, 72  ;;  %v842_v56 = vadd.s32 4294967224, %v647_v53  ;;  %vm650_vm12 = vcmp.ge.s32.totalorder %v647_v53, 72 }
  0xa5   : > { %v397_v18 = vsel %vm395_vm14, %v392_v16, %v394_v17  ;;  %404 = vst.msk [vmem:[#allocation2 + $0x40] sm:$0x1c] %vm403_vm15, %v394_v17  ;;  %v844_v61 = vadd.s32 4294967260, %v655_v58 }
  0xa6   : > { %402 = vst [vmem:[#allocation2 + $0x38] sm:$0x1c] %v397_v18  ;;  %v416_v19 = vpop.permute.xlu1 %415  ;;  %v657_v57 = vsel %vm651_vm10, %v843_v54, %v648_v52  ;;  %v656_v59 = vsel %vm650_vm12, %v842_v56, %v647_v53 }
  0xa7   : > { %v846_v60 = vadd.s32 4294967260, %v657_v57  ;;  %vm660_vm13 = vcmp.ge.s32.totalorder %v657_v57, 36  ;;  %v845_v62 = vadd.s32 4294967260, %v656_v59  ;;  %vm659_vm15 = vcmp.ge.s32.totalorder %v656_v59, 36 }
  0xa8   : > { %v418_v20 = vpop.permute.xlu0 %417 }
  0xa9   : > { %v421_v21 = vsel %vm419_vm1, %v416_v19, %v418_v20  ;;  %428 = vst.msk [vmem:[#allocation2 + $0x40] sm:$0xe0] %vm427_vm2, %v418_v20  ;;  %v453_v23 = vld [vmem:[#allocation2 + $0x18] sm:$0xff]  ;;  %v666_v63 = vsel %vm660_vm13, %v846_v60, %v657_v57  ;;  %v665_v2 = vsel %vm659_vm15, %v845_v62, %v656_v59  ;;  %vm625_vm2 = vcmask 261120  }
  0xaa   : > { %426 = vst [vmem:[#allocation2 + $0x38] sm:$0xe0] %v421_v21  ;;  %v437_v24 = vpop.permute.xlu1 %436  ;;  %v870_v26 = vpack.c.bf16 %v453_v23, %v450_v22  ;;  %v849_v3 = vadd.s32 4294967278, %v666_v63  ;;  %v848_v8 = vadd.s32 4294967278, %v665_v2  ;;  %vm668_vm4 = vcmp.ge.s32.totalorder %v665_v2, 18 }
  0xac   : > { %v439_v27 = vpop.permute.xlu0 %438  ;;  %871 = vmatpush1.bf16.msra.mxu0 %v870_v26  ;;  %v674_v11 = vsel %vm668_vm4, %v848_v8, %v665_v2 }
  0xad   : > { %v442_v25 = vsel %vm440_vm3, %v437_v24, %v439_v27  ;;  %448 = vst.msk [vmem:[#allocation2 + $0x58] sm:$0x7] %vm253_vm0, %v439_v27  ;;  %vm468_vm0 = vcmask 220160  }
  0xae   : > { %447 = vst [vmem:[#allocation2 + $0x50] sm:$0x7] %v442_v25  ;;  %v390_v28 = vpop.permute.xlu1 %389 }
  0xaf   : > { %v396_v29 = vsel %vm395_vm14, %v390_v28, %v392_v16  ;;  %vm658_vm14 = vcmp.ge.s32.totalorder %v655_v58, 36 }
  0xb0   : > { %401 = vst [vmem:[#allocation2 + $0x30] sm:$0x1c] %v396_v29  ;;  %v414_v30 = vpop.permute.xlu0 %413  ;;  %v458_v34 = vld [vmem:[#allocation2 + $0x40] sm:$0xff]  ;;  %v664_v0 = vsel %vm658_vm14, %v844_v61, %v655_v58 }
  0xb1   : > { %v420_v31 = vsel %vm419_vm1, %v414_v30, %v416_v19  ;;  %v457_v37 = vld [vmem:[#allocation2 + $0x38] sm:$0xff]  ;;  %vm669_vm1 = vcmp.ge.s32.totalorder %v666_v63, 18  ;;  %v847_v5 = vadd.s32 4294967278, %v664_v0 }
  0xb2   : > { %425 = vst [vmem:[#allocation2 + $0x30] sm:$0xe0] %v420_v31  ;;  %v435_v32 = vpop.permute.xlu1 %434  ;;  %v675_v9 = vsel %vm669_vm1, %v849_v3, %v666_v63 }
  0xb3   : > { %v441_v33 = vsel %vm440_vm3, %v435_v32, %v437_v24  ;;  %vm667_vm3 = vcmp.ge.s32.totalorder %v664_v0, 18  ;;  %vm678_vm5 = vcmp.lt.s32.totalorder %v675_v9, 16 }
  0xb4   : > { %446 = vst [vmem:[#allocation2 + $0x48] sm:$0x7] %v441_v33  ;;  %v461_v35 = vld [vmem:[#allocation2 + $0x58] sm:$0x7]  ;;  %v673_v10 = vsel %vm667_vm3, %v847_v5, %v664_v0 }
  0xb5   : > { %v882_v36 = vpack.c.bf16 %v461_v35, %v458_v34  ;;  %v460_v38 = vld [vmem:[#allocation2 + $0x50] sm:$0x7] }
  0xb6   : > { %v872_v39 = vpack.c.bf16 %v460_v38, %v457_v37 }
  0xb7   : > { %884 = vmatpush3.bf16.msk.msra.mxu1 %vm873_vm6, %v882_v36 }
  0xb8   : > { %874 = vmatprep.subr.msk.bf16.mxu0 %vm873_vm6, %v872_v39 }
  0xb9   : > { %v456_v41 = vld [vmem:[#allocation2 + $0x30] sm:$0xff] }
  0xba   : > { %866 = vmatmul.mubr.msk.f32.vlgmr.msra.gmra.mrb[0].mxu1 %vm468_vm0, %v449_v40 }
  0xbb   : > { %v459_v42 = vld [vmem:[#allocation2 + $0x48] sm:$0x7] }
  0xbc   : > { %v875_v43 = vpack.c.bf16 %v459_v42, %v456_v41 }
  0xbe   : > { %877 = vmatpush1.bf16.msk.msra.mxu0 %vm873_vm6, %v875_v43  ;;  %vm676_vm6 = vcmp.lt.s32.totalorder %v673_v10, 16 }
  0xc1   : > { %832 = vmatmul.mubr.msk.f32.vlgmr.msra.gmra.mrb[0].mxu0 %vm468_vm0, %v449_v40  ;;  %v466_v1 = vpop.permute.xlu0 %465  ;;  %vm677_vm0 = vcmp.lt.s32.totalorder %v674_v11, 16 }
 0x18d   : > { %v619_v4 = vpop.f32.mrb[0].mxu1 }
 0x18e   : > { %v620_v6 = vadd.f32 %v619_v4, %v466_v1  ;;  %v867_v7 = vpop.f32.mrb[1].mxu1 }
 0x190   : > { %626 = vst.msk [vmem:[%s237_s14 + $0x10] sm:$0xff] %vm625_vm2, %v620_v6  ;;  %v687_v15 = vsel %vm678_vm5, %v620_v6, 0.0 }
 0x191   : > { %v689_v19 = vsel %vm625_vm2, %v687_v15, 0.0  ;;  %v697_v21 = vmul.f32 %v687_v15, %v620_v6 }
 0x193   : > { %v699_v27 = vsel %vm625_vm2, %v697_v21, 0.0 }
 0x194   : > { %v548_v12 = vpop.f32.mrb[0].mxu0 }
 0x195   : > { %v549_v13 = vadd.f32 %v548_v12, %v466_v1  ;;  %v550_v14 = vpop.f32.mrb[1].mxu0 }
 0x196   : > { %v551_v16 = vadd.f32 %v550_v14, %v466_v1 }
 0x197   : > { %623 = vst [vmem:[%s237_s14] sm:$0xff] %v549_v13  ;;  %v685_v17 = vsel %vm676_vm6, %v549_v13, 0.0 }
 0x198   : > { %624 = vst [vmem:[%s237_s14 + $0x8] sm:$0xff] %v551_v16  ;;  %v686_v18 = vsel %vm677_vm0, %v551_v16, 0.0  ;;  %v695_v20 = vmul.f32 %v685_v17, %v549_v13 }
 0x199   : > { %v688_v22 = vadd.f32 %v686_v18, %v685_v17  ;;  %v696_v23 = vmul.f32 %v686_v18, %v551_v16 }
 0x19b   : > { %v690_v24 = vadd.f32 %v689_v19, %v688_v22  ;;  %v698_v26 = vadd.f32 %v696_v23, %v695_v20 }
 0x19d   : > { %691 = vadd.xlane.f32.xlu1 %v690_v24  ;;  %v700_v25 = vadd.f32 %v699_v27, %v698_v26 }
 0x19f   : > { %701 = vadd.xlane.f32.xlu0 %v700_v25 }
 0x22a   : > { %v692_v28 = vpop.xlane.xlu1 %691 }
 0x22b   : > { %694 = vst.msk [vmem:[%s241_s20] sm:$0xff] %vm693_vm7, %v692_v28 }
 0x22c   : > { %v702_v29 = vpop.xlane.xlu0 %701 }
 0x22d   : > { %703 = vst.msk [vmem:[%s245_s23] sm:$0xff] %vm693_vm7, %v702_v29 }
 0x22e PF: > { %s16_s18 = sadd.s32 1, %s925_s18  }
 0x22f   : > { %p13_p4 = scmp.ge.s32.totalorder %s16_s18, 4  }
 0x231   :  { %15 = sbr.rel (!%p13_p4) target bundleno = 1 (0x1), region = 86 }

// kernel: vgg_forward.7
= control target key start
LH: loop header
LB: loop body
LE: loop exit
PB: predicated region body
PF: predicated region fallthrough
CT: control target
= control target key end

     0   :  { %9 = vsyncpa [#allocation3], 0  ;;  %s1486_s15 = smov 0   ;;  %s1590_s0 = inlined_call_operand.vmem [shape: f32[2,8,288], index: 0, kind: input, shape index: {}]   ;;  %s1591_s1 = inlined_call_operand.vmem [shape: f32[8,1], index: 1, kind: input, shape index: {}]   ;;  %s1592_s2 = inlined_call_operand.vmem [shape: f32[8,1], index: 2, kind: input, shape index: {}]   ;;  %s1593_s3 = inlined_call_operand.hbm [shape: f32[4,288,110], index: 3, kind: input, shape index: {}]   ;;  %s1594_s4 = inlined_call_operand.vmem [shape: f32[2,8,110], index: 4, kind: output, shape index: {}]  }
   0x1 LB: > { %s1492_s16 = sadd.s32 4294967295, %s1452_s15   ;;  %p1018_p0 = scmp.ge.s32.totalorder %s1452_s15, 1  ;;  %s1452_s15 = sphi %s1486_s15, %s15_s15  }
   0x2   : > { %p135_p1 = scmp.lt.s32.totalorder %s1452_s15, 3  ;;  %s1454_s17 = smov [#allocation2]  }
   0x3   : > { %s153_s18 = sshll.u32 %s1454_s17, 4  ;;  %p1595_p3 = scmp.eq.s32.totalorder %s1492_s16, 0  ;;  %s154_s18 = int_to_ptr.vmem [resolvable:$true] %s153_s18 }
   0x4   : > { %p1496_p2 = pnand %p1018_p0, %p135_p1  ;;  %s1414_s23 = scalar_lea.hbm %s1593_s3, 18432 }
   0x5   : > { %p1415_p6 = scmp.ne.s32.totalorder %s1593_s3, %s1414_s23  ;;  %p1421_p10 = scmp.lt.u32.totalorder %s1414_s23, %s1593_s3 }
   0x6   : > { %s1597_s19 = scalar_select %p1496_p2, 1, 0 }
   0x7   : > { %p1392_p4 = pneg %p1496_p2 }
   0x9   : > { %p1505_p5 = pnand %p1595_p3, %p1392_p4 }
   0xb   : > { %p1416_p7 = pneg %p1505_p5 }
   0xd   : > { %p1417_p8 = pnand %p1416_p7, %p1415_p6 }
   0xf   : > { %p1418_p9 = pneg %p1417_p8 }
  0x11   : > { %p1423_p11 = pnand %p1421_p10, %p1418_p9 }
  0x13   : > { %1426 = shalt.err (!%p1423_p11)
}
  0x14   : > { %s1427_s28 = scalar_lea.vmem %s154_s18, 18432  ;;  %p1435_p1 = scmp.lt.s32.totalorder %s154_s18, %s154_s18 }
  0x15   : > { %p1428_p12 = scmp.ne.s32.totalorder %s154_s18, %s1427_s28  ;;  %p1436_p4 = scmp.lt.s32.totalorder %s1427_s28, %s1427_s28 }
  0x17   : > { %p1430_p13 = pnand %p1428_p12, %p1416_p7  ;;  %p1437_p3 = por %p1436_p4, %p1435_p1 }
  0x19   : > { %p1431_p0 = pneg %p1430_p13 }
  0x1b   : > { %p1438_p2 = pnand %p1437_p3, %p1431_p0 }
  0x1d   : > { %1441 = shalt.err (!%p1438_p2)
}
  0x1e   : > { %s1455_s29 = smov 128   ;;  %s1456_s30 = smov 8  }
  0x1f   : > { %1395 = dma.hbm_to_vmem [thread:$0]  (!%p1505_p5), %s1593_s3, 18432, %s154_s18, [#allocation3], %s1455_s29, %s1455_s29, %s1456_s30  }
  0x20   : > { %p1599_p6 = scmp.ne.s32.totalorder %s1597_s19, 0 }
  0x21   : > { %p1600_p8 = scmp.eq.s32.totalorder (!%p1599_p6), %s1492_s16, 0 }
  0x22   : > { %177 = sbr.rel (%p1599_p6) target bundleno = 472 (0x1d8), region = 36 }
  0x29   : > { %1447 = dma.done.wait (%p1600_p8), [#allocation3], 18432   ;;  %p1601_p7 = pmov %p1600_p8 }
  0x2a   : > { %v1457_v0 = vmov 0   ;;  %v1458_v1 = vmov 0.0|0.0   ;;  %v214_v2 = vld [vmem:[%s1591_s1] sm:$0xff]  ;;  %v252_v5 = vld [vmem:[#allocation2 + $0x88] sm:$0xff]  ;;  %v253_v10 = vld [vmem:[#allocation2 + $0x90] sm:$0xff]  ;;  %vm1459_vm0 = vmmov 0  }
  0x2b   : > { %1449 = vsyncadd (%p1601_p7), [#allocation3], 4294948864  ;;  %1413 = vset.pattern.permute.xlu0 %v1457_v0  ;;  %1267 = vmatprep.subr.bf16.mxu1 %v1458_v1  ;;  %v223_v3 = vld [vmem:[%s1592_s2] sm:$0xff]  ;;  %v236_v7 = vld [vmem:[#allocation2 + $0x8] sm:$0xff]  ;;  %v1460_v23 = vmov 0.0   ;;  %p202_p2 = scmp.lt.s32.totalorder %s1492_s16, 1 }
  0x2c   : > { %v251_v4 = vld [vmem:[#allocation2 + $0x80] sm:$0xff]  ;;  %217 = vperm.xlu0 %1413, %v214_v2   ;;  %v254_v11 = vld [vmem:[#allocation2 + $0x98] sm:$0xff]  ;;  %v237_v12 = vld [vmem:[#allocation2 + $0x10] sm:$0xff]  ;;  %1199 = vmatprep.mubr.msk.f32.mxu1 %vm1459_vm0, %v1460_v23  ;;  %vm271_vm1 = vcmask 261120   ;;  %vm949_vm2 = vcmask 900096  }
  0x2d   : > { %v235_v6 = vld [vmem:[#allocation2] sm:$0xff]  ;;  %v1235_v8 = vpack.c.bf16 %v252_v5, %v251_v4  ;;  %v1239_v13 = vpack.c.bf16 %v254_v11, %v253_v10  ;;  %v238_v14 = vld [vmem:[#allocation2 + $0x18] sm:$0xff]  ;;  %v256_v16 = vld [vmem:[#allocation2 + $0xa8] sm:$0xff]  ;;  %s1603_s16 = smov (!%p202_p2, %s1492_s16), 1 }
  0x2e   : > { %v1237_v9 = vpack.c.bf16 %v236_v7, %v235_v6  ;;  %v255_v15 = vld [vmem:[#allocation2 + $0xa0] sm:$0xff]  ;;  %v1241_v17 = vpack.c.bf16 %v238_v14, %v237_v12  ;;  %v240_v20 = vld [vmem:[#allocation2 + $0x28] sm:$0xff]  ;;  %v257_v21 = vld [vmem:[#allocation2 + $0xb0] sm:$0xff]  ;;  %s1387_s11 = smul.u32 24, %s1603_s16  ;;  %s1024_s17 = sshll.u32 %s1603_s16, 3 }
  0x2f   : > { %1236 = vmatprep.subr.bf16.mxu0 %v1235_v8  ;;  %v1243_v18 = vpack.c.bf16 %v256_v16, %v255_v15  ;;  %v239_v19 = vld [vmem:[#allocation2 + $0x20] sm:$0xff]  ;;  %v258_v22 = vld [vmem:[#allocation2 + $0xb8] sm:$0xff]  ;;  %v241_v25 = vld [vmem:[#allocation2 + $0x30] sm:$0xff]  ;;  %s210_s20 = scalar_lea.vmem %s1594_s4, %s1024_s17 }
  0x30   : > { %226 = vperm.xlu0 %1413, %v223_v3   ;;  %1238 = vmatpush3.bf16.msra.mxu0 %v1237_v9  ;;  %v1245_v24 = vpack.c.bf16 %v240_v20, %v239_v19  ;;  %v1247_v26 = vpack.c.bf16 %v258_v22, %v257_v21  ;;  %v242_v27 = vld [vmem:[#allocation2 + $0x38] sm:$0xff]  ;;  %v267_v28 = vld [vmem:[#allocation2 + $0x100] sm:$0xff]  ;;  %v268_v29 = vld [vmem:[#allocation2 + $0x108] sm:$0xff]  ;;  %s206_s14 = scalar_lea.vmem %s1590_s0, %s1387_s11 }
  0x31   : > { %1240 = vmatprep.subr.bf16.mxu0 %v1239_v13  ;;  %v259_v30 = vld [vmem:[#allocation2 + $0xc0] sm:$0xff]  ;;  %v260_v31 = vld [vmem:[#allocation2 + $0xc8] sm:$0xff]  ;;  %v1268_v32 = vpack.c.bf16 %v268_v29, %v267_v28  ;;  %v269_v33 = vld [vmem:[#allocation2 + $0x110] sm:$0xff]  ;;  %v1249_v35 = vpack.c.bf16 %v242_v27, %v241_v25 }
  0x32   : > { %v270_v34 = vld [vmem:[#allocation2 + $0x118] sm:$0xff]  ;;  %v432_v37 = vld [vmem:[#allocation2 + $0x1a0] sm:$0xff]  ;;  %v1251_v38 = vpack.c.bf16 %v260_v31, %v259_v30  ;;  %v244_v40 = vld [vmem:[#allocation2 + $0x48] sm:$0xff] }
  0x33   : > { %1269 = vmatpush3.bf16.msra.mxu1 %v1268_v32  ;;  %v1271_v36 = vpack.c.bf16 %v270_v34, %v269_v33  ;;  %v243_v39 = vld [vmem:[#allocation2 + $0x40] sm:$0xff]  ;;  %v433_v41 = vld [vmem:[#allocation2 + $0x1a8] sm:$0xff]  ;;  %v261_v42 = vld [vmem:[#allocation2 + $0xd0] sm:$0xff] }
  0x34   : > { %1242 = vmatpush3.bf16.msra.mxu0 %v1241_v17  ;;  %1270 = vmatprep.subr.bf16.mxu1 %v1458_v1  ;;  %v262_v43 = vld [vmem:[#allocation2 + $0xd8] sm:$0xff]  ;;  %v1273_v44 = vpack.c.bf16 %v433_v41, %v432_v37  ;;  %v1253_v45 = vpack.c.bf16 %v244_v40, %v243_v39  ;;  %v245_v47 = vld [vmem:[#allocation2 + $0x50] sm:$0xff]  ;;  %v263_v49 = vld [vmem:[#allocation2 + $0xe0] sm:$0xff] }
  0x35   : > { %1244 = vmatprep.subr.bf16.mxu0 %v1243_v18  ;;  %v1255_v46 = vpack.c.bf16 %v262_v43, %v261_v42  ;;  %v246_v48 = vld [vmem:[#allocation2 + $0x58] sm:$0xff]  ;;  %v264_v50 = vld [vmem:[#allocation2 + $0xe8] sm:$0xff]  ;;  %v247_v53 = vld [vmem:[#allocation2 + $0x60] sm:$0xff] }
  0x36   : > { %v1257_v51 = vpack.c.bf16 %v246_v48, %v245_v47  ;;  %v1259_v52 = vpack.c.bf16 %v264_v50, %v263_v49  ;;  %v248_v54 = vld [vmem:[#allocation2 + $0x68] sm:$0xff]  ;;  %v265_v55 = vld [vmem:[#allocation2 + $0xf0] sm:$0xff]  ;;  %v266_v56 = vld [vmem:[#allocation2 + $0xf8] sm:$0xff] }
  0x37   : > { %1272 = vmatpush3.bf16.msra.mxu1 %v1271_v36  ;;  %v1261_v57 = vpack.c.bf16 %v248_v54, %v247_v53  ;;  %v1263_v58 = vpack.c.bf16 %v266_v56, %v265_v55  ;;  %v249_v59 = vld [vmem:[#allocation2 + $0x70] sm:$0xff]  ;;  %v250_v60 = vld [vmem:[#allocation2 + $0x78] sm:$0xff]  ;;  %v211_v63 = vld [vmem:[%s206_s14] sm:$0xff] }
  0x38   : > { %1246 = vmatpush3.bf16.msra.mxu0 %v1245_v24  ;;  %1274 = vmatprep.subr.bf16.mxu1 %v1273_v44  ;;  %v1265_v61 = vpack.c.bf16 %v250_v60, %v249_v59  ;;  %v212_v0 = vld [vmem:[%s206_s14 + $0x8] sm:$0xff]  ;;  %v213_v2 = vld [vmem:[%s206_s14 + $0x10] sm:$0xff]  ;;  %v416_v6 = vld [vmem:[#allocation2 + $0x120] sm:$0xff] }
  0x39   : > { %1248 = vmatprep.subr.bf16.mxu0 %v1247_v26  ;;  %v417_v7 = vld [vmem:[#allocation2 + $0x128] sm:$0xff]  ;;  %v448_v9 = vld [vmem:[#allocation2 + $0x220] sm:$0xff]  ;;  %v434_v14 = vld [vmem:[#allocation2 + $0x1b0] sm:$0xff] }
  0x3a   : > { %v449_v10 = vld [vmem:[#allocation2 + $0x228] sm:$0xff]  ;;  %v435_v15 = vld [vmem:[#allocation2 + $0x1b8] sm:$0xff]  ;;  %v1275_v16 = vpack.c.bf16 %v417_v7, %v416_v6  ;;  %v418_v21 = vld [vmem:[#allocation2 + $0x130] sm:$0xff] }
  0x3b   : > { %v1306_v20 = vpack.c.bf16 %v449_v10, %v448_v9  ;;  %v419_v22 = vld [vmem:[#allocation2 + $0x138] sm:$0xff]  ;;  %v450_v24 = vld [vmem:[#allocation2 + $0x230] sm:$0xff]  ;;  %v1277_v25 = vpack.c.bf16 %v435_v15, %v434_v14  ;;  %v436_v27 = vld [vmem:[#allocation2 + $0x1c0] sm:$0xff] }
  0x3c   : > { %1250 = vmatpush3.bf16.msra.mxu0 %v1249_v35  ;;  %v451_v26 = vld [vmem:[#allocation2 + $0x238] sm:$0xff]  ;;  %v437_v28 = vld [vmem:[#allocation2 + $0x1c8] sm:$0xff]  ;;  %v610_v29 = vld [vmem:[#allocation2 + $0x2c0] sm:$0xff]  ;;  %v1279_v31 = vpack.c.bf16 %v419_v22, %v418_v21 }
  0x3d   : > { %1252 = vmatprep.subr.bf16.mxu0 %v1251_v38  ;;  %v611_v30 = vld [vmem:[#allocation2 + $0x2c8] sm:$0xff]  ;;  %v1309_v32 = vpack.c.bf16 %v451_v26, %v450_v24  ;;  %v1281_v33 = vpack.c.bf16 %v437_v28, %v436_v27  ;;  %v420_v34 = vld [vmem:[#allocation2 + $0x140] sm:$0xff]  ;;  %v438_v39 = vld [vmem:[#allocation2 + $0x1d0] sm:$0xff] }
  0x3e   : > { %v421_v35 = vld [vmem:[#allocation2 + $0x148] sm:$0xff]  ;;  %v1311_v36 = vpack.c.bf16 %v611_v30, %v610_v29  ;;  %v594_v37 = vld [vmem:[#allocation2 + $0x240] sm:$0xff]  ;;  %v439_v40 = vld [vmem:[#allocation2 + $0x1d8] sm:$0xff] }
  0x3f   : > { %v595_v38 = vld [vmem:[#allocation2 + $0x248] sm:$0xff]  ;;  %v612_v41 = vld [vmem:[#allocation2 + $0x2d0] sm:$0xff]  ;;  %v613_v42 = vld [vmem:[#allocation2 + $0x2d8] sm:$0xff]  ;;  %v1283_v43 = vpack.c.bf16 %v421_v35, %v420_v34  ;;  %v1285_v48 = vpack.c.bf16 %v439_v40, %v438_v39 }
  0x40   : > { %1254 = vmatpush3.bf16.msra.mxu0 %v1253_v45  ;;  %v1313_v44 = vpack.c.bf16 %v595_v38, %v594_v37  ;;  %v422_v45 = vld [vmem:[#allocation2 + $0x150] sm:$0xff]  ;;  %v1315_v49 = vpack.c.bf16 %v613_v42, %v612_v41  ;;  %v597_v50 = vld [vmem:[#allocation2 + $0x258] sm:$0xff]  ;;  %v614_v53 = vld [vmem:[#allocation2 + $0x2e0] sm:$0xff] }
  0x41   : > { %1256 = vmatprep.subr.bf16.mxu0 %v1255_v46  ;;  %v423_v46 = vld [vmem:[#allocation2 + $0x158] sm:$0xff]  ;;  %v596_v47 = vld [vmem:[#allocation2 + $0x250] sm:$0xff]  ;;  %v615_v54 = vld [vmem:[#allocation2 + $0x2e8] sm:$0xff] }
  0x42   : > { %v1287_v55 = vpack.c.bf16 %v423_v46, %v422_v45  ;;  %v1317_v56 = vpack.c.bf16 %v597_v50, %v596_v47  ;;  %v425_v59 = vld [vmem:[#allocation2 + $0x168] sm:$0xff]  ;;  %v598_v60 = vld [vmem:[#allocation2 + $0x260] sm:$0xff]  ;;  %v426_v7 = vld [vmem:[#allocation2 + $0x170] sm:$0xff] }
  0x43   : > { %v600_v9 = vld [vmem:[#allocation2 + $0x270] sm:$0xff]  ;;  %v618_v14 = vld [vmem:[#allocation2 + $0x300] sm:$0xff]  ;;  %v619_v15 = vld [vmem:[#allocation2 + $0x308] sm:$0xff] }
  0x44   : > { %1258 = vmatpush3.bf16.msra.mxu0 %v1257_v51  ;;  %v440_v51 = vld [vmem:[#allocation2 + $0x1e0] sm:$0xff]  ;;  %v429_v24 = vld [vmem:[#allocation2 + $0x188] sm:$0xff]  ;;  %v1327_v26 = vpack.c.bf16 %v619_v15, %v618_v14  ;;  %v446_v28 = vld [vmem:[#allocation2 + $0x210] sm:$0xff] }
  0x45   : > { %1260 = vmatprep.subr.bf16.mxu0 %v1259_v52  ;;  %v441_v52 = vld [vmem:[#allocation2 + $0x1e8] sm:$0xff]  ;;  %v428_v22 = vld [vmem:[#allocation2 + $0x180] sm:$0xff]  ;;  %v447_v29 = vld [vmem:[#allocation2 + $0x218] sm:$0xff] }
  0x46   : > { %v603_v27 = vld [vmem:[#allocation2 + $0x288] sm:$0xff]  ;;  %v620_v30 = vld [vmem:[#allocation2 + $0x310] sm:$0xff]  ;;  %v1301_v34 = vpack.c.bf16 %v447_v29, %v446_v28  ;;  %v605_v39 = vld [vmem:[#allocation2 + $0x298] sm:$0xff] }
  0x47   : > { %v430_v35 = vld [vmem:[#allocation2 + $0x190] sm:$0xff]  ;;  %v622_v40 = vld [vmem:[#allocation2 + $0x320] sm:$0xff]  ;;  %v623_v41 = vld [vmem:[#allocation2 + $0x328] sm:$0xff] }
  0x48   : > { %1262 = vmatpush3.bf16.msra.mxu0 %v1261_v57  ;;  %v1289_v57 = vpack.c.bf16 %v441_v52, %v440_v51  ;;  %v604_v38 = vld [vmem:[#allocation2 + $0x290] sm:$0xff]  ;;  %v627_v45 = vld [vmem:[#allocation2 + $0x348] sm:$0xff]  ;;  %v1335_v46 = vpack.c.bf16 %v623_v41, %v622_v40  ;;  %v606_v47 = vld [vmem:[#allocation2 + $0x2a0] sm:$0xff] }
  0x49   : > { %1264 = vmatprep.subr.bf16.mxu0 %v1263_v58  ;;  %v424_v58 = vld [vmem:[#allocation2 + $0x160] sm:$0xff]  ;;  %v625_v50 = vld [vmem:[#allocation2 + $0x338] sm:$0xff]  ;;  %v793_v14 = vld [vmem:[#allocation2 + $0x408] sm:$0xff] }
  0x4a   : > { %v778_v28 = vld [vmem:[#allocation2 + $0x390] sm:$0xff]  ;;  %v796_v29 = vld [vmem:[#allocation2 + $0x420] sm:$0xff]  ;;  %v801_v40 = vld [vmem:[#allocation2 + $0x448] sm:$0xff] }
  0x4c   : > { %1266 = vmatpush3.bf16.msra.mxu0 %v1265_v61  ;;  %v1319_v61 = vpack.c.bf16 %v615_v54, %v614_v53  ;;  %v628_v53 = vld [vmem:[#allocation2 + $0x350] sm:$0xff]  ;;  %v629_v54 = vld [vmem:[#allocation2 + $0x358] sm:$0xff] }
  0x4d   : > { %1305 = vmatprep.subr.bf16.mxu0 %v1458_v1 }
  0xab   : > { %v218_v62 = vpop.permute.xlu0 %217 }
  0xac   : > { %v220_v3 = vmul.f32 %v218_v62, %v211_v63  ;;  %v221_v4 = vmul.f32 %v218_v62, %v212_v0  ;;  %v222_v5 = vmul.f32 %v218_v62, %v213_v2  ;;  %v599_v62 = vld [vmem:[#allocation2 + $0x268] sm:$0xff]  ;;  %v442_v63 = vld [vmem:[#allocation2 + $0x1f0] sm:$0xff]  ;;  %v443_v0 = vld [vmem:[#allocation2 + $0x1f8] sm:$0xff] }
  0xad   : > { %v616_v2 = vld [vmem:[#allocation2 + $0x2f0] sm:$0xff]  ;;  %v1293_v6 = vpack.c.bf16 %v443_v0, %v442_v63  ;;  %v772_v63 = vld [vmem:[#allocation2 + $0x360] sm:$0xff]  ;;  %v773_v0 = vld [vmem:[#allocation2 + $0x368] sm:$0xff] }
  0xaf   : > { %v227_v8 = vpop.permute.xlu0 %226 }
  0xb0   : > { %v229_v11 = vadd.f32 %v227_v8, %v220_v3  ;;  %v230_v12 = vadd.f32 %v227_v8, %v221_v4  ;;  %v231_v13 = vadd.f32 %v227_v8, %v222_v5  ;;  %v617_v3 = vld [vmem:[#allocation2 + $0x2f8] sm:$0xff]  ;;  %v1291_v4 = vpack.c.bf16 %v425_v59, %v424_v58  ;;  %v788_v58 = vld [vmem:[#allocation2 + $0x3e0] sm:$0xff]  ;;  %v789_v59 = vld [vmem:[#allocation2 + $0x3e8] sm:$0xff] }
  0xb1   : > { %v1321_v5 = vpack.c.bf16 %v599_v62, %v598_v60  ;;  %v427_v8 = vld [vmem:[#allocation2 + $0x178] sm:$0xff]  ;;  %v1323_v10 = vpack.c.bf16 %v617_v3, %v616_v2  ;;  %v1347_v60 = vpack.c.bf16 %v629_v54, %v628_v53  ;;  %v1349_v62 = vpack.c.bf16 %v789_v59, %v788_v58  ;;  %v804_v2 = vld [vmem:[#allocation2 + $0x460] sm:$0xff]  ;;  %v805_v3 = vld [vmem:[#allocation2 + $0x468] sm:$0xff] }
  0xb2   : > { %v1550_v17 = vmax.f32 %v229_v11, 0.0  ;;  %v1552_v18 = vmax.f32 %v230_v12, 0.0  ;;  %v1554_v19 = vmax.f32 %v231_v13, 0.0  ;;  %v601_v11 = vld [vmem:[#allocation2 + $0x278] sm:$0xff]  ;;  %v444_v12 = vld [vmem:[#allocation2 + $0x200] sm:$0xff]  ;;  %v445_v13 = vld [vmem:[#allocation2 + $0x208] sm:$0xff] }
  0xb3   : > { %v1297_v21 = vpack.c.bf16 %v445_v13, %v444_v12  ;;  %v807_v12 = vld [vmem:[#allocation2 + $0x478] sm:$0xff]  ;;  %v792_v13 = vld [vmem:[#allocation2 + $0x400] sm:$0xff] }
  0xb4   : > { %339 = vmatprep.mubr.f32.mxu0 %v1552_v18  ;;  %1200 = vmatmul.mubr.msk.f32.vlgmr.msra.gmra.mrb[0].mxu1 %vm271_vm1, %v1554_v19 }
  0xb5   : > { %1276 = vmatpush3.bf16.msra.mxu1 %v1275_v16  ;;  %340 = vmatmul.mubr.f32.vlgmr.msra.gmra.mrb[0].mxu0 %v1550_v17  ;;  %v1295_v16 = vpack.c.bf16 %v427_v8, %v426_v7  ;;  %v1382_v7 = vpack.c.bf16 %v805_v3, %v804_v2  ;;  %v774_v8 = vld [vmem:[#allocation2 + $0x370] sm:$0xff] }
  0xb6   : > { %516 = vmatprep.mubr.f32.mxu1 %v1552_v18  ;;  %1307 = vmatpush3.bf16.msra.mxu0 %v1306_v20  ;;  %v1325_v20 = vpack.c.bf16 %v601_v11, %v600_v9  ;;  %v775_v9 = vld [vmem:[#allocation2 + $0x378] sm:$0xff] }
  0xb7   : > { %1278 = vmatprep.subr.bf16.mxu1 %v1277_v25  ;;  %1308 = vmatprep.subr.bf16.mxu0 %v1458_v1  ;;  %v602_v25 = vld [vmem:[#allocation2 + $0x280] sm:$0xff]  ;;  %v1355_v15 = vpack.c.bf16 %v775_v9, %v774_v8 }
  0xb8   : > { %1210 = vmatprep.mubr.msk.f32.mxu0 %vm1459_vm0, %v1460_v23 }
  0xb9   : > { %1280 = vmatpush3.bf16.msra.mxu1 %v1279_v31  ;;  %v621_v31 = vld [vmem:[#allocation2 + $0x318] sm:$0xff] }
  0xba   : > { %1310 = vmatpush3.bf16.msra.mxu0 %v1309_v32  ;;  %1282 = vmatprep.subr.bf16.mxu1 %v1281_v33  ;;  %v1299_v32 = vpack.c.bf16 %v429_v24, %v428_v22  ;;  %v1329_v33 = vpack.c.bf16 %v603_v27, %v602_v25  ;;  %v1331_v37 = vpack.c.bf16 %v621_v31, %v620_v30  ;;  %v777_v22 = vld [vmem:[#allocation2 + $0x388] sm:$0xff]  ;;  %v794_v24 = vld [vmem:[#allocation2 + $0x410] sm:$0xff]  ;;  %v795_v25 = vld [vmem:[#allocation2 + $0x418] sm:$0xff] }
  0xbb   : > { %1312 = vmatprep.subr.bf16.mxu0 %v1311_v36  ;;  %v431_v36 = vld [vmem:[#allocation2 + $0x198] sm:$0xff]  ;;  %v1361_v27 = vpack.c.bf16 %v795_v25, %v794_v24  ;;  %v797_v30 = vld [vmem:[#allocation2 + $0x428] sm:$0xff] }
  0xbc   : > { %v1303_v42 = vpack.c.bf16 %v431_v36, %v430_v35 }
  0xbd   : > { %1284 = vmatpush3.bf16.msra.mxu1 %v1283_v43  ;;  %1211 = vmatmul.mubr.msk.f32.vlgmr.msra.gmra.mrb[2].mxu0 %vm271_vm1, %v1554_v19  ;;  %v1333_v43 = vpack.c.bf16 %v605_v39, %v604_v38  ;;  %v783_v38 = vld [vmem:[#allocation2 + $0x3b8] sm:$0xff]  ;;  %v800_v39 = vld [vmem:[#allocation2 + $0x440] sm:$0xff] }
  0xbe   : > { %1314 = vmatpush3.bf16.msra.mxu0 %v1313_v44  ;;  %694 = vmatprep.mubr.f32.mxu0 %v1552_v18  ;;  %v626_v44 = vld [vmem:[#allocation2 + $0x340] sm:$0xff] }
  0xbf   : > { %1286 = vmatprep.subr.bf16.mxu1 %v1285_v48  ;;  %1316 = vmatprep.subr.bf16.mxu0 %v1315_v49  ;;  %v607_v48 = vld [vmem:[#allocation2 + $0x2a8] sm:$0xff]  ;;  %v624_v49 = vld [vmem:[#allocation2 + $0x330] sm:$0xff]  ;;  %v1344_v51 = vpack.c.bf16 %v627_v45, %v626_v44  ;;  %v803_v45 = vld [vmem:[#allocation2 + $0x458] sm:$0xff] }
  0xc0   : > { %v1337_v52 = vpack.c.bf16 %v607_v48, %v606_v47  ;;  %v802_v44 = vld [vmem:[#allocation2 + $0x450] sm:$0xff] }
  0xc1   : > { %1288 = vmatpush3.bf16.msra.mxu1 %v1287_v55  ;;  %v608_v55 = vld [vmem:[#allocation2 + $0x2b0] sm:$0xff]  ;;  %v1377_v47 = vpack.c.bf16 %v803_v45, %v802_v44 }
  0xc2   : > { %1318 = vmatpush3.bf16.msra.mxu0 %v1317_v56  ;;  %1290 = vmatprep.subr.bf16.mxu1 %v1289_v57  ;;  %v1339_v56 = vpack.c.bf16 %v625_v50, %v624_v49  ;;  %v609_v57 = vld [vmem:[#allocation2 + $0x2b8] sm:$0xff]  ;;  %v786_v48 = vld [vmem:[#allocation2 + $0x3d0] sm:$0xff] }
  0xc3   : > { %1320 = vmatprep.subr.bf16.mxu0 %v1319_v61  ;;  %v1341_v61 = vpack.c.bf16 %v609_v57, %v608_v55  ;;  %v787_v49 = vld [vmem:[#allocation2 + $0x3d8] sm:$0xff] }
  0xc4   : > { %v1379_v50 = vpack.c.bf16 %v787_v49, %v786_v48 }
  0xc5   : > { %1292 = vmatpush3.bf16.msra.mxu1 %v1291_v4  ;;  %v790_v4 = vld [vmem:[#allocation2 + $0x3f0] sm:$0xff] }
  0xc6   : > { %1322 = vmatpush3.bf16.msra.mxu0 %v1321_v5  ;;  %1294 = vmatprep.subr.bf16.mxu1 %v1293_v6  ;;  %v791_v5 = vld [vmem:[#allocation2 + $0x3f8] sm:$0xff]  ;;  %v1351_v6 = vpack.c.bf16 %v773_v0, %v772_v63 }
  0xc7   : > { %1324 = vmatprep.subr.bf16.mxu0 %v1323_v10  ;;  %v806_v10 = vld [vmem:[#allocation2 + $0x470] sm:$0xff]  ;;  %v1353_v11 = vpack.c.bf16 %v791_v5, %v790_v4 }
  0xc9   : > { %1296 = vmatpush3.bf16.msra.mxu1 %v1295_v16  ;;  %v1385_v16 = vpack.c.bf16 %v807_v12, %v806_v10 }
  0xca   : > { %1326 = vmatpush3.bf16.msra.mxu0 %v1325_v20  ;;  %1298 = vmatprep.subr.bf16.mxu1 %v1297_v21  ;;  %v1357_v20 = vpack.c.bf16 %v793_v14, %v792_v13  ;;  %v776_v21 = vld [vmem:[#allocation2 + $0x380] sm:$0xff] }
  0xcb   : > { %1328 = vmatprep.subr.bf16.mxu0 %v1327_v26  ;;  %v1359_v26 = vpack.c.bf16 %v777_v22, %v776_v21 }
  0xcd   : > { %1300 = vmatpush3.bf16.msra.mxu1 %v1299_v32  ;;  %v780_v32 = vld [vmem:[#allocation2 + $0x3a0] sm:$0xff] }
  0xce   : > { %1330 = vmatpush3.bf16.msra.mxu0 %v1329_v33  ;;  %1302 = vmatprep.subr.bf16.mxu1 %v1301_v34  ;;  %v781_v33 = vld [vmem:[#allocation2 + $0x3a8] sm:$0xff]  ;;  %v798_v34 = vld [vmem:[#allocation2 + $0x430] sm:$0xff] }
  0xcf   : > { %1332 = vmatprep.subr.bf16.mxu0 %v1331_v37  ;;  %v1367_v35 = vpack.c.bf16 %v781_v33, %v780_v32  ;;  %v782_v37 = vld [vmem:[#allocation2 + $0x3b0] sm:$0xff] }
  0xd0   : > { %v1371_v41 = vpack.c.bf16 %v783_v38, %v782_v37 }
  0xd1   : > { %1304 = vmatpush3.bf16.msra.mxu1 %v1303_v42  ;;  %v1373_v42 = vpack.c.bf16 %v801_v40, %v800_v39 }
  0xd2   : > { %1334 = vmatpush3.bf16.msra.mxu0 %v1333_v43  ;;  %1343 = vmatprep.subr.bf16.mxu1 %v1458_v1  ;;  %v785_v43 = vld [vmem:[#allocation2 + $0x3c8] sm:$0xff] }
  0xd3   : > { %1336 = vmatprep.subr.bf16.mxu0 %v1335_v46 }
  0xd4   : > { %517 = vmatmul.mubr.f32.vlgmr.msra.gmra.mrb[2].mxu1 %v1550_v17 }
  0xd5   : > { %1345 = vmatpush3.bf16.msra.mxu1 %v1344_v51  ;;  %1221 = vmatprep.mubr.msk.f32.mxu1 %vm1459_vm0, %v1460_v23 }
  0xd6   : > { %1338 = vmatpush3.bf16.msra.mxu0 %v1337_v52  ;;  %1346 = vmatprep.subr.bf16.mxu1 %v1458_v1 }
  0xd7   : > { %1340 = vmatprep.subr.bf16.mxu0 %v1339_v56 }
  0xd9   : > { %1348 = vmatpush3.bf16.msra.mxu1 %v1347_v60 }
  0xda   : > { %1342 = vmatpush3.bf16.msra.mxu0 %v1341_v61  ;;  %1350 = vmatprep.subr.bf16.mxu1 %v1349_v62 }
  0xdb   : > { %1381 = vmatprep.subr.bf16.mxu0 %v1458_v1 }
  0xdc   : > { %1222 = vmatmul.mubr.msk.f32.vlgmr.msra.gmra.mrb[4].mxu1 %vm271_vm1, %v1554_v19 }
  0xdd   : > { %695 = vmatmul.mubr.f32.vlgmr.msra.gmra.mrb[4].mxu0 %v1550_v17  ;;  %1352 = vmatpush3.bf16.msra.mxu1 %v1351_v6 }
  0xde   : > { %872 = vmatprep.mubr.f32.mxu1 %v1552_v18  ;;  %1383 = vmatpush3.bf16.msra.mxu0 %v1382_v7  ;;  %v779_v18 = vld [vmem:[#allocation2 + $0x398] sm:$0xff] }
  0xdf   : > { %1354 = vmatprep.subr.bf16.mxu1 %v1353_v11  ;;  %1384 = vmatprep.subr.bf16.mxu0 %v1458_v1  ;;  %v1363_v31 = vpack.c.bf16 %v779_v18, %v778_v28  ;;  %v1365_v1 = vpack.c.bf16 %v797_v30, %v796_v29 }
  0xe0   : > { %1232 = vmatprep.mubr.msk.f32.mxu0 %vm1459_vm0, %v1460_v23  ;;  %v799_v23 = vld [vmem:[#allocation2 + $0x438] sm:$0xff] }
  0xe1   : > { %1356 = vmatpush3.bf16.msra.mxu1 %v1355_v15  ;;  %v1369_v36 = vpack.c.bf16 %v799_v23, %v798_v34 }
  0xe2   : > { %1386 = vmatpush3.bf16.msra.mxu0 %v1385_v16  ;;  %1358 = vmatprep.subr.bf16.mxu1 %v1357_v20 }
  0xe5   : > { %1360 = vmatpush3.bf16.msra.mxu1 %v1359_v26  ;;  %1233 = vmatmul.mubr.msk.f32.vlgmr.msra.gmra.mrb[6].mxu0 %vm271_vm1, %v1554_v19  ;;  %v784_v19 = vld [vmem:[#allocation2 + $0x3c0] sm:$0xff] }
  0xe6   : > { %1362 = vmatprep.subr.bf16.mxu1 %v1361_v27  ;;  %v1375_v46 = vpack.c.bf16 %v785_v43, %v784_v19 }
  0xe9   : > { %1364 = vmatpush3.bf16.msra.mxu1 %v1363_v31 }
  0xea   : > { %1366 = vmatprep.subr.bf16.mxu1 %v1365_v1 }
  0xed   : > { %1368 = vmatpush3.bf16.msra.mxu1 %v1367_v35 }
  0xee   : > { %1370 = vmatprep.subr.bf16.mxu1 %v1369_v36 }
  0xf1   : > { %1372 = vmatpush3.bf16.msra.mxu1 %v1371_v41 }
  0xf2   : > { %1374 = vmatprep.subr.bf16.mxu1 %v1373_v42 }
  0xf5   : > { %1376 = vmatpush3.bf16.msra.mxu1 %v1375_v46 }
  0xf6   : > { %1378 = vmatprep.subr.bf16.mxu1 %v1377_v47 }
  0xf9   : > { %1380 = vmatpush3.bf16.msra.mxu1 %v1379_v50 }
  0xfc   : > { %873 = vmatmul.mubr.f32.vlgmr.msra.gmra.mrb[6].mxu1 %v1550_v17 }
 0x187   : > { %v411_v51 = vpop.f32.mrb[0].mxu1 }
 0x188   : > { %v1063_v52 = vpop.f32.mrb[0].mxu0  ;;  %v1201_v53 = vpop.f32.mrb[1].mxu1 }
 0x189   : > { %v1064_v54 = vpop.f32.mrb[1].mxu0 }
 0x18a   : > { %v1065_v55 = vadd.f32 %v1064_v54, %v1063_v52 }
 0x18c   : > { %v412_v56 = vadd.f32 %v1065_v55, %v411_v51 }
 0x190   : > { %v588_v57 = vpop.f32.mrb[2].mxu0 }
 0x191   : > { %v1212_v58 = vpop.f32.mrb[3].mxu0 }
 0x1a7   : > { %v1103_v59 = vpop.f32.mrb[2].mxu1 }
 0x1a8   : > { %v1104_v60 = vpop.f32.mrb[3].mxu1 }
 0x1a9   : > { %v1105_v61 = vadd.f32 %v1104_v60, %v1103_v59 }
 0x1ab   : > { %v589_v62 = vadd.f32 %v1105_v61, %v588_v57 }
 0x1ad   : > { %v592_v63 = vmax.f32 %v412_v56, %v589_v62 }
 0x1af   : > { %v766_v0 = vpop.f32.mrb[4].mxu1 }
 0x1b0   : > { %v1143_v2 = vpop.f32.mrb[4].mxu0  ;;  %v1223_v3 = vpop.f32.mrb[5].mxu1 }
 0x1b1   : > { %v1144_v4 = vpop.f32.mrb[5].mxu0 }
 0x1b2   : > { %v1145_v5 = vadd.f32 %v1144_v4, %v1143_v2 }
 0x1b4   : > { %v767_v17 = vadd.f32 %v1145_v5, %v766_v0 }
 0x1b6   : > { %v770_v6 = vmax.f32 %v592_v63, %v767_v17 }
 0x1b8   : > { %v944_v7 = vpop.f32.mrb[6].mxu0 }
 0x1b9   : > { %v1234_v8 = vpop.f32.mrb[7].mxu0 }
 0x1cf   : > { %v1183_v9 = vpop.f32.mrb[6].mxu1 }
 0x1d0   : > { %v1184_v10 = vpop.f32.mrb[7].mxu1 }
 0x1d1   : > { %v1185_v11 = vadd.f32 %v1184_v10, %v1183_v9 }
 0x1d3   : > { %v945_v12 = vadd.f32 %v1185_v11, %v944_v7 }
 0x1d5   : > { %v948_v13 = vmax.f32 %v770_v6, %v945_v12 }
 0x1d7   : > { %950 = vst.msk [vmem:[%s210_s20] sm:$0xff] %vm949_vm2, %v948_v13 }
 0x1d8 PF: > { %s15_s15 = sadd.s32 1, %s1452_s15  }
 0x1d9   : > { %p12_p3 = scmp.ge.s32.totalorder %s15_s15, 4  }
 0x1db   :  { %14 = sbr.rel (!%p12_p3) target bundleno = 1 (0x1), region = 74 }
 0x1e2   :  { %970 = vsyncpa [#allocation3], 1 }
 0x1e3   :  { %972 = vsyncpa [#allocation3 + $0x1], 1 }

// kernel: vgg_forward.10
= control target key start
LH: loop header
LB: loop body
LE: loop exit
PB: predicated region body
PF: predicated region fallthrough
CT: control target
= control target key end

     0   :  { %s930_s18 = smov 0   ;;  %s1147_s0 = inlined_call_operand.vmem [shape: f32[2,16,42], index: 0, kind: input, shape index: {}]   ;;  %s1148_s1 = inlined_call_operand.vmem [shape: f32[64,144], index: 1, kind: input, shape index: {}]   ;;  %s1149_s2 = inlined_call_operand.vmem [shape: f32[64,1], index: 2, kind: input, shape index: {}]   ;;  %s1150_s3 = inlined_call_operand.vmem [shape: f32[2,64,24], index: 3, kind: output, shape index: {0}]   ;;  %s1151_s4 = inlined_call_operand.vmem [shape: f32[2,64,1], index: 4, kind: output, shape index: {1}]   ;;  %s1152_s5 = inlined_call_operand.vmem [shape: f32[2,64,1], index: 5, kind: output, shape index: {2}]  }
   0x1 LB: > { %s787_s19 = sadd.s32 4294967295, %s888_s18   ;;  %p791_p0 = scmp.ge.s32.totalorder %s888_s18, 1  ;;  %s888_s18 = sphi %s930_s18, %s16_s18  }
   0x2   : > { %p192_p1 = scmp.lt.s32.totalorder %s888_s18, 3 }
   0x4   : > { %p193_p2 = pnand %p791_p0, %p192_p1 }
   0x5   : > { %p230_p3 = scmp.lt.s32.totalorder (!%p193_p2), %s787_s19, 1  ;;  %v890_v0 = vmov (!%p193_p2), 0.0|0.0   ;;  %vm252_vm0 = vcmask (!%p193_p2), 195584   ;;  %s891_s24 = smov (!%p193_p2), 126   ;;  %v352_v6 = vld [vmem:[%s1148_s1 + $0x8] sm:$0xff] (!%p193_p2)  ;;  %vm433_vm1 = vcmask (!%p193_p2), 130048  }
   0x6   : > { %196 = sbr.rel (%p193_p2) target bundleno = 564 (0x234), region = 32  ;;  %817 = vmatprep.subr.bf16.mxu0 (!%p193_p2), %v890_v0  ;;  %844 = vmatprep.subr.bf16.mxu1 (!%p193_p2), %v890_v0  ;;  %s892_s25 = smov (!%p193_p2), 127   ;;  %v360_v7 = vld [vmem:[%s1148_s1 + $0x48] sm:$0xff] (!%p193_p2)  ;;  %v385_v9 = vld [vmem:[%s1149_s2] sm:$0xff] (!%p193_p2)  ;;  %v899_v10 = vmov (!%p193_p2), 0   ;;  %v387_v11 = vld [vmem:[%s1149_s2 + $0x10] sm:$0xff] (!%p193_p2) }
   0x7   : > { %s893_s26 = smov (!%p193_p2), 122   ;;  %s894_s27 = smov (!%p193_p2), 121   ;;  %800 = vmatprep.mubr.msk.f32.mxu0 (!%p193_p2), %vm433_vm1, %v352_v6  ;;  %804 = vmatprep.mubr.msk.f32.mxu1 (!%p193_p2), %vm433_vm1, %v360_v7  ;;  %v386_v8 = vld [vmem:[%s1149_s2 + $0x8] sm:$0xff] (!%p193_p2)  ;;  %v388_v12 = vld [vmem:[%s1149_s2 + $0x18] sm:$0xff] (!%p193_p2)  ;;  %v389_v13 = vld [vmem:[%s1149_s2 + $0x20] sm:$0xff] (!%p193_p2)  ;;  %v571_v7 = vlaneseq (!%p193_p2)  ;;  %vm617_vm6 = vcmask (!%p193_p2), 7168  }
   0x8   : > { %s895_s28 = smov (!%p193_p2), 120   ;;  %s896_s29 = smov (!%p193_p2), 116   ;;  %881 = vset.pattern.permute.xlu1 (!%p193_p2), %v899_v10  ;;  %880 = vset.pattern.permute.xlu0 (!%p193_p2), %v899_v10  ;;  %v390_v14 = vld [vmem:[%s1149_s2 + $0x28] sm:$0xff] (!%p193_p2)  ;;  %v391_v15 = vld [vmem:[%s1149_s2 + $0x30] sm:$0xff] (!%p193_p2)  ;;  %v392_v16 = vld [vmem:[%s1149_s2 + $0x38] sm:$0xff] (!%p193_p2) }
   0x9   : > { %s897_s30 = smov (!%p193_p2), 115   ;;  %s898_s6 = smov (!%p193_p2), 114   ;;  %v351_v57 = vld [vmem:[%s1148_s1] sm:$0xff] (!%p193_p2)  ;;  %v354_v59 = vld [vmem:[%s1148_s1 + $0x18] sm:$0xff] (!%p193_p2)  ;;  %v353_v61 = vld [vmem:[%s1148_s1 + $0x10] sm:$0xff] (!%p193_p2) }
   0xa   : > { %v359_v58 = vld [vmem:[%s1148_s1 + $0x40] sm:$0xff] (!%p193_p2)  ;;  %v362_v60 = vld [vmem:[%s1148_s1 + $0x58] sm:$0xff] (!%p193_p2)  ;;  %v361_v62 = vld [vmem:[%s1148_s1 + $0x50] sm:$0xff] (!%p193_p2) }
   0xb   : > { %v356_v63 = vld [vmem:[%s1148_s1 + $0x28] sm:$0xff] (!%p193_p2)  ;;  %v365_v6 = vld [vmem:[%s1148_s1 + $0x70] sm:$0xff] (!%p193_p2) }
   0xd   : > { %s1154_s19 = smov (!%p230_p3, %s787_s19), 1 }
   0xe   : > { %s813_s20 = sshll.u32 %s1154_s19, 4  ;;  %s1061_s9 = sshll.u32 %s1154_s19, 6 }
   0xf   : > { %s234_s23 = scalar_lea.vmem %s1147_s0, %s813_s20  ;;  %s1069_s12 = scalar_lea.vmem %s1150_s3, %s1061_s9 }
  0x10   : > { %v267_v1 = vld [vmem:[%s234_s23] sm:$0xff]  ;;  %v268_v2 = vld [vmem:[%s234_s23 + $0x8] sm:$0xff]  ;;  %s244_s14 = scalar_lea.vmem %s1151_s4, %s1061_s9  ;;  %s249_s17 = scalar_lea.vmem %s1152_s5, %s1061_s9 }
  0x11   : > { %271 = vrot.lane.b32.xlu1 %v267_v1, %s891_s24  ;;  %259 = vrot.lane.b32.xlu0 %v267_v1, %s892_s25  ;;  %253 = vst.msk [vmem:[#allocation2] sm:$0xff] %vm252_vm0, %v267_v1  ;;  %254 = vst.msk [vmem:[#allocation2 + $0x8] sm:$0xff] %vm252_vm0, %v268_v2 }
  0x15   : > { %273 = vrot.lane.b32.xlu1 %v268_v2, %s891_s24  ;;  %261 = vrot.lane.b32.xlu0 %v268_v2, %s892_s25 }
  0x18   : > { %v367_v3 = vld [vmem:[#allocation2] sm:$0xff]  ;;  %v368_v4 = vld [vmem:[#allocation2 + $0x8] sm:$0xff] }
  0x19   : > { %285 = vrot.lane.b32.xlu1 %v268_v2, %s893_s26  ;;  %283 = vrot.lane.b32.xlu0 %v267_v1, %s893_s26  ;;  %v818_v5 = vpack.c.bf16 %v368_v4, %v367_v3  ;;  %v358_v3 = vld [vmem:[%s1148_s1 + $0x38] sm:$0xff] }
  0x1a   : > { %v366_v4 = vld [vmem:[%s1148_s1 + $0x78] sm:$0xff] }
  0x1b   : > { %819 = vmatpush1.bf16.msra.mxu0 %v818_v5  ;;  %853 = vmatpush1.bf16.msra.mxu1 %v818_v5  ;;  %v357_v5 = vld [vmem:[%s1148_s1 + $0x30] sm:$0xff] }
  0x1c   : > { %820 = vmatprep.subr.bf16.mxu0 %v890_v0  ;;  %845 = vmatprep.subr.bf16.mxu1 %v890_v0 }
  0x1d   : > { %297 = vrot.lane.b32.xlu1 %v268_v2, %s894_s27  ;;  %295 = vrot.lane.b32.xlu0 %v267_v1, %s894_s27 }
  0x21   : > { %309 = vrot.lane.b32.xlu1 %v268_v2, %s895_s28  ;;  %307 = vrot.lane.b32.xlu0 %v267_v1, %s895_s28 }
  0x25   : > { %321 = vrot.lane.b32.xlu1 %v268_v2, %s896_s29  ;;  %319 = vrot.lane.b32.xlu0 %v267_v1, %s896_s29 }
  0x29   : > { %333 = vrot.lane.b32.xlu1 %v268_v2, %s897_s30  ;;  %331 = vrot.lane.b32.xlu0 %v267_v1, %s897_s30 }
  0x2d   : > { %345 = vrot.lane.b32.xlu1 %v268_v2, %s898_s6  ;;  %343 = vrot.lane.b32.xlu0 %v267_v1, %s898_s6  ;;  %v355_v1 = vld [vmem:[%s1148_s1 + $0x20] sm:$0xff] }
  0x2e   : > { %v363_v2 = vld [vmem:[%s1148_s1 + $0x60] sm:$0xff] }
  0x31   : > { %400 = vperm.xlu1 %881, %v386_v8   ;;  %395 = vperm.xlu0 %880, %v385_v9   ;;  %v572_v8 = vand.u32 127, %v571_v7 }
  0x33   : > { %v808_v9 = vadd.s32 4294967272, %v572_v8  ;;  %vm573_vm2 = vcmp.ge.s32.totalorder %v572_v8, 24 }
  0x35   : > { %405 = vperm.xlu1 %881, %v387_v11   ;;  %410 = vperm.xlu0 %880, %v388_v12   ;;  %v575_v10 = vsel %vm573_vm2, %v808_v9, %v572_v8 }
  0x36   : > { %v809_v11 = vadd.s32 4294967284, %v575_v10  ;;  %vm576_vm3 = vcmp.ge.s32.totalorder %v575_v10, 12 }
  0x39   : > { %415 = vperm.xlu1 %881, %v389_v13   ;;  %420 = vperm.xlu0 %880, %v390_v14   ;;  %v578_v13 = vsel %vm576_vm3, %v809_v11, %v575_v10 }
  0x3a   : > { %vm579_vm4 = vcmp.ge.s32.totalorder %v578_v13, 6 }
  0x3d   : > { %425 = vperm.xlu1 %881, %v391_v15   ;;  %430 = vperm.xlu0 %880, %v392_v16   ;;  %v810_v16 = vadd.s32 4294967290, %v578_v13 }
  0x83   : > { %v272_v17 = vpop.permute.xlu1 %271  ;;  %v260_v18 = vpop.permute.xlu0 %259 }
  0x84   : > { %277 = vst.msk [vmem:[#allocation2 + $0x20] sm:$0xff] %vm252_vm0, %v272_v17  ;;  %265 = vst.msk [vmem:[#allocation2 + $0x10] sm:$0xff] %vm252_vm0, %v260_v18  ;;  %v1063_v18 = vsel %vm579_vm4, %v810_v16, %v578_v13 }
  0x85   : > { %vm582_vm5 = vcmp.lt.s32.totalorder %v1063_v18, 4 }
  0x87   : > { %v274_v19 = vpop.permute.xlu1 %273  ;;  %v262_v20 = vpop.permute.xlu0 %261 }
  0x88   : > { %278 = vst.msk [vmem:[#allocation2 + $0x28] sm:$0xff] %vm252_vm0, %v274_v19  ;;  %266 = vst.msk [vmem:[#allocation2 + $0x18] sm:$0xff] %vm252_vm0, %v262_v20 }
  0x8b   : > { %v286_v21 = vpop.permute.xlu1 %285  ;;  %v284_v22 = vpop.permute.xlu0 %283  ;;  %v369_v23 = vld [vmem:[#allocation2 + $0x10] sm:$0xff]  ;;  %v371_v28 = vld [vmem:[#allocation2 + $0x20] sm:$0xff] }
  0x8c   : > { %290 = vst.msk [vmem:[#allocation2 + $0x38] sm:$0xff] %vm252_vm0, %v286_v21  ;;  %289 = vst.msk [vmem:[#allocation2 + $0x30] sm:$0xff] %vm252_vm0, %v284_v22 }
  0x8f   : > { %v370_v24 = vld [vmem:[#allocation2 + $0x18] sm:$0xff]  ;;  %v298_v25 = vpop.permute.xlu1 %297  ;;  %v296_v26 = vpop.permute.xlu0 %295  ;;  %v372_v29 = vld [vmem:[#allocation2 + $0x28] sm:$0xff] }
  0x90   : > { %v821_v27 = vpack.c.bf16 %v370_v24, %v369_v23  ;;  %302 = vst.msk [vmem:[#allocation2 + $0x48] sm:$0xff] %vm252_vm0, %v298_v25  ;;  %301 = vst.msk [vmem:[#allocation2 + $0x40] sm:$0xff] %vm252_vm0, %v296_v26  ;;  %v824_v34 = vpack.c.bf16 %v372_v29, %v371_v28 }
  0x92   : > { %822 = vmatpush1.bf16.msra.mxu0 %v821_v27  ;;  %854 = vmatpush1.bf16.msra.mxu1 %v821_v27 }
  0x93   : > { %823 = vmatprep.subr.bf16.mxu0 %v890_v0  ;;  %846 = vmatprep.subr.bf16.mxu1 %v890_v0  ;;  %v310_v30 = vpop.permute.xlu1 %309  ;;  %v308_v31 = vpop.permute.xlu0 %307  ;;  %v373_v32 = vld [vmem:[#allocation2 + $0x30] sm:$0xff]  ;;  %v374_v33 = vld [vmem:[#allocation2 + $0x38] sm:$0xff] }
  0x94   : > { %314 = vst.msk [vmem:[#allocation2 + $0x58] sm:$0xff] %vm252_vm0, %v310_v30  ;;  %313 = vst.msk [vmem:[#allocation2 + $0x50] sm:$0xff] %vm252_vm0, %v308_v31  ;;  %v827_v35 = vpack.c.bf16 %v374_v33, %v373_v32 }
  0x96   : > { %825 = vmatpush1.bf16.msra.mxu0 %v824_v34  ;;  %855 = vmatpush1.bf16.msra.mxu1 %v824_v34 }
  0x97   : > { %826 = vmatprep.subr.bf16.mxu0 %v890_v0  ;;  %847 = vmatprep.subr.bf16.mxu1 %v890_v0  ;;  %v322_v36 = vpop.permute.xlu1 %321  ;;  %v320_v37 = vpop.permute.xlu0 %319  ;;  %v375_v38 = vld [vmem:[#allocation2 + $0x40] sm:$0xff]  ;;  %v376_v39 = vld [vmem:[#allocation2 + $0x48] sm:$0xff] }
  0x98   : > { %326 = vst.msk [vmem:[#allocation2 + $0x68] sm:$0xff] %vm252_vm0, %v322_v36  ;;  %325 = vst.msk [vmem:[#allocation2 + $0x60] sm:$0xff] %vm252_vm0, %v320_v37  ;;  %v830_v40 = vpack.c.bf16 %v376_v39, %v375_v38 }
  0x9a   : > { %828 = vmatpush1.bf16.msra.mxu0 %v827_v35  ;;  %856 = vmatpush1.bf16.msra.mxu1 %v827_v35 }
  0x9b   : > { %829 = vmatprep.subr.bf16.mxu0 %v890_v0  ;;  %848 = vmatprep.subr.bf16.mxu1 %v890_v0  ;;  %v334_v41 = vpop.permute.xlu1 %333  ;;  %v332_v42 = vpop.permute.xlu0 %331  ;;  %v377_v43 = vld [vmem:[#allocation2 + $0x50] sm:$0xff]  ;;  %v378_v44 = vld [vmem:[#allocation2 + $0x58] sm:$0xff] }
  0x9c   : > { %338 = vst.msk [vmem:[#allocation2 + $0x78] sm:$0xff] %vm252_vm0, %v334_v41  ;;  %337 = vst.msk [vmem:[#allocation2 + $0x70] sm:$0xff] %vm252_vm0, %v332_v42  ;;  %v833_v45 = vpack.c.bf16 %v378_v44, %v377_v43 }
  0x9e   : > { %831 = vmatpush1.bf16.msra.mxu0 %v830_v40  ;;  %857 = vmatpush1.bf16.msra.mxu1 %v830_v40 }
  0x9f   : > { %832 = vmatprep.subr.bf16.mxu0 %v890_v0  ;;  %849 = vmatprep.subr.bf16.mxu1 %v890_v0  ;;  %v346_v46 = vpop.permute.xlu1 %345  ;;  %v344_v47 = vpop.permute.xlu0 %343  ;;  %v379_v48 = vld [vmem:[#allocation2 + $0x60] sm:$0xff]  ;;  %v380_v49 = vld [vmem:[#allocation2 + $0x68] sm:$0xff] }
  0xa0   : > { %350 = vst.msk [vmem:[#allocation2 + $0x88] sm:$0xff] %vm252_vm0, %v346_v46  ;;  %349 = vst.msk [vmem:[#allocation2 + $0x80] sm:$0xff] %vm252_vm0, %v344_v47  ;;  %v836_v50 = vpack.c.bf16 %v380_v49, %v379_v48 }
  0xa2   : > { %834 = vmatpush1.bf16.msra.mxu0 %v833_v45  ;;  %858 = vmatpush1.bf16.msra.mxu1 %v833_v45 }
  0xa3   : > { %835 = vmatprep.subr.bf16.mxu0 %v890_v0  ;;  %850 = vmatprep.subr.bf16.mxu1 %v890_v0  ;;  %v381_v51 = vld [vmem:[#allocation2 + $0x70] sm:$0xff]  ;;  %v382_v52 = vld [vmem:[#allocation2 + $0x78] sm:$0xff] }
  0xa4   : > { %v839_v53 = vpack.c.bf16 %v382_v52, %v381_v51 }
  0xa6   : > { %837 = vmatpush1.bf16.msra.mxu0 %v836_v50  ;;  %859 = vmatpush1.bf16.msra.mxu1 %v836_v50 }
  0xa7   : > { %838 = vmatprep.subr.bf16.mxu0 %v890_v0  ;;  %851 = vmatprep.subr.bf16.mxu1 %v890_v0  ;;  %v383_v54 = vld [vmem:[#allocation2 + $0x80] sm:$0xff]  ;;  %v384_v55 = vld [vmem:[#allocation2 + $0x88] sm:$0xff] }
  0xa8   : > { %v842_v56 = vpack.c.bf16 %v384_v55, %v383_v54 }
  0xaa   : > { %840 = vmatpush1.bf16.msra.mxu0 %v839_v53  ;;  %860 = vmatpush1.bf16.msra.mxu1 %v839_v53 }
  0xab   : > { %841 = vmatprep.subr.bf16.mxu0 %v890_v0  ;;  %852 = vmatprep.subr.bf16.mxu1 %v890_v0  ;;  %v364_v0 = vld [vmem:[%s1148_s1 + $0x68] sm:$0xff] }
  0xae   : > { %843 = vmatpush1.bf16.msra.mxu0 %v842_v56  ;;  %861 = vmatpush1.bf16.msra.mxu1 %v842_v56 }
  0xb0   : > { %v401_v12 = vpop.permute.xlu1 %400  ;;  %v396_v14 = vpop.permute.xlu0 %395 }
  0xb1   : > { %523 = vmatmul.mubr.f32.vlgmr.msra.gmra.mrb[0].mxu0 %v351_v57  ;;  %543 = vmatmul.mubr.f32.vlgmr.msra.gmra.mrb[0].mxu1 %v359_v58 }
  0xb2   : > { %801 = vmatprep.mubr.msk.f32.mxu0 %vm433_vm1, %v354_v59  ;;  %805 = vmatprep.mubr.msk.f32.mxu1 %vm433_vm1, %v362_v60 }
  0xb4   : > { %v406_v15 = vpop.permute.xlu1 %405  ;;  %v411_v17 = vpop.permute.xlu0 %410 }
  0xb5   : > { %528 = vmatmul.mubr.f32.gmra.mrb[2].mxu0 %v353_v61  ;;  %548 = vmatmul.mubr.f32.gmra.mrb[2].mxu1 %v361_v62 }
  0xb6   : > { %802 = vmatprep.mubr.msk.f32.mxu0 %vm433_vm1, %v356_v63  ;;  %806 = vmatprep.mubr.msk.f32.mxu1 %vm433_vm1, %v364_v0 }
  0xb8   : > { %v416_v19 = vpop.permute.xlu1 %415  ;;  %v421_v26 = vpop.permute.xlu0 %420 }
  0xb9   : > { %533 = vmatmul.mubr.f32.gmra.mrb[4].mxu0 %v355_v1  ;;  %553 = vmatmul.mubr.f32.gmra.mrb[4].mxu1 %v363_v2 }
  0xba   : > { %803 = vmatprep.mubr.msk.f32.mxu0 %vm433_vm1, %v358_v3  ;;  %807 = vmatprep.mubr.msk.f32.mxu1 %vm433_vm1, %v366_v4 }
  0xbc   : > { %v426_v38 = vpop.permute.xlu1 %425  ;;  %v431_v51 = vpop.permute.xlu0 %430 }
  0xbd   : > { %538 = vmatmul.mubr.f32.gmra.mrb[6].mxu0 %v357_v5  ;;  %558 = vmatmul.mubr.f32.gmra.mrb[6].mxu1 %v365_v6 }
 0x184   : > { %v524_v20 = vpop.f32.mrb[0].mxu0  ;;  %v544_v21 = vpop.f32.mrb[0].mxu1 }
 0x185   : > { %v525_v22 = vadd.f32 %v524_v20, %v396_v14  ;;  %v545_v23 = vadd.f32 %v544_v21, %v416_v19  ;;  %v526_v24 = vpop.f32.mrb[1].mxu0  ;;  %v546_v25 = vpop.f32.mrb[1].mxu1 }
 0x187   : > { %563 = vst.msk [vmem:[%s1069_s12] sm:$0xff] %vm252_vm0, %v525_v22  ;;  %567 = vst.msk [vmem:[%s1069_s12 + $0x20] sm:$0xff] %vm252_vm0, %v545_v23  ;;  %v589_v27 = vsel %vm582_vm5, %v545_v23, 0.0  ;;  %v585_v28 = vsel %vm582_vm5, %v525_v22, 0.0 }
 0x188   : > { %v529_v29 = vpop.f32.mrb[2].mxu0  ;;  %v549_v30 = vpop.f32.mrb[2].mxu1  ;;  %v605_v31 = vsel %vm252_vm0, %v589_v27, 0.0  ;;  %v593_v32 = vsel %vm252_vm0, %v585_v28, 0.0  ;;  %v626_v33 = vmul.f32 %v585_v28, %v525_v22  ;;  %v630_v45 = vmul.f32 %v589_v27, %v545_v23 }
 0x189   : > { %v530_v34 = vadd.f32 %v529_v29, %v401_v12  ;;  %v550_v35 = vadd.f32 %v549_v30, %v421_v26  ;;  %v551_v36 = vpop.f32.mrb[3].mxu1  ;;  %606 = vadd.xlane.f32.xlu0 %v605_v31  ;;  %594 = vadd.xlane.f32.xlu1 %v593_v32  ;;  %v531_v37 = vpop.f32.mrb[3].mxu0 }
 0x18a   : > { %v634_v43 = vsel %vm252_vm0, %v626_v33, 0.0  ;;  %v646_v54 = vsel %vm252_vm0, %v630_v45, 0.0 }
 0x18b   : > { %564 = vst.msk [vmem:[%s1069_s12 + $0x8] sm:$0xff] %vm252_vm0, %v530_v34  ;;  %568 = vst.msk [vmem:[%s1069_s12 + $0x28] sm:$0xff] %vm252_vm0, %v550_v35  ;;  %v590_v39 = vsel %vm582_vm5, %v550_v35, 0.0  ;;  %v586_v40 = vsel %vm582_vm5, %v530_v34, 0.0 }
 0x18c   : > { %v534_v41 = vpop.f32.mrb[4].mxu0  ;;  %v554_v42 = vpop.f32.mrb[4].mxu1  ;;  %v608_v44 = vsel %vm252_vm0, %v590_v39, 0.0  ;;  %v627_v46 = vmul.f32 %v586_v40, %v530_v34  ;;  %v631_v56 = vmul.f32 %v590_v39, %v550_v35  ;;  %v596_v61 = vsel %vm252_vm0, %v586_v40, 0.0 }
 0x18d   : > { %v535_v47 = vadd.f32 %v534_v41, %v406_v15  ;;  %v555_v48 = vadd.f32 %v554_v42, %v426_v38  ;;  %635 = vadd.xlane.f32.xlu0 %v634_v43  ;;  %609 = vadd.xlane.f32.xlu1 %v608_v44  ;;  %v536_v49 = vpop.f32.mrb[5].mxu0  ;;  %v556_v50 = vpop.f32.mrb[5].mxu1 }
 0x18e   : > { %v637_v55 = vsel %vm252_vm0, %v627_v46, 0.0  ;;  %v649_v62 = vsel %vm252_vm0, %v631_v56, 0.0 }
 0x18f   : > { %565 = vst.msk [vmem:[%s1069_s12 + $0x10] sm:$0xff] %vm252_vm0, %v535_v47  ;;  %569 = vst.msk [vmem:[%s1069_s12 + $0x30] sm:$0xff] %vm252_vm0, %v555_v48  ;;  %v587_v63 = vsel %vm582_vm5, %v535_v47, 0.0  ;;  %v591_v3 = vsel %vm582_vm5, %v555_v48, 0.0 }
 0x190   : > { %v539_v52 = vpop.f32.mrb[6].mxu0  ;;  %v559_v53 = vpop.f32.mrb[6].mxu1  ;;  %v599_v1 = vsel %vm252_vm0, %v587_v63, 0.0  ;;  %v611_v5 = vsel %vm252_vm0, %v591_v3, 0.0  ;;  %v628_v7 = vmul.f32 %v587_v63, %v535_v47  ;;  %v632_v11 = vmul.f32 %v591_v3, %v555_v48 }
 0x191   : > { %v540_v57 = vadd.f32 %v539_v52, %v411_v17  ;;  %v560_v58 = vadd.f32 %v559_v53, %v431_v51  ;;  %647 = vadd.xlane.f32.xlu0 %v646_v54  ;;  %638 = vadd.xlane.f32.xlu1 %v637_v55  ;;  %v541_v59 = vpop.f32.mrb[7].mxu0  ;;  %v561_v60 = vpop.f32.mrb[7].mxu1 }
 0x192   : > { %v640_v9 = vsel %vm252_vm0, %v628_v7, 0.0  ;;  %v652_v13 = vsel %vm252_vm0, %v632_v11, 0.0 }
 0x193   : > { %566 = vst.msk [vmem:[%s1069_s12 + $0x18] sm:$0xff] %vm252_vm0, %v540_v57  ;;  %570 = vst.msk [vmem:[%s1069_s12 + $0x38] sm:$0xff] %vm252_vm0, %v560_v58  ;;  %v588_v0 = vsel %vm582_vm5, %v540_v57, 0.0  ;;  %v592_v4 = vsel %vm582_vm5, %v560_v58, 0.0 }
 0x194   : > { %v602_v2 = vsel %vm252_vm0, %v588_v0, 0.0  ;;  %v614_v6 = vsel %vm252_vm0, %v592_v4, 0.0  ;;  %v629_v8 = vmul.f32 %v588_v0, %v540_v57  ;;  %v633_v12 = vmul.f32 %v592_v4, %v560_v58 }
 0x195   : > { %597 = vadd.xlane.f32.xlu0 %v596_v61  ;;  %650 = vadd.xlane.f32.xlu1 %v649_v62 }
 0x196   : > { %v643_v10 = vsel %vm252_vm0, %v629_v8, 0.0  ;;  %v655_v14 = vsel %vm252_vm0, %v633_v12, 0.0 }
 0x199   : > { %600 = vadd.xlane.f32.xlu0 %v599_v1  ;;  %603 = vadd.xlane.f32.xlu1 %v602_v2 }
 0x19d   : > { %612 = vadd.xlane.f32.xlu0 %v611_v5  ;;  %615 = vadd.xlane.f32.xlu1 %v614_v6 }
 0x1a1   : > { %641 = vadd.xlane.f32.xlu0 %v640_v9  ;;  %644 = vadd.xlane.f32.xlu1 %v643_v10 }
 0x1a5   : > { %653 = vadd.xlane.f32.xlu0 %v652_v13  ;;  %656 = vadd.xlane.f32.xlu1 %v655_v14 }
 0x216   : > { %v607_v15 = vpop.xlane.xlu0 %606  ;;  %v595_v16 = vpop.xlane.xlu1 %594 }
 0x217   : > { %622 = vst.msk [vmem:[%s244_s14 + $0x20] sm:$0xff] %vm617_vm6, %v607_v15  ;;  %618 = vst.msk [vmem:[%s244_s14] sm:$0xff] %vm617_vm6, %v595_v16 }
 0x21a   : > { %v636_v17 = vpop.xlane.xlu0 %635  ;;  %v610_v18 = vpop.xlane.xlu1 %609 }
 0x21b   : > { %658 = vst.msk [vmem:[%s249_s17] sm:$0xff] %vm617_vm6, %v636_v17  ;;  %623 = vst.msk [vmem:[%s244_s14 + $0x28] sm:$0xff] %vm617_vm6, %v610_v18 }
 0x21e   : > { %v648_v19 = vpop.xlane.xlu0 %647  ;;  %v639_v20 = vpop.xlane.xlu1 %638 }
 0x21f   : > { %662 = vst.msk [vmem:[%s249_s17 + $0x20] sm:$0xff] %vm617_vm6, %v648_v19  ;;  %659 = vst.msk [vmem:[%s249_s17 + $0x8] sm:$0xff] %vm617_vm6, %v639_v20 }
 0x222   : > { %v598_v21 = vpop.xlane.xlu0 %597  ;;  %v651_v22 = vpop.xlane.xlu1 %650 }
 0x223   : > { %619 = vst.msk [vmem:[%s244_s14 + $0x8] sm:$0xff] %vm617_vm6, %v598_v21  ;;  %663 = vst.msk [vmem:[%s249_s17 + $0x28] sm:$0xff] %vm617_vm6, %v651_v22 }
 0x226   : > { %v601_v23 = vpop.xlane.xlu0 %600  ;;  %v604_v24 = vpop.xlane.xlu1 %603 }
 0x227   : > { %620 = vst.msk [vmem:[%s244_s14 + $0x10] sm:$0xff] %vm617_vm6, %v601_v23  ;;  %621 = vst.msk [vmem:[%s244_s14 + $0x18] sm:$0xff] %vm617_vm6, %v604_v24 }
 0x22a   : > { %v613_v25 = vpop.xlane.xlu0 %612  ;;  %v616_v26 = vpop.xlane.xlu1 %615 }
 0x22b   : > { %624 = vst.msk [vmem:[%s244_s14 + $0x30] sm:$0xff] %vm617_vm6, %v613_v25  ;;  %625 = vst.msk [vmem:[%s244_s14 + $0x38] sm:$0xff] %vm617_vm6, %v616_v26 }
 0x22e   : > { %v642_v27 = vpop.xlane.xlu0 %641  ;;  %v645_v28 = vpop.xlane.xlu1 %644 }
 0x22f   : > { %660 = vst.msk [vmem:[%s249_s17 + $0x10] sm:$0xff] %vm617_vm6, %v642_v27  ;;  %661 = vst.msk [vmem:[%s249_s17 + $0x18] sm:$0xff] %vm617_vm6, %v645_v28 }
 0x232   : > { %v654_v29 = vpop.xlane.xlu0 %653  ;;  %v657_v30 = vpop.xlane.xlu1 %656 }
 0x233   : > { %664 = vst.msk [vmem:[%s249_s17 + $0x30] sm:$0xff] %vm617_vm6, %v654_v29  ;;  %665 = vst.msk [vmem:[%s249_s17 + $0x38] sm:$0xff] %vm617_vm6, %v657_v30 }
 0x234 PF: > { %s16_s18 = sadd.s32 1, %s888_s18  }
 0x235   : > { %p13_p4 = scmp.ge.s32.totalorder %s16_s18, 4  }
 0x237   :  { %15 = sbr.rel (!%p13_p4) target bundleno = 1 (0x1), region = 86 }

// kernel: vgg_forward.11
= control target key start
LH: loop header
LB: loop body
LE: loop exit
PB: predicated region body
PF: predicated region fallthrough
CT: control target
= control target key end

     0   :  { %s658_s18 = smov 0   ;;  %s782_s0 = inlined_call_operand.vmem [shape: f32[2,64,24], index: 0, kind: input, shape index: {}]   ;;  %s783_s1 = inlined_call_operand.vmem [shape: f32[64,1], index: 1, kind: input, shape index: {}]   ;;  %s784_s2 = inlined_call_operand.vmem [shape: f32[64,1], index: 2, kind: input, shape index: {}]   ;;  %s785_s3 = inlined_call_operand.vmem [shape: f32[10,64], index: 3, kind: input, shape index: {}]   ;;  %s786_s4 = inlined_call_operand.vmem [shape: f32[10,1], index: 4, kind: input, shape index: {}]   ;;  %s787_s5 = inlined_call_operand.vmem [shape: f32[2,10,1], index: 5, kind: output, shape index: {}]  }
   0x1 LB: > { %s545_s19 = sadd.s32 4294967295, %s625_s18   ;;  %p549_p0 = scmp.ge.s32.totalorder %s625_s18, 1  ;;  %s625_s18 = sphi %s658_s18, %s15_s18  }
   0x2   : > { %p187_p1 = scmp.lt.s32.totalorder %s625_s18, 3 }
   0x4   : > { %p188_p2 = pnand %p549_p0, %p187_p1 }
   0x5   : > { %v289_v0 = vld [vmem:[%s784_s2] sm:$0xff] (!%p188_p2)  ;;  %v627_v2 = vmov (!%p188_p2), 0   ;;  %v290_v3 = vld [vmem:[%s784_s2 + $0x8] sm:$0xff] (!%p188_p2)  ;;  %v236_v5 = vld [vmem:[%s783_s1 + $0x18] sm:$0xff] (!%p188_p2)  ;;  %v353_v17 = vlaneseq (!%p188_p2)  ;;  %p215_p3 = scmp.lt.s32.totalorder (!%p188_p2), %s545_s19, 1  ;;  %vm375_vm4 = vcmask (!%p188_p2), 195584  }
   0x6   : > { %191 = sbr.rel (%p188_p2) target bundleno = 533 (0x215), region = 40  ;;  %v233_v1 = vld [vmem:[%s783_s1] sm:$0xff] (!%p188_p2)  ;;  %618 = vset.pattern.permute.xlu1 (!%p188_p2), %v627_v2  ;;  %617 = vset.pattern.permute.xlu0 (!%p188_p2), %v627_v2  ;;  %v234_v4 = vld [vmem:[%s783_s1 + $0x8] sm:$0xff] (!%p188_p2)  ;;  %v235_v6 = vld [vmem:[%s783_s1 + $0x10] sm:$0xff] (!%p188_p2)  ;;  %vm404_vm5 = vcmask (!%p188_p2), 523264   ;;  %vm488_vm6 = vcmask (!%p188_p2), 1024  }
   0x7   : > { %299 = vperm.xlu1 (!%p188_p2), %618, %v289_v0   ;;  %243 = vperm.xlu0 (!%p188_p2), %617, %v233_v1   ;;  %v292_v7 = vld [vmem:[%s784_s2 + $0x18] sm:$0xff] (!%p188_p2)  ;;  %v291_v8 = vld [vmem:[%s784_s2 + $0x10] sm:$0xff] (!%p188_p2)  ;;  %v238_v9 = vld [vmem:[%s783_s1 + $0x28] sm:$0xff] (!%p188_p2)  ;;  %v354_v18 = vand.u32 (!%p188_p2), 127, %v353_v17  ;;  %vm486_vm7 = vcmask (!%p188_p2), 7168  }
   0x8   : > { %v237_v10 = vld [vmem:[%s783_s1 + $0x20] sm:$0xff] (!%p188_p2)  ;;  %v294_v11 = vld [vmem:[%s784_s2 + $0x28] sm:$0xff] (!%p188_p2)  ;;  %v240_v13 = vld [vmem:[%s783_s1 + $0x38] sm:$0xff] (!%p188_p2) }
   0x9   : > { %v293_v12 = vld [vmem:[%s784_s2 + $0x20] sm:$0xff] (!%p188_p2)  ;;  %v239_v14 = vld [vmem:[%s783_s1 + $0x30] sm:$0xff] (!%p188_p2)  ;;  %v296_v15 = vld [vmem:[%s784_s2 + $0x38] sm:$0xff] (!%p188_p2)  ;;  %v554_v19 = vadd.s32 (!%p188_p2), 4294967272, %v354_v18  ;;  %vm355_vm0 = vcmp.ge.s32.totalorder (!%p188_p2), %v354_v18, 24 }
   0xa   : > { %v295_v16 = vld [vmem:[%s784_s2 + $0x30] sm:$0xff] (!%p188_p2) }
   0xb   : > { %304 = vperm.xlu1 (!%p188_p2), %618, %v290_v3   ;;  %248 = vperm.xlu0 (!%p188_p2), %617, %v234_v4   ;;  %v357_v20 = vsel (!%p188_p2), %vm355_vm0, %v554_v19, %v354_v18 }
   0xc   : > { %v555_v21 = vadd.s32 (!%p188_p2), 4294967284, %v357_v20  ;;  %vm358_vm1 = vcmp.ge.s32.totalorder (!%p188_p2), %v357_v20, 12 }
   0xd   : > { %s789_s19 = smov (!%p215_p3, %s545_s19), 1 }
   0xe   : > { %s561_s29 = sshll.u32 %s789_s19, 6  ;;  %v360_v22 = vsel %vm358_vm1, %v555_v21, %v357_v20  ;;  %s562_s12 = sshll.u32 %s789_s19, 4 }
   0xf   : > { %258 = vperm.xlu1 %618, %v236_v5   ;;  %253 = vperm.xlu0 %617, %v235_v6   ;;  %s724_s7 = scalar_lea.vmem %s782_s0, %s561_s29  ;;  %v556_v23 = vadd.s32 4294967290, %v360_v22  ;;  %vm361_vm2 = vcmp.ge.s32.totalorder %v360_v22, 6  ;;  %s224_s21 = scalar_lea.vmem %s787_s5, %s562_s12 }
  0x10   : > { %v225_v24 = vld [vmem:[%s724_s7] sm:$0xff]  ;;  %v226_v29 = vld [vmem:[%s724_s7 + $0x8] sm:$0xff]  ;;  %v228_v38 = vld [vmem:[%s724_s7 + $0x18] sm:$0xff] }
  0x11   : > { %v727_v28 = vsel %vm361_vm2, %v556_v23, %v360_v22  ;;  %v227_v40 = vld [vmem:[%s724_s7 + $0x10] sm:$0xff]  ;;  %v230_v54 = vld [vmem:[%s724_s7 + $0x28] sm:$0xff]  ;;  %v229_v56 = vld [vmem:[%s724_s7 + $0x20] sm:$0xff] }
  0x12   : > { %vm364_vm3 = vcmp.lt.s32.totalorder %v727_v28, 4  ;;  %v232_v6 = vld [vmem:[%s724_s7 + $0x38] sm:$0xff] }
  0x13   : > { %314 = vperm.xlu1 %618, %v292_v7   ;;  %309 = vperm.xlu0 %617, %v291_v8   ;;  %v231_v8 = vld [vmem:[%s724_s7 + $0x30] sm:$0xff] }
  0x17   : > { %268 = vperm.xlu1 %618, %v238_v9   ;;  %263 = vperm.xlu0 %617, %v237_v10  }
  0x1b   : > { %324 = vperm.xlu1 %618, %v294_v11   ;;  %319 = vperm.xlu0 %617, %v293_v12  }
  0x1f   : > { %278 = vperm.xlu1 %618, %v240_v13   ;;  %273 = vperm.xlu0 %617, %v239_v14  }
  0x23   : > { %334 = vperm.xlu1 %618, %v296_v15   ;;  %329 = vperm.xlu0 %617, %v295_v16  }
  0x86   : > { %v300_v25 = vpop.permute.xlu1 %299  ;;  %v244_v26 = vpop.permute.xlu0 %243 }
  0x87   : > { %v281_v27 = vmul.f32 %v244_v26, %v225_v24 }
  0x89   : > { %v337_v30 = vadd.f32 %v300_v25, %v281_v27  ;;  %v400_v25 = vld [vmem:[%s785_s3] sm:$0xff] }
  0x8a   : > { %v305_v31 = vpop.permute.xlu1 %304  ;;  %v249_v32 = vpop.permute.xlu0 %248  ;;  %589 = vmatprep.mubr.msk.f32.mxu0 %vm404_vm5, %v400_v25 }
  0x8b   : > { %v345_v33 = vmax.f32 %v337_v30, 0.0  ;;  %v282_v34 = vmul.f32 %v249_v32, %v226_v29 }
  0x8d   : > { %v338_v35 = vadd.f32 %v305_v31, %v282_v34  ;;  %v367_v36 = vsel %vm364_vm3, %v345_v33, 0.0 }
  0x8e   : > { %v259_v37 = vpop.permute.xlu1 %258  ;;  %v254_v39 = vpop.permute.xlu0 %253  ;;  %v376_v41 = vsel %vm375_vm4, %v367_v36, -inf }
  0x8f   : > { %v346_v42 = vmax.f32 %v338_v35, 0.0  ;;  %377 = vmax.xlane.f32.xlu0 %v376_v41  ;;  %v284_v43 = vmul.f32 %v259_v37, %v228_v38  ;;  %v283_v44 = vmul.f32 %v254_v39, %v227_v40  ;;  %v401_v38 = vld [vmem:[%s785_s3 + $0x8] sm:$0x3]  ;;  %v402_v40 = vld [vmem:[%s786_s4] sm:$0xff] }
  0x90   : > { %v403_v39 = vld [vmem:[%s786_s4 + $0x8] sm:$0x3] }
  0x91   : > { %v368_v45 = vsel %vm364_vm3, %v346_v42, 0.0 }
  0x92   : > { %v315_v46 = vpop.permute.xlu1 %314  ;;  %v310_v47 = vpop.permute.xlu0 %309  ;;  %v379_v48 = vsel %vm375_vm4, %v368_v45, -inf }
  0x93   : > { %v340_v49 = vadd.f32 %v315_v46, %v284_v43  ;;  %v339_v50 = vadd.f32 %v310_v47, %v283_v44  ;;  %380 = vmax.xlane.f32.xlu1 %v379_v48 }
  0x95   : > { %v348_v51 = vmax.f32 %v340_v49, 0.0  ;;  %v347_v52 = vmax.f32 %v339_v50, 0.0 }
  0x96   : > { %v269_v53 = vpop.permute.xlu1 %268  ;;  %v264_v55 = vpop.permute.xlu0 %263 }
  0x97   : > { %v369_v57 = vsel %vm364_vm3, %v347_v52, 0.0  ;;  %v286_v59 = vmul.f32 %v269_v53, %v230_v54  ;;  %v285_v60 = vmul.f32 %v264_v55, %v229_v56  ;;  %v370_v61 = vsel %vm364_vm3, %v348_v51, 0.0 }
  0x98   : > { %v382_v58 = vsel %vm375_vm4, %v369_v57, -inf  ;;  %v385_v2 = vsel %vm375_vm4, %v370_v61, -inf }
  0x99   : > { %383 = vmax.xlane.f32.xlu0 %v382_v58 }
  0x9a   : > { %v325_v62 = vpop.permute.xlu1 %324  ;;  %v320_v63 = vpop.permute.xlu0 %319 }
  0x9b   : > { %v342_v0 = vadd.f32 %v325_v62, %v286_v59  ;;  %v341_v1 = vadd.f32 %v320_v63, %v285_v60 }
  0x9d   : > { %v350_v3 = vmax.f32 %v342_v0, 0.0  ;;  %v349_v4 = vmax.f32 %v341_v1, 0.0  ;;  %386 = vmax.xlane.f32.xlu0 %v385_v2 }
  0x9e   : > { %v279_v5 = vpop.permute.xlu1 %278  ;;  %v274_v7 = vpop.permute.xlu0 %273 }
  0x9f   : > { %v371_v9 = vsel %vm364_vm3, %v349_v4, 0.0  ;;  %v372_v10 = vsel %vm364_vm3, %v350_v3, 0.0  ;;  %v288_v13 = vmul.f32 %v279_v5, %v232_v6  ;;  %v287_v14 = vmul.f32 %v274_v7, %v231_v8 }
  0xa0   : > { %v388_v11 = vsel %vm375_vm4, %v371_v9, -inf  ;;  %v391_v12 = vsel %vm375_vm4, %v372_v10, -inf }
  0xa1   : > { %389 = vmax.xlane.f32.xlu1 %v388_v11  ;;  %392 = vmax.xlane.f32.xlu0 %v391_v12 }
  0xa2   : > { %v335_v15 = vpop.permute.xlu1 %334  ;;  %v330_v16 = vpop.permute.xlu0 %329 }
  0xa3   : > { %v344_v17 = vadd.f32 %v335_v15, %v288_v13  ;;  %v343_v18 = vadd.f32 %v330_v16, %v287_v14 }
  0xa5   : > { %v352_v19 = vmax.f32 %v344_v17, 0.0  ;;  %v351_v20 = vmax.f32 %v343_v18, 0.0 }
  0xa7   : > { %v373_v21 = vsel %vm364_vm3, %v351_v20, 0.0  ;;  %v374_v22 = vsel %vm364_vm3, %v352_v19, 0.0 }
  0xa8   : > { %v394_v23 = vsel %vm375_vm4, %v373_v21, -inf  ;;  %v397_v24 = vsel %vm375_vm4, %v374_v22, -inf }
  0xa9   : > { %395 = vmax.xlane.f32.xlu1 %v394_v23  ;;  %398 = vmax.xlane.f32.xlu0 %v397_v24 }
 0x11c   : > { %v378_v26 = vpop.xlane.xlu0 %377 }
 0x120   : > { %v381_v27 = vpop.xlane.xlu1 %380 }
 0x121   : > { %v592_v29 = vpack.c.bf16 %v381_v27, %v378_v26 }
 0x123   : > { %593 = vmatprep.subr.bf16.mxu0 %v592_v29 }
 0x124   : > { %595 = vmatpush3.bf16.msra.mxu0 %v592_v29 }
 0x126   : > { %v384_v28 = vpop.xlane.xlu0 %383 }
 0x12a   : > { %v387_v30 = vpop.xlane.xlu0 %386 }
 0x12b   : > { %v596_v31 = vpack.c.bf16 %v387_v30, %v384_v28 }
 0x12d   : > { %597 = vmatprep.subr.bf16.mxu0 %v596_v31 }
 0x12e   : > { %v390_v32 = vpop.xlane.xlu1 %389  ;;  %599 = vmatpush3.bf16.msra.mxu0 %v596_v31  ;;  %v393_v33 = vpop.xlane.xlu0 %392 }
 0x12f   : > { %v600_v34 = vpack.c.bf16 %v393_v33, %v390_v32 }
 0x131   : > { %601 = vmatprep.subr.bf16.mxu0 %v600_v34 }
 0x132   : > { %603 = vmatpush3.bf16.msra.mxu0 %v600_v34 }
 0x136   : > { %v396_v35 = vpop.xlane.xlu1 %395  ;;  %v399_v36 = vpop.xlane.xlu0 %398 }
 0x137   : > { %v604_v37 = vpack.c.bf16 %v399_v36, %v396_v35 }
 0x139   : > { %605 = vmatprep.subr.bf16.mxu0 %v604_v37 }
 0x13a   : > { %607 = vmatpush3.bf16.msra.mxu0 %v604_v37 }
 0x13d   : > { %590 = vmatmul.mubr.msk.f32.vlgmr.msra.gmra.mrb[0].mxu0 %vm404_vm5, %v401_v38 }
 0x210   : > { %v591_v41 = vpop.f32.mrb[0].mxu0 }
 0x211   : > { %v483_v42 = vadd.f32 %v591_v41, %v403_v39  ;;  %v477_v43 = vpop.f32.mrb[1].mxu0 }
 0x212   : > { %v478_v44 = vadd.f32 %v477_v43, %v402_v40 }
 0x213   : > { %489 = vst.msk [vmem:[%s224_s21 + $0x8] sm:$0x3] %vm488_vm6, %v483_v42 }
 0x214   : > { %487 = vst.msk [vmem:[%s224_s21] sm:$0xff] %vm486_vm7, %v478_v44 }
 0x215 PF: > { %s15_s18 = sadd.s32 1, %s625_s18  }
 0x216   : > { %p12_p4 = scmp.ge.s32.totalorder %s15_s18, 4  }
 0x218   :  { %14 = sbr.rel (!%p12_p4) target bundleno = 1 (0x1), region = 70 }

</bundles_post_ra>
